<compile_context>
chip_gen: v6e
topology: v6e:2x2x1
jax: 0.10.0
libtpu: 0.0.40
codegen_flags: <defaults>
</compile_context>

<pallas_src>
import jax
import jax.numpy as jnp
from jax.experimental import pallas as pl
from jax.experimental.pallas import tpu as pltpu

# size_dict['small'] = [512, 512, 256], n_classes = 2  (gate=True, dropout=False)
L_IN = 512     # size[0]
L_HID = 512    # size[1]
D_ATT = 256    # size[2]
N_CLASSES = 2


def _make_kernel(n_valid: int, tile: int):
    """Build the kernel closure (n_valid = real #instances, tile = rows per grid step)."""

    def kernel(h_ref, w1_ref, b1_ref, wa_ref, ba_ref, wb_ref, bb_ref,
               wc_ref, bc_ref, wcls_ref, bcls_ref,
               logits_ref, prob_ref, yhat_ref, araw_ref,
               m_ref, l_ref, acc_ref):
        step = pl.program_id(0)

        # ---- init running stats on the first tile ----
        @pl.when(step == 0)
        def _():
            m_ref[...] = jnp.full_like(m_ref, -jnp.inf)
            l_ref[...] = jnp.zeros_like(l_ref)
            acc_ref[...] = jnp.zeros_like(acc_ref)

        # ---- fc: Linear(512,512) + ReLU   (bf16 MXU inputs, f32 accumulation) ----
        h1 = jnp.dot(h_ref[...], w1_ref[...],
                     preferred_element_type=jnp.float32) + b1_ref[...]
        h1 = jnp.maximum(h1, 0.0)                              # (tile, 512) f32
        h1_bf = h1.astype(jnp.bfloat16)

        # ---- Attn_Net_Gated (elementwise math kept in f32 for VPU/EUP) ----
        a = jnp.tanh(jnp.dot(h1_bf, wa_ref[...],
                             preferred_element_type=jnp.float32) + ba_ref[...])
        b = jax.nn.sigmoid(jnp.dot(h1_bf, wb_ref[...],
                                   preferred_element_type=jnp.float32) + bb_ref[...])
        gated = a * b                                          # (tile, 256) f32

        # attention_c: contract (1,256) x (tile,256) -> lane-dense (1, tile) scores
        scores = jax.lax.dot_general(
            wc_ref[...], gated, (((1,), (1,)), ((), ())),
            preferred_element_type=jnp.float32) + bc_ref[...]  # (1, tile)
        araw_ref[...] = scores                                 # lane-dense A_raw block

        # ---- online softmax over instances (mask padded lanes) ----
        lane = jax.lax.broadcasted_iota(jnp.int32, (1, tile), 1) + step * tile
        s = jnp.where(lane < n_valid, scores, -jnp.inf)

        m_old = m_ref[...]                                     # (1,1)
        m_new = jnp.maximum(m_old, jnp.max(s, axis=-1, keepdims=True))
        alpha = jnp.exp(m_old - m_new)                         # (1,1)
        p = jnp.exp(s - m_new)                                 # (1, tile)
        l_ref[...] = alpha * l_ref[...] + jnp.sum(p, axis=-1, keepdims=True)
        # pooled features on the MXU: (1, tile) @ (tile, 512), f32 for accuracy
        acc_ref[...] = alpha * acc_ref[...] + jnp.dot(
            p, h1, preferred_element_type=jnp.float32)
        m_ref[...] = m_new

        # ---- epilogue on the last grid step ----
        @pl.when(step == pl.num_programs(0) - 1)
        def _():
            m_pool = acc_ref[...] / l_ref[...]                 # (1,512) == softmax(A) @ h1
            logits = jnp.dot(m_pool, wcls_ref[...],
                             preferred_element_type=jnp.float32) + bcls_ref[...]
            logits_ref[...] = logits                           # (1, 2)

            lmax = jnp.max(logits, axis=-1, keepdims=True)
            le = jnp.exp(logits - lmax)
            prob_ref[...] = le / jnp.sum(le, axis=-1, keepdims=True)

            # Y_hat = topk(logits, 1)[1]  (argmax, lowest index on ties)
            idx = jax.lax.broadcasted_iota(jnp.int32, logits.shape, 1)
            yhat_ref[...] = jnp.min(
                jnp.where(logits == lmax, idx, jnp.int32(logits.shape[-1])),
                axis=-1, keepdims=True).astype(jnp.int32)

    return kernel


def iefmil_forward(h, params, *, tile=256):
    """Returns (logits, Y_prob, Y_hat, A_raw, results_dict), matching the PyTorch module."""
    N = h.shape[0]
    grid_n = pl.cdiv(N, tile)
    n_pad = grid_n * tile
    if n_pad != N:
        h = jnp.pad(h, ((0, n_pad - N), (0, 0)))

    # bf16 for the streaming input and the big resident weights (MXU-native);
    # biases, the tiny attention_c / classifier weights and all accumulation stay f32.
    h_bf = h.astype(jnp.bfloat16)
    w1 = params["w1"].astype(jnp.bfloat16)
    wa = params["wa"].astype(jnp.bfloat16)
    wb = params["wb"].astype(jnp.bfloat16)

    def const_spec(shape):
        return pl.BlockSpec(shape, lambda i: (0, 0))

    in_specs = [
        pl.BlockSpec((tile, L_IN), lambda i: (i, 0)),       # h: streamed per tile
        const_spec((L_IN, L_HID)), const_spec((1, L_HID)),  # w1, b1   (resident)
        const_spec((L_HID, D_ATT)), const_spec((1, D_ATT)), # wa, ba
        const_spec((L_HID, D_ATT)), const_spec((1, D_ATT)), # wb, bb
        const_spec((1, D_ATT)), const_spec((1, 1)),         # wc, bc
        const_spec((L_HID, N_CLASSES)), const_spec((1, N_CLASSES)),  # wcls, bcls
    ]
    out_shape = (
        jax.ShapeDtypeStruct((1, N_CLASSES), jnp.float32),  # logits
        jax.ShapeDtypeStruct((1, N_CLASSES), jnp.float32),  # Y_prob
        jax.ShapeDtypeStruct((1, 1), jnp.int32),            # Y_hat
        jax.ShapeDtypeStruct((1, n_pad), jnp.float32),      # A_raw (lane-dense row)
    )
    out_specs = (
        pl.BlockSpec((1, N_CLASSES), lambda i: (0, 0)),
        pl.BlockSpec((1, N_CLASSES), lambda i: (0, 0)),
        pl.BlockSpec((1, 1), lambda i: (0, 0)),
        pl.BlockSpec((1, tile), lambda i: (0, i)),
    )
    scratch_shapes = [
        pltpu.VMEM((1, 1), jnp.float32),       # running max
        pltpu.VMEM((1, 1), jnp.float32),       # running exp-sum
        pltpu.VMEM((1, L_HID), jnp.float32),   # running weighted-sum of h1
    ]

    logits, y_prob, y_hat, a_raw_pad = pl.pallas_call(
        _make_kernel(N, tile),
        out_shape=out_shape,
        grid_spec=pltpu.PrefetchScalarGridSpec(
            num_scalar_prefetch=0,
            grid=(grid_n,),
            in_specs=in_specs,
            out_specs=out_specs,
            scratch_shapes=scratch_shapes),
        compiler_params=pltpu.CompilerParams(
            dimension_semantics=("arbitrary",),          # instance axis is a reduction
            vmem_limit_bytes=32 * 1024 * 1024),          # fits v5e/v6e/v7x budgets
    )(h_bf, w1, params["b1"], wa, params["ba"], wb, params["bb"],
      params["wc"], params["bc"], params["wcls"], params["bcls"])

    a_raw = a_raw_pad[:, :N]    # drop the tile padding
    results_dict = {}
    return logits, y_prob, y_hat, a_raw, results_dict


def iefmil_reference(h, params):
    """Pure-JAX f32 reference of the PyTorch forward (for a sanity check)."""
    h1 = jnp.maximum(h @ params["w1"] + params["b1"], 0.0)
    a = jnp.tanh(h1 @ params["wa"] + params["ba"])
    b = jax.nn.sigmoid(h1 @ params["wb"] + params["bb"])
    gated = a * b
    scores = gated @ params["wc"].T + params["bc"]      # (N, 1)
    a_raw = scores.T                                     # (1, N)
    att = jax.nn.softmax(a_raw, axis=1)
    m = att @ h1                                         # (1, 512)
    logits = m @ params["wcls"] + params["bcls"]
    y_prob = jax.nn.softmax(logits, axis=1)
    y_hat = jnp.argmax(logits, axis=1, keepdims=True).astype(jnp.int32)
    return logits, y_prob, y_hat, a_raw


def init_params(key):
    """Deterministic synthetic parameters; Linear weights stored as [in, out]."""
    ks = jax.random.split(key, 10)
    s = 0.02
    return {
        "w1":   s * jax.random.normal(ks[0], (L_IN, L_HID), jnp.float32),
        "b1":   0.01 * jax.random.normal(ks[1], (1, L_HID), jnp.float32),
        "wa":   s * jax.random.normal(ks[2], (L_HID, D_ATT), jnp.float32),
        "ba":   0.01 * jax.random.normal(ks[3], (1, D_ATT), jnp.float32),
        "wb":   s * jax.random.normal(ks[4], (L_HID, D_ATT), jnp.float32),
        "bb":   0.01 * jax.random.normal(ks[5], (1, D_ATT), jnp.float32),
        # attention_c: Linear(D_ATT, 1) -> single weight row, scalar bias
        "wc":   s * jax.random.normal(ks[6], (1, D_ATT), jnp.float32),
        "bc":   0.01 * jax.random.normal(ks[7], (1, 1), jnp.float32),
        "wcls": s * jax.random.normal(ks[8], (L_HID, N_CLASSES), jnp.float32),
        "bcls": 0.01 * jax.random.normal(ks[9], (1, N_CLASSES), jnp.float32),
    }


if __name__ == "__main__":
    key = jax.random.PRNGKey(0)
    k_param, k_data = jax.random.split(key)
    params = init_params(k_param)

    N = 300  # bag size (not a tile multiple -> exercises padding/masking + 2-step grid)
    h = jax.random.normal(k_data, (N, L_IN), jnp.float32)

    logits, y_prob, y_hat, a_raw, results_dict = iefmil_forward(h, params, tile=256)
    jax.block_until_ready((logits, y_prob, y_hat, a_raw))

    assert logits.shape == (1, N_CLASSES)
    assert y_prob.shape == (1, N_CLASSES)
    assert y_hat.shape == (1, 1)
    assert a_raw.shape == (1, N)

    # Loose numeric sanity check against the pure-JAX f32 reference
    # (kernel feeds bf16 to the MXU, so allow bf16-level tolerance).
    ref_logits, ref_prob, ref_yhat, ref_araw = iefmil_reference(h, params)
    assert jnp.allclose(a_raw, ref_araw, atol=5e-2, rtol=5e-2)
    assert jnp.allclose(logits, ref_logits, atol=5e-2, rtol=5e-2)
    assert jnp.allclose(y_prob, ref_prob, atol=5e-2, rtol=5e-2)

    print("KERNEL_OK")
</pallas_src>

<mosaic_0001>
module attributes {stable_mosaic.version = 11 : i64} {
  func.func @kernel(%arg0: i32, %arg1: memref<256x512xbf16, #tpu.memory_space<vmem>>, %arg2: memref<512x512xbf16, #tpu.memory_space<vmem>>, %arg3: memref<1x512xf32, #tpu.memory_space<vmem>>, %arg4: memref<512x256xbf16, #tpu.memory_space<vmem>>, %arg5: memref<1x256xf32, #tpu.memory_space<vmem>>, %arg6: memref<512x256xbf16, #tpu.memory_space<vmem>>, %arg7: memref<1x256xf32, #tpu.memory_space<vmem>>, %arg8: memref<1x256xf32, #tpu.memory_space<vmem>>, %arg9: memref<1x1xf32, #tpu.memory_space<vmem>>, %arg10: memref<512x2xf32, #tpu.memory_space<vmem>>, %arg11: memref<1x2xf32, #tpu.memory_space<vmem>>, %arg12: memref<1x2xf32, #tpu.memory_space<vmem>>, %arg13: memref<1x2xf32, #tpu.memory_space<vmem>>, %arg14: memref<1x1xi32, #tpu.memory_space<vmem>>, %arg15: memref<1x256xf32, #tpu.memory_space<vmem>>, %arg16: memref<1x1xf32, #tpu.memory_space<vmem>>, %arg17: memref<1x1xf32, #tpu.memory_space<vmem>>, %arg18: memref<1x512xf32, #tpu.memory_space<vmem>>) attributes {dimension_semantics = [#tpu.dimension_semantics<arbitrary>], iteration_bounds = array<i64: 2>, scalar_prefetch = 0 : i64, scratch_operands = 3 : i64, tpu.core_type = #tpu.core_type<tc>, window_params = [{transform_indices = @transform_0, window_bounds = array<i64: 256, 512>}, {pipeline_mode = #tpu.pipeline_mode<synchronous>, transform_indices = @transform_1, window_bounds = array<i64: 512, 512>}, {pipeline_mode = #tpu.pipeline_mode<synchronous>, transform_indices = @transform_2, window_bounds = array<i64: 1, 512>}, {pipeline_mode = #tpu.pipeline_mode<synchronous>, transform_indices = @transform_3, window_bounds = array<i64: 512, 256>}, {pipeline_mode = #tpu.pipeline_mode<synchronous>, transform_indices = @transform_4, window_bounds = array<i64: 1, 256>}, {pipeline_mode = #tpu.pipeline_mode<synchronous>, transform_indices = @transform_5, window_bounds = array<i64: 512, 256>}, {pipeline_mode = #tpu.pipeline_mode<synchronous>, transform_indices = @transform_6, window_bounds = array<i64: 1, 256>}, {pipeline_mode = #tpu.pipeline_mode<synchronous>, transform_indices = @transform_7, window_bounds = array<i64: 1, 256>}, {pipeline_mode = #tpu.pipeline_mode<synchronous>, transform_indices = @transform_8, window_bounds = array<i64: 1, 1>}, {pipeline_mode = #tpu.pipeline_mode<synchronous>, transform_indices = @transform_9, window_bounds = array<i64: 512, 2>}, {pipeline_mode = #tpu.pipeline_mode<synchronous>, transform_indices = @transform_10, window_bounds = array<i64: 1, 2>}, {pipeline_mode = #tpu.pipeline_mode<synchronous>, transform_indices = @transform_11, window_bounds = array<i64: 1, 2>}, {pipeline_mode = #tpu.pipeline_mode<synchronous>, transform_indices = @transform_12, window_bounds = array<i64: 1, 2>}, {pipeline_mode = #tpu.pipeline_mode<synchronous>, transform_indices = @transform_13, window_bounds = array<i64: 1, 1>}, {transform_indices = @transform_14, window_bounds = array<i64: 1, 256>}]} {
    %c0_i32 = arith.constant 0 : i32
    %0 = arith.cmpi eq, %arg0, %c0_i32 : i32
    %1 = arith.extui %0 : i1 to i32
    %c0_i32_0 = arith.constant 0 : i32
    %2 = arith.cmpi ne, %1, %c0_i32_0 : i32
    scf.if %2 {
      %cst_42 = arith.constant 0xFF800000 : f32
      %68 = vector.broadcast %cst_42 : f32 to vector<1x1xf32>
      %c0_43 = arith.constant 0 : index
      %c0_44 = arith.constant 0 : index
      %69 = vector.load %arg16[%c0_43, %c0_44] : memref<1x1xf32, #tpu.memory_space<vmem>>, vector<1x1xf32>
      tpu.vector_store %arg16[%c0_43, %c0_44], %68 {strides = array<i32>} : memref<1x1xf32, #tpu.memory_space<vmem>>, vector<1x1xf32>,
      %cst_45 = arith.constant 0.000000e+00 : f32
      %70 = vector.broadcast %cst_45 : f32 to vector<1x1xf32>
      %c0_46 = arith.constant 0 : index
      %c0_47 = arith.constant 0 : index
      %71 = vector.load %arg17[%c0_46, %c0_47] : memref<1x1xf32, #tpu.memory_space<vmem>>, vector<1x1xf32>
      tpu.vector_store %arg17[%c0_46, %c0_47], %70 {strides = array<i32>} : memref<1x1xf32, #tpu.memory_space<vmem>>, vector<1x1xf32>,
      %cst_48 = arith.constant 0.000000e+00 : f32
      %72 = vector.broadcast %cst_48 : f32 to vector<1x512xf32>
      %c0_49 = arith.constant 0 : index
      %c0_50 = arith.constant 0 : index
      %73 = vector.load %arg18[%c0_49, %c0_50] : memref<1x512xf32, #tpu.memory_space<vmem>>, vector<1x512xf32>
      tpu.vector_store %arg18[%c0_49, %c0_50], %72 {strides = array<i32>} : memref<1x512xf32, #tpu.memory_space<vmem>>, vector<1x512xf32>,
    } else {
    }
    %c0 = arith.constant 0 : index
    %c0_1 = arith.constant 0 : index
    %3 = vector.load %arg1[%c0, %c0_1] : memref<256x512xbf16, #tpu.memory_space<vmem>>, vector<256x512xbf16>
    %c0_2 = arith.constant 0 : index
    %c0_3 = arith.constant 0 : index
    %4 = vector.load %arg2[%c0_2, %c0_3] : memref<512x512xbf16, #tpu.memory_space<vmem>>, vector<512x512xbf16>
    %cst = arith.constant dense<0.000000e+00> : vector<256x512xf32>
    %5 = tpu.matmul %3, %4, %cst {dimension_numbers = #tpu.dot_dimension_numbers<[1], [0], [0], [1], [0, 0, 1, 1], [], []>} : vector<256x512xbf16>, vector<512x512xbf16>, vector<256x512xf32> -> vector<256x512xf32>
    %c0_4 = arith.constant 0 : index
    %c0_5 = arith.constant 0 : index
    %6 = vector.load %arg3[%c0_4, %c0_5] : memref<1x512xf32, #tpu.memory_space<vmem>>, vector<1x512xf32>
    %7 = vector.broadcast %6 : vector<1x512xf32> to vector<256x512xf32>
    %8 = arith.addf %5, %7 : vector<256x512xf32>
    %cst_6 = arith.constant 0.000000e+00 : f32
    %9 = vector.broadcast %cst_6 : f32 to vector<256x512xf32>
    %10 = arith.maximumf %8, %9 : vector<256x512xf32>
    %11 = arith.truncf %10 : vector<256x512xf32> to vector<256x512xbf16>
    %c0_7 = arith.constant 0 : index
    %c0_8 = arith.constant 0 : index
    %12 = vector.load %arg4[%c0_7, %c0_8] : memref<512x256xbf16, #tpu.memory_space<vmem>>, vector<512x256xbf16>
    %cst_9 = arith.constant dense<0.000000e+00> : vector<256x256xf32>
    %13 = tpu.matmul %11, %12, %cst_9 {dimension_numbers = #tpu.dot_dimension_numbers<[1], [0], [0], [1], [0, 0, 1, 1], [], []>} : vector<256x512xbf16>, vector<512x256xbf16>, vector<256x256xf32> -> vector<256x256xf32>
    %c0_10 = arith.constant 0 : index
    %c0_11 = arith.constant 0 : index
    %14 = vector.load %arg5[%c0_10, %c0_11] : memref<1x256xf32, #tpu.memory_space<vmem>>, vector<1x256xf32>
    %15 = vector.broadcast %14 : vector<1x256xf32> to vector<256x256xf32>
    %16 = arith.addf %13, %15 : vector<256x256xf32>
    %17 = math.tanh %16 : vector<256x256xf32>
    %c0_12 = arith.constant 0 : index
    %c0_13 = arith.constant 0 : index
    %18 = vector.load %arg6[%c0_12, %c0_13] : memref<512x256xbf16, #tpu.memory_space<vmem>>, vector<512x256xbf16>
    %cst_14 = arith.constant dense<0.000000e+00> : vector<256x256xf32>
    %19 = tpu.matmul %11, %18, %cst_14 {dimension_numbers = #tpu.dot_dimension_numbers<[1], [0], [0], [1], [0, 0, 1, 1], [], []>} : vector<256x512xbf16>, vector<512x256xbf16>, vector<256x256xf32> -> vector<256x256xf32>
    %c0_15 = arith.constant 0 : index
    %c0_16 = arith.constant 0 : index
    %20 = vector.load %arg7[%c0_15, %c0_16] : memref<1x256xf32, #tpu.memory_space<vmem>>, vector<1x256xf32>
    %21 = vector.broadcast %20 : vector<1x256xf32> to vector<256x256xf32>
    %22 = arith.addf %19, %21 : vector<256x256xf32>
    %23 = arith.negf %22 : vector<256x256xf32>
    %24 = math.exp %23 : vector<256x256xf32>
    %cst_17 = arith.constant 1.000000e+00 : f32
    %25 = vector.broadcast %cst_17 : f32 to vector<256x256xf32>
    %26 = arith.addf %25, %24 : vector<256x256xf32>
    %27 = arith.divf %25, %26 : vector<256x256xf32>
    %28 = arith.mulf %17, %27 : vector<256x256xf32>
    %c0_18 = arith.constant 0 : index
    %c0_19 = arith.constant 0 : index
    %29 = vector.load %arg8[%c0_18, %c0_19] : memref<1x256xf32, #tpu.memory_space<vmem>>, vector<1x256xf32>
    %cst_20 = arith.constant dense<0.000000e+00> : vector<1x256xf32>
    %30 = tpu.matmul %29, %28, %cst_20 {dimension_numbers = #tpu.dot_dimension_numbers<[1], [1], [0], [0], [0, 0, 1, 0], [], []>} : vector<1x256xf32>, vector<256x256xf32>, vector<1x256xf32> -> vector<1x256xf32>
    %c0_21 = arith.constant 0 : index
    %c0_22 = arith.constant 0 : index
    %31 = vector.load %arg9[%c0_21, %c0_22] : memref<1x1xf32, #tpu.memory_space<vmem>>, vector<1x1xf32>
    %32 = vector.broadcast %31 : vector<1x1xf32> to vector<1x256xf32>
    %33 = arith.addf %30, %32 : vector<1x256xf32>
    %c0_23 = arith.constant 0 : index
    %c0_24 = arith.constant 0 : index
    %34 = vector.load %arg15[%c0_23, %c0_24] : memref<1x256xf32, #tpu.memory_space<vmem>>, vector<1x256xf32>
    tpu.vector_store %arg15[%c0_23, %c0_24], %33 {strides = array<i32>} : memref<1x256xf32, #tpu.memory_space<vmem>>, vector<1x256xf32>,
    %35 = tpu.iota {dimensions = array<i32: 1>} : vector<1x256xi32>
    %c256_i32 = arith.constant 256 : i32
    %36 = arith.muli %arg0, %c256_i32 : i32
    %37 = vector.broadcast %36 : i32 to vector<1x256xi32>
    %38 = arith.addi %35, %37 : vector<1x256xi32>
    %c300_i32 = arith.constant 300 : i32
    %39 = vector.broadcast %c300_i32 : i32 to vector<1x256xi32>
    %40 = arith.cmpi slt, %38, %39 : vector<1x256xi32>
    %cst_25 = arith.constant 0xFF800000 : f32
    %41 = vector.broadcast %cst_25 : f32 to vector<1x256xf32>
    %42 = arith.select %40, %33, %41 : vector<1x256xi1>, vector<1x256xf32>
    %c0_26 = arith.constant 0 : index
    %c0_27 = arith.constant 0 : index
    %43 = vector.load %arg16[%c0_26, %c0_27] : memref<1x1xf32, #tpu.memory_space<vmem>>, vector<1x1xf32>
    %cst_28 = arith.constant dense<0xFF800000> : vector<1xf32>
    %44 = vector.multi_reduction <maximumf>, %42, %cst_28 [1] : vector<1x256xf32> to vector<1xf32>
    %45 = vector.shape_cast %44 : vector<1xf32> to vector<1x1xf32>
    %46 = arith.maximumf %43, %45 : vector<1x1xf32>
    %47 = arith.subf %43, %46 : vector<1x1xf32>
    %48 = math.exp %47 : vector<1x1xf32>
    %49 = vector.broadcast %46 : vector<1x1xf32> to vector<1x256xf32>
    %50 = arith.subf %42, %49 : vector<1x256xf32>
    %51 = math.exp %50 : vector<1x256xf32>
    %c0_29 = arith.constant 0 : index
    %c0_30 = arith.constant 0 : index
    %52 = vector.load %arg17[%c0_29, %c0_30] : memref<1x1xf32, #tpu.memory_space<vmem>>, vector<1x1xf32>
    %53 = arith.mulf %48, %52 : vector<1x1xf32>
    %cst_31 = arith.constant dense<0.000000e+00> : vector<1xf32>
    %54 = vector.multi_reduction <add>, %51, %cst_31 [1] : vector<1x256xf32> to vector<1xf32>
    %55 = vector.shape_cast %54 : vector<1xf32> to vector<1x1xf32>
    %56 = arith.addf %53, %55 : vector<1x1xf32>
    %c0_32 = arith.constant 0 : index
    %c0_33 = arith.constant 0 : index
    %57 = vector.load %arg17[%c0_32, %c0_33] : memref<1x1xf32, #tpu.memory_space<vmem>>, vector<1x1xf32>
    tpu.vector_store %arg17[%c0_32, %c0_33], %56 {strides = array<i32>} : memref<1x1xf32, #tpu.memory_space<vmem>>, vector<1x1xf32>,
    %c0_34 = arith.constant 0 : index
    %c0_35 = arith.constant 0 : index
    %58 = vector.load %arg18[%c0_34, %c0_35] : memref<1x512xf32, #tpu.memory_space<vmem>>, vector<1x512xf32>
    %59 = vector.broadcast %48 : vector<1x1xf32> to vector<1x512xf32>
    %60 = arith.mulf %59, %58 : vector<1x512xf32>
    %cst_36 = arith.constant dense<0.000000e+00> : vector<1x512xf32>
    %61 = tpu.matmul %51, %10, %cst_36 {dimension_numbers = #tpu.dot_dimension_numbers<[1], [0], [0], [1], [0, 0, 1, 1], [], []>} : vector<1x256xf32>, vector<256x512xf32>, vector<1x512xf32> -> vector<1x512xf32>
    %62 = arith.addf %60, %61 : vector<1x512xf32>
    %c0_37 = arith.constant 0 : index
    %c0_38 = arith.constant 0 : index
    %63 = vector.load %arg18[%c0_37, %c0_38] : memref<1x512xf32, #tpu.memory_space<vmem>>, vector<1x512xf32>
    tpu.vector_store %arg18[%c0_37, %c0_38], %62 {strides = array<i32>} : memref<1x512xf32, #tpu.memory_space<vmem>>, vector<1x512xf32>,
    %c0_39 = arith.constant 0 : index
    %c0_40 = arith.constant 0 : index
    %64 = vector.load %arg16[%c0_39, %c0_40] : memref<1x1xf32, #tpu.memory_space<vmem>>, vector<1x1xf32>
    tpu.vector_store %arg16[%c0_39, %c0_40], %46 {strides = array<i32>} : memref<1x1xf32, #tpu.memory_space<vmem>>, vector<1x1xf32>,
    %c1_i32 = arith.constant 1 : i32
    %65 = arith.cmpi eq, %arg0, %c1_i32 : i32
    %66 = arith.extui %65 : i1 to i32
    %c0_i32_41 = arith.constant 0 : i32
    %67 = arith.cmpi ne, %66, %c0_i32_41 : i32
    scf.if %67 {
      %c0_42 = arith.constant 0 : index
      %c0_43 = arith.constant 0 : index
      %68 = vector.load %arg18[%c0_42, %c0_43] : memref<1x512xf32, #tpu.memory_space<vmem>>, vector<1x512xf32>
      %c0_44 = arith.constant 0 : index
      %c0_45 = arith.constant 0 : index
      %69 = vector.load %arg17[%c0_44, %c0_45] : memref<1x1xf32, #tpu.memory_space<vmem>>, vector<1x1xf32>
      %70 = vector.broadcast %69 : vector<1x1xf32> to vector<1x512xf32>
      %71 = arith.divf %68, %70 : vector<1x512xf32>
      %c0_46 = arith.constant 0 : index
      %c0_47 = arith.constant 0 : index
      %72 = vector.load %arg10[%c0_46, %c0_47] : memref<512x2xf32, #tpu.memory_space<vmem>>, vector<512x2xf32>
      %cst_48 = arith.constant dense<0.000000e+00> : vector<1x2xf32>
      %73 = tpu.matmul %71, %72, %cst_48 {dimension_numbers = #tpu.dot_dimension_numbers<[1], [0], [0], [1], [0, 0, 1, 1], [], []>} : vector<1x512xf32>, vector<512x2xf32>, vector<1x2xf32> -> vector<1x2xf32>
      %c0_49 = arith.constant 0 : index
      %c0_50 = arith.constant 0 : index
      %74 = vector.load %arg11[%c0_49, %c0_50] : memref<1x2xf32, #tpu.memory_space<vmem>>, vector<1x2xf32>
      %75 = arith.addf %73, %74 : vector<1x2xf32>
      %c0_51 = arith.constant 0 : index
      %c0_52 = arith.constant 0 : index
      %76 = vector.load %arg12[%c0_51, %c0_52] : memref<1x2xf32, #tpu.memory_space<vmem>>, vector<1x2xf32>
      tpu.vector_store %arg12[%c0_51, %c0_52], %75 {strides = array<i32>} : memref<1x2xf32, #tpu.memory_space<vmem>>, vector<1x2xf32>,
      %cst_53 = arith.constant dense<0xFF800000> : vector<1xf32>
      %77 = vector.multi_reduction <maximumf>, %75, %cst_53 [1] : vector<1x2xf32> to vector<1xf32>
      %78 = vector.shape_cast %77 : vector<1xf32> to vector<1x1xf32>
      %79 = vector.broadcast %78 : vector<1x1xf32> to vector<1x2xf32>
      %80 = arith.subf %75, %79 : vector<1x2xf32>
      %81 = math.exp %80 : vector<1x2xf32>
      %cst_54 = arith.constant dense<0.000000e+00> : vector<1xf32>
      %82 = vector.multi_reduction <add>, %81, %cst_54 [1] : vector<1x2xf32> to vector<1xf32>
      %83 = vector.shape_cast %82 : vector<1xf32> to vector<1x1xf32>
      %84 = vector.broadcast %83 : vector<1x1xf32> to vector<1x2xf32>
      %85 = arith.divf %81, %84 : vector<1x2xf32>
      %c0_55 = arith.constant 0 : index
      %c0_56 = arith.constant 0 : index
      %86 = vector.load %arg13[%c0_55, %c0_56] : memref<1x2xf32, #tpu.memory_space<vmem>>, vector<1x2xf32>
      tpu.vector_store %arg13[%c0_55, %c0_56], %85 {strides = array<i32>} : memref<1x2xf32, #tpu.memory_space<vmem>>, vector<1x2xf32>,
      %87 = tpu.iota {dimensions = array<i32: 1>} : vector<1x2xi32>
      %88 = vector.broadcast %78 : vector<1x1xf32> to vector<1x2xf32>
      %89 = arith.cmpf oeq, %75, %88 : vector<1x2xf32>
      %c2_i32 = arith.constant 2 : i32
      %90 = vector.broadcast %c2_i32 : i32 to vector<1x2xi32>
      %91 = arith.select %89, %87, %90 : vector<1x2xi1>, vector<1x2xi32>
      %cst_57 = arith.constant dense<2147483647> : vector<1xi32>
      %92 = vector.multi_reduction <minsi>, %91, %cst_57 [1] : vector<1x2xi32> to vector<1xi32>
      %93 = vector.shape_cast %92 : vector<1xi32> to vector<1x1xi32>
      %c0_58 = arith.constant 0 : index
      %c0_59 = arith.constant 0 : index
      %94 = vector.load %arg14[%c0_58, %c0_59] : memref<1x1xi32, #tpu.memory_space<vmem>>, vector<1x1xi32>
      tpu.vector_store %arg14[%c0_58, %c0_59], %93 {strides = array<i32>} : memref<1x1xi32, #tpu.memory_space<vmem>>, vector<1x1xi32>,
    } else {
    }
    return
  }
  func.func @transform_0(%arg0: i32) -> (i32, i32) {
    %c0_i32 = arith.constant 0 : i32
    %c0_i32_0 = arith.constant 0 : i32
    return %arg0, %c0_i32 : i32, i32
  }
  func.func @transform_1(%arg0: i32) -> (i32, i32) {
    %c0_i32 = arith.constant 0 : i32
    %c0_i32_0 = arith.constant 0 : i32
    %c0_i32_1 = arith.constant 0 : i32
    return %c0_i32, %c0_i32_0 : i32, i32
  }
  func.func @transform_2(%arg0: i32) -> (i32, i32) {
    %c0_i32 = arith.constant 0 : i32
    %c0_i32_0 = arith.constant 0 : i32
    %c0_i32_1 = arith.constant 0 : i32
    return %c0_i32, %c0_i32_0 : i32, i32
  }
  func.func @transform_3(%arg0: i32) -> (i32, i32) {
    %c0_i32 = arith.constant 0 : i32
    %c0_i32_0 = arith.constant 0 : i32
    %c0_i32_1 = arith.constant 0 : i32
    return %c0_i32, %c0_i32_0 : i32, i32
  }
  func.func @transform_4(%arg0: i32) -> (i32, i32) {
    %c0_i32 = arith.constant 0 : i32
    %c0_i32_0 = arith.constant 0 : i32
    %c0_i32_1 = arith.constant 0 : i32
    return %c0_i32, %c0_i32_0 : i32, i32
  }
  func.func @transform_5(%arg0: i32) -> (i32, i32) {
    %c0_i32 = arith.constant 0 : i32
    %c0_i32_0 = arith.constant 0 : i32
    %c0_i32_1 = arith.constant 0 : i32
    return %c0_i32, %c0_i32_0 : i32, i32
  }
  func.func @transform_6(%arg0: i32) -> (i32, i32) {
    %c0_i32 = arith.constant 0 : i32
    %c0_i32_0 = arith.constant 0 : i32
    %c0_i32_1 = arith.constant 0 : i32
    return %c0_i32, %c0_i32_0 : i32, i32
  }
  func.func @transform_7(%arg0: i32) -> (i32, i32) {
    %c0_i32 = arith.constant 0 : i32
    %c0_i32_0 = arith.constant 0 : i32
    %c0_i32_1 = arith.constant 0 : i32
    return %c0_i32, %c0_i32_0 : i32, i32
  }
  func.func @transform_8(%arg0: i32) -> (i32, i32) {
    %c0_i32 = arith.constant 0 : i32
    %c0_i32_0 = arith.constant 0 : i32
    %c0_i32_1 = arith.constant 0 : i32
    return %c0_i32, %c0_i32_0 : i32, i32
  }
  func.func @transform_9(%arg0: i32) -> (i32, i32) {
    %c0_i32 = arith.constant 0 : i32
    %c0_i32_0 = arith.constant 0 : i32
    %c0_i32_1 = arith.constant 0 : i32
    return %c0_i32, %c0_i32_0 : i32, i32
  }
  func.func @transform_10(%arg0: i32) -> (i32, i32) {
    %c0_i32 = arith.constant 0 : i32
    %c0_i32_0 = arith.constant 0 : i32
    %c0_i32_1 = arith.constant 0 : i32
    return %c0_i32, %c0_i32_0 : i32, i32
  }
  func.func @transform_11(%arg0: i32) -> (i32, i32) {
    %c0_i32 = arith.constant 0 : i32
    %c0_i32_0 = arith.constant 0 : i32
    %c0_i32_1 = arith.constant 0 : i32
    return %c0_i32, %c0_i32_0 : i32, i32
  }
  func.func @transform_12(%arg0: i32) -> (i32, i32) {
    %c0_i32 = arith.constant 0 : i32
    %c0_i32_0 = arith.constant 0 : i32
    %c0_i32_1 = arith.constant 0 : i32
    return %c0_i32, %c0_i32_0 : i32, i32
  }
  func.func @transform_13(%arg0: i32) -> (i32, i32) {
    %c0_i32 = arith.constant 0 : i32
    %c0_i32_0 = arith.constant 0 : i32
    %c0_i32_1 = arith.constant 0 : i32
    return %c0_i32, %c0_i32_0 : i32, i32
  }
  func.func @transform_14(%arg0: i32) -> (i32, i32) {
    %c0_i32 = arith.constant 0 : i32
    %c0_i32_0 = arith.constant 0 : i32
    return %c0_i32, %arg0 : i32, i32
  }
}

</mosaic_0001>

<bundles_post_ra>
// kernel: tpu_custom_call.1
= control target key start
LH: loop header
LB: loop body
LE: loop exit
PB: predicated region body
PF: predicated region fallthrough
CT: control target
= control target key end

     0   :  { %s11017_s0 = inlined_call_operand.hbm [shape: bf16[512,512], index: 0, kind: input, shape index: {}]   ;;  %s11018_s1 = inlined_call_operand.hbm [shape: bf16[512,512], index: 1, kind: input, shape index: {}]   ;;  %s11019_s2 = inlined_call_operand.vmem [shape: f32[1,512], index: 2, kind: input, shape index: {}]   ;;  %s11020_s3 = inlined_call_operand.vmem [shape: bf16[512,256], index: 3, kind: input, shape index: {}]   ;;  %s11021_s4 = inlined_call_operand.vmem [shape: f32[1,256], index: 4, kind: input, shape index: {}]   ;;  %s11022_s5 = inlined_call_operand.hbm [shape: bf16[512,256], index: 5, kind: input, shape index: {}]   ;;  %s11023_s6 = inlined_call_operand.vmem [shape: f32[1,256], index: 6, kind: input, shape index: {}]   ;;  %s11024_s7 = inlined_call_operand.vmem [shape: f32[1,256], index: 7, kind: input, shape index: {}]   ;;  %s11025_s8 = inlined_call_operand.<no memory space> [shape: f32[1,1], index: 8, kind: input, shape index: {}]   ;;  %s11026_s9 = inlined_call_operand.vmem [shape: f32[512,2], index: 9, kind: input, shape index: {}]   ;;  %s11027_s10 = inlined_call_operand.vmem [shape: f32[1,2], index: 10, kind: input, shape index: {}]   ;;  %s11028_s11 = inlined_call_operand.hbm [shape: f32[1,2], index: 11, kind: output, shape index: {0}]   ;;  %s11029_s12 = inlined_call_operand.hbm [shape: f32[1,2], index: 12, kind: output, shape index: {1}]   ;;  %s11030_s13 = inlined_call_operand.hbm [shape: s32[1,1], index: 13, kind: output, shape index: {2}]   ;;  %s11031_s14 = inlined_call_operand.hbm [shape: f32[1,512], index: 14, kind: output, shape index: {3}]  }
   0x1   :  { %11272 = sst [smem:[#allocation159_spill]] %s11018_s1  ;;  %v20_v0 = vstv %s11025_s8 }
   0x2   :  { %11273 = sst [smem:[#allocation160_spill]] %s11022_s5  ;;  %21 = vst [vmem:[#allocation5] sm:$0x1] %v20_v0 }
   0x3   :  { %22 = vsyncpa [#allocation7], 0 }
   0x4   :  { %24 = vsyncpa [#allocation7 + $0x1], 0 }
   0x5   :  { %25 = vsyncpa [#allocation10], 0 }
   0x6   :  { %26 = vsyncpa [#allocation8], 0 }
   0x7   :  { %27 = vsyncpa [#allocation14], 0 }
   0x8   :  { %28 = vsyncpa [#allocation17], 0 }
   0x9   :  { %30 = vsyncpa [#allocation17 + $0x1], 0  ;;  %s7323_s15 = smov 0   ;;  %s7325_s16 = smov 0  }
   0xa   :  { %s7327_s17 = smov 0   ;;  %s7329_s18 = smov 0  }
   0xb LB: > { %11274 = sst [smem:[#allocation23_spill]] %s7223_s17  ;;  %s7344_s8 = sadd.s32 4294967295, %s7227_s18   ;;  %s7227_s18 = sphi %s7329_s18, %s12043_s18   ;;  %s7223_s17 = sphi %s7327_s17, %s12045_s17   ;;  %s7219_s16 = sphi %s7325_s16, %s12047_s16   ;;  %s7215_s15 = sphi %s7323_s15, %s12046_s15  }
   0xc   : > { %11275 = sst [smem:[#allocation24_spill]] %s7227_s18  ;;  %s5536_s19 = sadd.s32 4294967294, %s7227_s18  }
   0xd   : > { %p56_p0 = scmp.ne.s32.totalorder %s7219_s16, %s7215_s15  ;;  %p11037_p1 = scmp.eq.s32.totalorder %s7344_s8, 0 }
   0xe   : > { %p11036_p2 = scmp.eq.s32.totalorder %s7344_s8, 1  ;;  %p359_p3 = scmp.eq.s32.totalorder %s5536_s19, 1 }
   0xf   : > { %p7353_p4 = por %p11037_p1, %p56_p0  ;;  %p5537_p5 = scmp.ge.s32.totalorder %s7227_s18, 1 }
  0x10   : > { %p7358_p6 = por %p359_p3, %p56_p0  ;;  %p366_p7 = scmp.lt.s32.totalorder %s7227_s18, 3 }
  0x11   : > { %s11276_s20 = scalar_select %p7353_p4, 1, 0 }
  0x12   : > { %s11277_s21 = scalar_select %p7358_p6, 1, 0 }
  0x13   : > { %p7364_p9 = pnand %p5537_p5, %p366_p7  ;;  %s7229_s23 = smov [#allocation9]  }
  0x14   : > { %11278 = sst [smem:[#allocation25_spill]] %s11277_s21  ;;  %s378_s24 = sshll.u32 %s7229_s23, 4  ;;  %s379_s24 = int_to_ptr.vmem [resolvable:$true] %s378_s24 }
  0x15   : > { %s11279_s22 = scalar_select %p7364_p9, 1, 0 }
  0x16   : > { %p6045_p10 = pneg %p7364_p9  ;;  %s7230_s26 = smov [#allocation11]  }
  0x17   : > { %s400_s27 = sshll.u32 %s7230_s26, 4  ;;  %s7010_s28 = scalar_lea.vmem %s379_s24, 16384  ;;  %s401_s27 = int_to_ptr.vmem [resolvable:$true] %s400_s27 }
  0x18   : > { %p7373_p12 = pnand %p6045_p10, %p11037_p1  ;;  %p7011_p0 = scmp.ne.s32.totalorder %s379_s24, %s7010_s28 }
  0x19   : > { %p7018_p7 = scmp.lt.s32.totalorder %s379_s24, %s379_s24  ;;  %p7019_p11 = scmp.lt.s32.totalorder %s7010_s28, %s7010_s28 }
  0x1a   : > { %p7001_p13 = pneg %p7373_p12 }
  0x1b   : > { %p7020_p8 = por %p7019_p11, %p7018_p7 }
  0x1c   : > { %p7013_p3 = pnand %p7011_p0, %p7001_p13 }
  0x1e   : > { %p7014_p5 = pneg %p7013_p3 }
  0x20   : > { %p7021_p10 = pnand %p7020_p8, %p7014_p5 }
  0x22   : > { %7024 = shalt.err (!%p7021_p10)
}
  0x23   : > { %s11032_s29 = smov 256   ;;  %s11033_s30 = smov 16  }
  0x24   : > { %s11281_s1 = sld [smem:[#allocation159_spill]]  ;;  %s7036_s26 = scalar_lea.vmem %s401_s27, 8192 }
  0x25   : > { %p7037_p0 = scmp.ne.s32.totalorder %s401_s27, %s7036_s26  ;;  %p7044_p8 = scmp.lt.s32.totalorder %s401_s27, %s401_s27 }
  0x26   : > { %p7045_p5 = scmp.lt.s32.totalorder %s7036_s26, %s7036_s26 }
  0x27   : > { %p7039_p3 = pnand %p7037_p0, %p7001_p13 }
  0x28   : > { %p7046_p7 = por %p7045_p5, %p7044_p8 }
  0x29   : > { %p7040_p11 = pneg %p7039_p3 }
  0x2a   : > { %6048 = dma.hbm_to_vmem [thread:$0]  (!%p7373_p12), %s11281_s1, 16384, %s379_s24, [#allocation10], %s11032_s29, %s11032_s29, %s11033_s30  }
  0x2b   : > { %p7047_p10 = pnand %p7046_p7, %p7040_p11 }
  0x2d   : > { %7050 = shalt.err (!%p7047_p10)
}
  0x2e   : > { %s7233_s28 = smov 128   ;;  %s7234_s24 = smov 8  }
  0x2f   : > { %s11282_s5 = sld [smem:[#allocation160_spill]]  ;;  %s7399_s26 = sadd.s32 1, %s7227_s18  }
  0x30   : > { %11283 = sst [smem:[#allocation26_spill]] %s7399_s26  ;;  %s40_s29 = ssub.s32 %s7227_s18, %s7399_s26 }
  0x31   : > { %p41_p13 = scmp.eq.s32.totalorder %s40_s29, 0  ;;  %s43_s30 = sadd.s32 1, %s7223_s17 }
  0x32   : > { %p50_p0 = scmp.ne.s32.totalorder %s7223_s17, %s7219_s16  ;;  %p51_p3 = scmp.eq.s32.totalorder %s7227_s18, 0 }
  0x33   : > { %s7408_s1 = scalar_select %p41_p13, %s7223_s17, %s43_s30  }
  0x34   : > { %p52_p11 = por %p51_p3, %p50_p0  ;;  %p7412_p8 = por %p11036_p2, %p50_p0 }
  0x35   : > { %6051 = dma.hbm_to_vmem [thread:$0]  (!%p7373_p12), %s11282_s5, 8192, %s401_s27, [#allocation10], %s7233_s28, %s7233_s28, %s7234_s24  }
  0x36   : > { %11284 = sst [smem:[#allocation27_spill]] %s7408_s1  ;;  %p6062_p5 = scmp.lt.s32.totalorder %s7227_s18, 2 }
  0x37   : > { %s11285_s21 = scalar_select %p7412_p8, 1, 0 }
  0x38   : > { %s429_s25 = sand.u32 1, %s7223_s17   ;;  %s5949_s27 = sshll.u32 %s7227_s18, 13 }
  0x39   : > { %s5541_s19 = sshll.u32 %s429_s25, 9  ;;  %s7422_s23 = scalar_lea.hbm %s11017_s0, %s5949_s27 }
  0x3a   : > { %s433_s29 = scalar_lea.vmem [#allocation6], %s5541_s19  ;;  %p7426_p12 = pnand %p6062_p5, %p52_p11 }
  0x3b   : > { %s441_s30 = sshll.u32 %s433_s29, 4  ;;  %s7430_s1 = scalar_lea.sflag [#allocation7], %s429_s25  ;;  %s7424_s30 = int_to_ptr.vmem [resolvable:$true] %s441_s30 }
  0x3c   : > { %s7051_s17 = scalar_lea.hbm %s7422_s23, 8192  ;;  %p7053_p10 = pneg %p7426_p12 }
  0x3d   : > { %p7052_p7 = scmp.ne.s32.totalorder %s7422_s23, %s7051_s17  ;;  %s7056_s19 = scalar_lea.hbm %s11017_s0, 16384 }
  0x3e   : > { %p7057_p3 = scmp.lt.s32.totalorder %s7422_s23, %s11017_s0  ;;  %p7058_p11 = scmp.lt.s32.totalorder %s7056_s19, %s7051_s17 }
  0x3f   : > { %p7054_p13 = pnand %p7053_p10, %p7052_p7 }
  0x40   : > { %p7059_p5 = por %p7058_p11, %p7057_p3 }
  0x41   : > { %p7055_p0 = pneg %p7054_p13 }
  0x43   : > { %p7060_p2 = pnand %p7059_p5, %p7055_p0 }
  0x45   : > { %7063 = shalt.err (!%p7060_p2)
}
  0x46   : > { %s7064_s25 = scalar_lea.vmem %s7424_s30, 8192  ;;  %s7235_s26 = smov [#allocation6]  }
  0x47   : > { %p7065_p1 = scmp.ne.s32.totalorder %s7424_s30, %s7064_s25  ;;  %s7069_s18 = sshll.u32 %s7235_s26, 4  ;;  %s7070_s18 = int_to_ptr.vmem [resolvable:$false] %s7069_s18 }
  0x48   : > { %s7071_s27 = scalar_lea.vmem %s7070_s18, 16384  ;;  %p7072_p13 = scmp.lt.s32.totalorder %s7424_s30, %s7070_s18 }
  0x49   : > { %p7067_p6 = pnand %p7065_p1, %p7053_p10  ;;  %p7073_p8 = scmp.lt.s32.totalorder %s7071_s27, %s7064_s25 }
  0x4b   : > { %p7068_p7 = pneg %p7067_p6  ;;  %p7074_p4 = por %p7073_p8, %p7072_p13 }
  0x4d   : > { %p7075_p9 = pnand %p7074_p4, %p7068_p7 }
  0x4f   : > { %7078 = shalt.err (!%p7075_p9)
}
  0x50   : > { %s11287_s17 = smov 16   ;;  %s11288_s28 = smov 256  }
  0x51   : > { %6055 = dma.hbm_to_vmem [thread:$0]  (!%p7426_p12), %s7422_s23, 8192, %s7424_s30, %s7430_s1, %s11288_s28, %s11288_s28, %s11287_s17  }
  0x52   : > { %p11289_p1 = scmp.ne.s32.totalorder %s11279_s22, 0 }
  0x54   : > { %453 = sbr.rel (%p11289_p1) target bundleno = 2601 (0xa29), region = 64 }
  0x59   : > { %s7457_s26 = sand.u32 1, %s7219_s16   ;;  %p11290_p2 = scmp.ne.s32.totalorder %s11276_s20, 0 }
  0x5a   : > { %s5546_s18 = sshll.u32 %s7457_s26, 9  ;;  %s456_s19 = scalar_lea.sflag [#allocation7], %s7457_s26 }
  0x5b   : > { %s7461_s24 = scalar_lea.vmem [#allocation6], %s5546_s18 }
  0x5c   : > { %7194 = dma.done.wait (%p11290_p2), %s456_s19, 8192  }
  0x5d   : > { %7196 = vsyncadd (%p11290_p2), %s456_s19, 4294959104  ;;  %p11291_p4 = scmp.eq.s32.totalorder %s7344_s8, 0 }
  0x5f   : > { %7198 = dma.done.wait (%p11291_p4), [#allocation10], 24576   ;;  %p11292_p6 = pmov %p11291_p4 }
  0x60   : > { %s5549_s1 = sshll.u32 %s7457_s26, 1  ;;  %p11293_p9 = scmp.ne.s32.totalorder %s7344_s8, 0 }
  0x61   : > { %7200 = vsyncadd (%p11292_p6), [#allocation10], 4294942720  ;;  %s7472_s5 = scalar_lea.vmem [#allocation16], %s5549_s1 }
  0x62   : > { %517 = sbr.rel (%p11293_p9) target bundleno = 107 (0x6b), region = 80 }
  0x67   : > { %vm518_vm0 = vcmask 0   ;;  %v521_v1 = vlaneseq  ;;  %v7236_v2 = vmov -inf   ;;  %v7237_v3 = vmov 0.0  }
  0x68   : > { %519 = vst.msk [vmem:[#allocation2] sm:$0x1] %vm518_vm0, %v7236_v2  ;;  %520 = vst.msk [vmem:[#allocation3] sm:$0x1] %vm518_vm0, %v7237_v3 }
  0x69   : > { %vm523_vm1 = vcmp.lt.s32.totalorder %v521_v1, 512 }
  0x6a   : > { %525 = vst.msk [vmem:[#allocation4] sm:$0xf] %vm523_vm1, %v7237_v3 }
  0x6b PF: > { %v6120_v4 = vld [vmem:[#allocation9 + $0xe4] ss:$16 sps:$4 sm:$0xff]   ;;  %v6124_v6 = vld [vmem:[#allocation9 + $0xe0] ss:$16 sps:$4 sm:$0xff]   ;;  %v6221_v55 = vld [vmem:[%s7461_s24 + $0xc] ss:$16 sps:$4 sm:$0xff]  }
  0x6c   : > { %v6122_v5 = vld [vmem:[#allocation9 + $0x2e4] ss:$16 sps:$4 sm:$0xff]   ;;  %1700 = vmatprep.subr.bf16.mxu0 %v6120_v4  ;;  %v6125_v7 = vld [vmem:[#allocation9 + $0x2e0] ss:$16 sps:$4 sm:$0xff]   ;;  %1925 = vmatprep.mubr.bf16.mxu1 %v6221_v55  ;;  %v6309_v55 = vld [vmem:[#allocation9 + $0x208] ss:$16 sps:$4 sm:$0xff]  }
  0x6d   : > { %1893 = vmatprep.subr.bf16.mxu1 %v6122_v5  ;;  %v6126_v8 = vld [vmem:[#allocation9 + $0xc4] ss:$16 sps:$4 sm:$0xff]   ;;  %1701 = vmatpush1.bf16.msra.mxu0 %v6124_v6  ;;  %v6130_v10 = vld [vmem:[#allocation9 + $0xc0] ss:$16 sps:$4 sm:$0xff]   ;;  %v6224_v6 = vld [vmem:[#allocation9 + $0xec] ss:$16 sps:$4 sm:$0xff]  }
  0x6e   : > { %1894 = vmatpush1.bf16.msra.mxu1 %v6125_v7  ;;  %v6128_v9 = vld [vmem:[#allocation9 + $0x2c4] ss:$16 sps:$4 sm:$0xff]   ;;  %1702 = vmatprep.subr.bf16.mxu0 %v6126_v8  ;;  %v6131_v11 = vld [vmem:[#allocation9 + $0x2c0] ss:$16 sps:$4 sm:$0xff]   ;;  %v6227_v7 = vld [vmem:[#allocation9 + $0x2ec] ss:$16 sps:$4 sm:$0xff]  }
  0x6f   : > { %1895 = vmatprep.subr.bf16.mxu1 %v6128_v9  ;;  %v6132_v12 = vld [vmem:[#allocation9 + $0xa4] ss:$16 sps:$4 sm:$0xff]   ;;  %v6136_v14 = vld [vmem:[#allocation9 + $0xa0] ss:$16 sps:$4 sm:$0xff]   ;;  %v7482_v9 = vld [vmem:[%s7461_s24 + $0x8] ss:$16 sps:$4 sm:$0xff]  }
  0x70   : > { %v6134_v13 = vld [vmem:[#allocation9 + $0x2a4] ss:$16 sps:$4 sm:$0xff]   ;;  %v6137_v15 = vld [vmem:[#allocation9 + $0x2a0] ss:$16 sps:$4 sm:$0xff]   ;;  %s5935_s27 = sshll.u32 %s7344_s8, 8  ;;  %vm4868_vm4 = vcmask 1040384  }
  0x71   : > { %1703 = vmatpush1.bf16.msra.mxu0 %v6130_v10  ;;  %v6138_v16 = vld [vmem:[#allocation9 + $0x84] ss:$16 sps:$4 sm:$0xff]   ;;  %v6142_v18 = vld [vmem:[#allocation9 + $0x80] ss:$16 sps:$4 sm:$0xff]   ;;  %v6222_v10 = vld [vmem:[#allocation9 + $0xe8] ss:$16 sps:$4 sm:$0xff]  }
  0x72   : > { %1896 = vmatpush1.bf16.msra.mxu1 %v6131_v11  ;;  %1704 = vmatprep.subr.bf16.mxu0 %v6132_v12  ;;  %v6140_v17 = vld [vmem:[#allocation9 + $0x284] ss:$16 sps:$4 sm:$0xff]   ;;  %v6143_v19 = vld [vmem:[#allocation9 + $0x280] ss:$16 sps:$4 sm:$0xff]   ;;  %v6225_v11 = vld [vmem:[#allocation9 + $0x2e8] ss:$16 sps:$4 sm:$0xff]  }
  0x73   : > { %1897 = vmatprep.subr.bf16.mxu1 %v6134_v13  ;;  %v6144_v20 = vld [vmem:[#allocation9 + $0x64] ss:$16 sps:$4 sm:$0xff]   ;;  %v6148_v22 = vld [vmem:[#allocation9 + $0x60] ss:$16 sps:$4 sm:$0xff]   ;;  %v7488_v13 = vld [vmem:[%s7461_s24 + $0x2c] ss:$16 sps:$4 sm:$0xff]  }
  0x74   : > { %v6146_v21 = vld [vmem:[#allocation9 + $0x264] ss:$16 sps:$4 sm:$0xff]   ;;  %v6149_v23 = vld [vmem:[#allocation9 + $0x260] ss:$16 sps:$4 sm:$0xff]   ;;  %vm4901_vm6 = vcmask 0   ;;  %p5936_p8 = scmp.ne.s32.totalorder %s7344_s8, 1 }
  0x75   : > { %1705 = vmatpush1.bf16.msra.mxu0 %v6136_v14  ;;  %v6150_v24 = vld [vmem:[#allocation9 + $0x44] ss:$16 sps:$4 sm:$0xff]   ;;  %v6154_v26 = vld [vmem:[#allocation9 + $0x40] ss:$16 sps:$4 sm:$0xff]   ;;  %v6236_v14 = vld [vmem:[#allocation9 + $0xcc] ss:$16 sps:$4 sm:$0xff]  }
  0x76   : > { %1898 = vmatpush1.bf16.msra.mxu1 %v6137_v15  ;;  %1706 = vmatprep.subr.bf16.mxu0 %v6138_v16  ;;  %v6152_v25 = vld [vmem:[#allocation9 + $0x244] ss:$16 sps:$4 sm:$0xff]   ;;  %v6155_v27 = vld [vmem:[#allocation9 + $0x240] ss:$16 sps:$4 sm:$0xff]   ;;  %v6239_v15 = vld [vmem:[#allocation9 + $0x2cc] ss:$16 sps:$4 sm:$0xff]  }
  0x77   : > { %1899 = vmatprep.subr.bf16.mxu1 %v6140_v17  ;;  %v6156_v28 = vld [vmem:[#allocation9 + $0x24] ss:$16 sps:$4 sm:$0xff]   ;;  %v6160_v30 = vld [vmem:[#allocation9 + $0x20] ss:$16 sps:$4 sm:$0xff]   ;;  %v6234_v16 = vld [vmem:[#allocation9 + $0xc8] ss:$16 sps:$4 sm:$0xff]  }
  0x78   : > { %v6158_v29 = vld [vmem:[#allocation9 + $0x224] ss:$16 sps:$4 sm:$0xff]   ;;  %v6161_v31 = vld [vmem:[#allocation9 + $0x220] ss:$16 sps:$4 sm:$0xff]   ;;  %v6237_v17 = vld [vmem:[#allocation9 + $0x2c8] ss:$16 sps:$4 sm:$0xff]  }
  0x79   : > { %1707 = vmatpush1.bf16.msra.mxu0 %v6142_v18  ;;  %v6162_v32 = vld [vmem:[#allocation9 + $0x4] ss:$16 sps:$4 sm:$0xff]   ;;  %v6166_v34 = vld [vmem:[#allocation9] ss:$16 sps:$4 sm:$0xff]   ;;  %v6248_v18 = vld [vmem:[#allocation9 + $0xac] ss:$16 sps:$4 sm:$0xff]  }
  0x7a   : > { %1900 = vmatpush1.bf16.msra.mxu1 %v6143_v19  ;;  %1708 = vmatprep.subr.bf16.mxu0 %v6144_v20  ;;  %v6164_v33 = vld [vmem:[#allocation9 + $0x204] ss:$16 sps:$4 sm:$0xff]   ;;  %v6167_v35 = vld [vmem:[#allocation9 + $0x200] ss:$16 sps:$4 sm:$0xff]   ;;  %v6251_v19 = vld [vmem:[#allocation9 + $0x2ac] ss:$16 sps:$4 sm:$0xff]  }
  0x7b   : > { %1901 = vmatprep.subr.bf16.mxu1 %v6146_v21  ;;  %v6168_v36 = vld [vmem:[#allocation9 + $0x1e4] ss:$16 sps:$4 sm:$0xff]   ;;  %v6172_v38 = vld [vmem:[#allocation9 + $0x1e0] ss:$16 sps:$4 sm:$0xff]   ;;  %v7498_v21 = vld [vmem:[%s7461_s24 + $0x28] ss:$16 sps:$4 sm:$0xff]  }
  0x7c   : > { %v6170_v37 = vld [vmem:[#allocation9 + $0x3e4] ss:$16 sps:$4 sm:$0xff]   ;;  %v6173_v39 = vld [vmem:[#allocation9 + $0x3e0] ss:$16 sps:$4 sm:$0xff]  }
  0x7d   : > { %1709 = vmatpush1.bf16.msra.mxu0 %v6148_v22  ;;  %v6174_v40 = vld [vmem:[#allocation9 + $0x1c4] ss:$16 sps:$4 sm:$0xff]   ;;  %v6178_v42 = vld [vmem:[#allocation9 + $0x1c0] ss:$16 sps:$4 sm:$0xff]  }
  0x7e   : > { %1902 = vmatpush1.bf16.msra.mxu1 %v6149_v23  ;;  %1710 = vmatprep.subr.bf16.mxu0 %v6150_v24  ;;  %v6176_v41 = vld [vmem:[#allocation9 + $0x3c4] ss:$16 sps:$4 sm:$0xff]   ;;  %v6179_v43 = vld [vmem:[#allocation9 + $0x3c0] ss:$16 sps:$4 sm:$0xff]   ;;  %v7504_v23 = vld [vmem:[%s7461_s24 + $0x4c] ss:$16 sps:$4 sm:$0xff]  }
  0x7f   : > { %1903 = vmatprep.subr.bf16.mxu1 %v6152_v25  ;;  %v6180_v44 = vld [vmem:[#allocation9 + $0x1a4] ss:$16 sps:$4 sm:$0xff]   ;;  %v6184_v46 = vld [vmem:[#allocation9 + $0x1a0] ss:$16 sps:$4 sm:$0xff]   ;;  %v6246_v24 = vld [vmem:[#allocation9 + $0xa8] ss:$16 sps:$4 sm:$0xff]  }
  0x80   : > { %v6182_v45 = vld [vmem:[#allocation9 + $0x3a4] ss:$16 sps:$4 sm:$0xff]   ;;  %v6185_v47 = vld [vmem:[#allocation9 + $0x3a0] ss:$16 sps:$4 sm:$0xff]   ;;  %v6249_v25 = vld [vmem:[#allocation9 + $0x2a8] ss:$16 sps:$4 sm:$0xff]  }
  0x81   : > { %1711 = vmatpush1.bf16.msra.mxu0 %v6154_v26  ;;  %v6186_v48 = vld [vmem:[#allocation9 + $0x184] ss:$16 sps:$4 sm:$0xff]   ;;  %v6190_v50 = vld [vmem:[#allocation9 + $0x180] ss:$16 sps:$4 sm:$0xff]   ;;  %v6260_v26 = vld [vmem:[#allocation9 + $0x8c] ss:$16 sps:$4 sm:$0xff]  }
  0x82   : > { %1904 = vmatpush1.bf16.msra.mxu1 %v6155_v27  ;;  %1712 = vmatprep.subr.bf16.mxu0 %v6156_v28  ;;  %v6188_v49 = vld [vmem:[#allocation9 + $0x384] ss:$16 sps:$4 sm:$0xff]   ;;  %v6191_v51 = vld [vmem:[#allocation9 + $0x380] ss:$16 sps:$4 sm:$0xff]   ;;  %v6263_v27 = vld [vmem:[#allocation9 + $0x28c] ss:$16 sps:$4 sm:$0xff]  }
  0x83   : > { %1905 = vmatprep.subr.bf16.mxu1 %v6158_v29  ;;  %v6192_v52 = vld [vmem:[#allocation9 + $0x164] ss:$16 sps:$4 sm:$0xff]   ;;  %v6196_v56 = vld [vmem:[#allocation9 + $0x160] ss:$16 sps:$4 sm:$0xff]   ;;  %v6258_v28 = vld [vmem:[#allocation9 + $0x88] ss:$16 sps:$4 sm:$0xff]  }
  0x84   : > { %v6218_v53 = vld [vmem:[%s7461_s24 + $0x4] ss:$16 sps:$4 sm:$0xff]   ;;  %v6197_v57 = vld [vmem:[#allocation9 + $0x360] ss:$16 sps:$4 sm:$0xff]  }
  0x85   : > { %1713 = vmatpush1.bf16.msra.mxu0 %v6160_v30  ;;  %v6194_v54 = vld [vmem:[#allocation9 + $0x364] ss:$16 sps:$4 sm:$0xff]   ;;  %1732 = vmatprep.mubr.bf16.mxu0 %v6218_v53  ;;  %v6202_v60 = vld [vmem:[#allocation9 + $0x140] ss:$16 sps:$4 sm:$0xff]   ;;  %v7514_v30 = vld [vmem:[%s7461_s24 + $0x48] ss:$16 sps:$4 sm:$0xff]  }
  0x86   : > { %1906 = vmatpush1.bf16.msra.mxu1 %v6161_v31  ;;  %1714 = vmatprep.subr.bf16.mxu0 %v6162_v32  ;;  %v6198_v58 = vld [vmem:[#allocation9 + $0x144] ss:$16 sps:$4 sm:$0xff]   ;;  %v6203_v61 = vld [vmem:[#allocation9 + $0x340] ss:$16 sps:$4 sm:$0xff]   ;;  %v6261_v31 = vld [vmem:[#allocation9 + $0x288] ss:$16 sps:$4 sm:$0xff]  }
  0x87   : > { %1907 = vmatprep.subr.bf16.mxu1 %v6164_v33  ;;  %v6200_v59 = vld [vmem:[#allocation9 + $0x344] ss:$16 sps:$4 sm:$0xff]   ;;  %v6208_v0 = vld [vmem:[#allocation9 + $0x120] ss:$16 sps:$4 sm:$0xff]   ;;  %v6272_v32 = vld [vmem:[#allocation9 + $0x6c] ss:$16 sps:$4 sm:$0xff]  }
  0x88   : > { %v6204_v62 = vld [vmem:[#allocation9 + $0x124] ss:$16 sps:$4 sm:$0xff]   ;;  %v6209_v1 = vld [vmem:[#allocation9 + $0x320] ss:$16 sps:$4 sm:$0xff]   ;;  %v6275_v33 = vld [vmem:[#allocation9 + $0x26c] ss:$16 sps:$4 sm:$0xff]  }
  0x89   : > { %1715 = vmatpush1.bf16.msra.mxu0 %v6166_v34  ;;  %v6206_v63 = vld [vmem:[#allocation9 + $0x324] ss:$16 sps:$4 sm:$0xff]   ;;  %v6214_v4 = vld [vmem:[#allocation9 + $0x100] ss:$16 sps:$4 sm:$0xff]  }
  0x8a   : > { %1908 = vmatpush1.bf16.msra.mxu1 %v6167_v35  ;;  %1716 = vmatprep.subr.bf16.mxu0 %v6168_v36  ;;  %v6210_v2 = vld [vmem:[#allocation9 + $0x104] ss:$16 sps:$4 sm:$0xff]   ;;  %v6215_v5 = vld [vmem:[#allocation9 + $0x300] ss:$16 sps:$4 sm:$0xff]   ;;  %v7520_v35 = vld [vmem:[%s7461_s24 + $0x6c] ss:$16 sps:$4 sm:$0xff]  }
  0x8b   : > { %1909 = vmatprep.subr.bf16.mxu1 %v6170_v37  ;;  %v6212_v3 = vld [vmem:[#allocation9 + $0x304] ss:$16 sps:$4 sm:$0xff]   ;;  %v7479_v8 = vld [vmem:[%s7461_s24] ss:$16 sps:$4 sm:$0xff]   ;;  %v6270_v36 = vld [vmem:[#allocation9 + $0x68] ss:$16 sps:$4 sm:$0xff]  }
  0x8c   : > { %v7485_v12 = vld [vmem:[%s7461_s24 + $0x24] ss:$16 sps:$4 sm:$0xff]   ;;  %v7495_v20 = vld [vmem:[%s7461_s24 + $0x20] ss:$16 sps:$4 sm:$0xff]   ;;  %v6273_v37 = vld [vmem:[#allocation9 + $0x268] ss:$16 sps:$4 sm:$0xff]  }
  0x8d   : > { %1717 = vmatpush2.bf16.msra.mxu0 %v6172_v38  ;;  %v7501_v22 = vld [vmem:[%s7461_s24 + $0x44] ss:$16 sps:$4 sm:$0xff]   ;;  %v7511_v29 = vld [vmem:[%s7461_s24 + $0x40] ss:$16 sps:$4 sm:$0xff]   ;;  %v6284_v38 = vld [vmem:[#allocation9 + $0x4c] ss:$16 sps:$4 sm:$0xff]  }
  0x8e   : > { %1910 = vmatpush2.bf16.msra.mxu1 %v6173_v39  ;;  %1718 = vmatprep.subr.bf16.mxu0 %v6174_v40  ;;  %v7517_v34 = vld [vmem:[%s7461_s24 + $0x64] ss:$16 sps:$4 sm:$0xff]   ;;  %v6287_v39 = vld [vmem:[#allocation9 + $0x24c] ss:$16 sps:$4 sm:$0xff]   ;;  %v6282_v40 = vld [vmem:[#allocation9 + $0x48] ss:$16 sps:$4 sm:$0xff]  }
  0x8f   : > { %1911 = vmatprep.subr.bf16.mxu1 %v6176_v41  ;;  %v6285_v41 = vld [vmem:[#allocation9 + $0x248] ss:$16 sps:$4 sm:$0xff]   ;;  %v7543_v53 = vld [vmem:[%s7461_s24 + $0x80] ss:$16 sps:$4 sm:$0xff]  }
  0x91   : > { %1719 = vmatpush2.bf16.msra.mxu0 %v6178_v42  ;;  %v7527_v42 = vld [vmem:[%s7461_s24 + $0x60] ss:$16 sps:$4 sm:$0xff]  }
  0x92   : > { %1912 = vmatpush2.bf16.msra.mxu1 %v6179_v43  ;;  %1720 = vmatprep.subr.bf16.mxu0 %v6180_v44  ;;  %v6296_v43 = vld [vmem:[#allocation9 + $0x2c] ss:$16 sps:$4 sm:$0xff]  }
  0x93   : > { %1913 = vmatprep.subr.bf16.mxu1 %v6182_v45  ;;  %v6299_v44 = vld [vmem:[#allocation9 + $0x22c] ss:$16 sps:$4 sm:$0xff]   ;;  %v7530_v45 = vld [vmem:[%s7461_s24 + $0x68] ss:$16 sps:$4 sm:$0xff]  }
  0x95   : > { %1721 = vmatpush2.bf16.msra.mxu0 %v6184_v46  ;;  %v7533_v46 = vld [vmem:[%s7461_s24 + $0x84] ss:$16 sps:$4 sm:$0xff]  }
  0x96   : > { %1914 = vmatpush2.bf16.msra.mxu1 %v6185_v47  ;;  %1722 = vmatprep.subr.bf16.mxu0 %v6186_v48  ;;  %v7536_v47 = vld [vmem:[%s7461_s24 + $0x8c] ss:$16 sps:$4 sm:$0xff]   ;;  %v6294_v48 = vld [vmem:[#allocation9 + $0x28] ss:$16 sps:$4 sm:$0xff]  }
  0x97   : > { %1915 = vmatprep.subr.bf16.mxu1 %v6188_v49  ;;  %v6297_v49 = vld [vmem:[#allocation9 + $0x228] ss:$16 sps:$4 sm:$0xff]  }
  0x99   : > { %1723 = vmatpush2.bf16.msra.mxu0 %v6190_v50  ;;  %v6308_v50 = vld [vmem:[#allocation9 + $0xc] ss:$16 sps:$4 sm:$0xff]  }
  0x9a   : > { %1916 = vmatpush2.bf16.msra.mxu1 %v6191_v51  ;;  %1724 = vmatprep.subr.bf16.mxu0 %v6192_v52  ;;  %v6311_v51 = vld [vmem:[#allocation9 + $0x20c] ss:$16 sps:$4 sm:$0xff]   ;;  %v6306_v52 = vld [vmem:[#allocation9 + $0x8] ss:$16 sps:$4 sm:$0xff]  }
  0x9b   : > { %1917 = vmatprep.subr.bf16.mxu1 %v6194_v54  ;;  %v7546_v54 = vld [vmem:[%s7461_s24 + $0x88] ss:$16 sps:$4 sm:$0xff]  }
  0x9d   : > { %1725 = vmatpush2.bf16.msra.mxu0 %v6196_v56  ;;  %v6320_v56 = vld [vmem:[#allocation9 + $0x1ec] ss:$16 sps:$4 sm:$0xff]  }
  0x9e   : > { %1918 = vmatpush2.bf16.msra.mxu1 %v6197_v57  ;;  %1726 = vmatprep.subr.bf16.mxu0 %v6198_v58  ;;  %v6323_v57 = vld [vmem:[#allocation9 + $0x3ec] ss:$16 sps:$4 sm:$0xff]   ;;  %v7549_v58 = vld [vmem:[%s7461_s24 + $0xa4] ss:$16 sps:$4 sm:$0xff]  }
  0x9f   : > { %1919 = vmatprep.subr.bf16.mxu1 %v6200_v59  ;;  %v7552_v59 = vld [vmem:[%s7461_s24 + $0xac] ss:$16 sps:$4 sm:$0xff]  }
  0xa1   : > { %1727 = vmatpush2.bf16.msra.mxu0 %v6202_v60  ;;  %v6318_v60 = vld [vmem:[#allocation9 + $0x1e8] ss:$16 sps:$4 sm:$0xff]  }
  0xa2   : > { %1920 = vmatpush2.bf16.msra.mxu1 %v6203_v61  ;;  %1728 = vmatprep.subr.bf16.mxu0 %v6204_v62  ;;  %v6321_v61 = vld [vmem:[#allocation9 + $0x3e8] ss:$16 sps:$4 sm:$0xff]   ;;  %v6332_v62 = vld [vmem:[#allocation9 + $0x1cc] ss:$16 sps:$4 sm:$0xff]  }
  0xa3   : > { %1921 = vmatprep.subr.bf16.mxu1 %v6206_v63  ;;  %v6335_v63 = vld [vmem:[#allocation9 + $0x3cc] ss:$16 sps:$4 sm:$0xff]  }
  0xa5   : > { %1729 = vmatpush2.bf16.msra.mxu0 %v6208_v0  ;;  %v6330_v0 = vld [vmem:[#allocation9 + $0x1c8] ss:$16 sps:$4 sm:$0xff]  }
  0xa6   : > { %1922 = vmatpush2.bf16.msra.mxu1 %v6209_v1  ;;  %1730 = vmatprep.subr.bf16.mxu0 %v6210_v2  ;;  %v6333_v1 = vld [vmem:[#allocation9 + $0x3c8] ss:$16 sps:$4 sm:$0xff]   ;;  %v7559_v2 = vld [vmem:[%s7461_s24 + $0xa0] ss:$16 sps:$4 sm:$0xff]  }
  0xa7   : > { %1923 = vmatprep.subr.bf16.mxu1 %v6212_v3  ;;  %v6344_v3 = vld [vmem:[#allocation9 + $0x1ac] ss:$16 sps:$4 sm:$0xff]  }
  0xa9   : > { %1731 = vmatpush2.bf16.msra.mxu0 %v6214_v4  ;;  %v6347_v4 = vld [vmem:[#allocation9 + $0x3ac] ss:$16 sps:$4 sm:$0xff]  }
  0xaa   : > { %1924 = vmatpush2.bf16.msra.mxu1 %v6215_v5  ;;  %2086 = vmatprep.subr.bf16.mxu0 %v6224_v6  ;;  %v7562_v5 = vld [vmem:[%s7461_s24 + $0xa8] ss:$16 sps:$4 sm:$0xff]   ;;  %v7565_v6 = vld [vmem:[%s7461_s24 + $0xc4] ss:$16 sps:$4 sm:$0xff]  }
  0xab   : > { %2279 = vmatprep.subr.bf16.mxu1 %v6227_v7  ;;  %v7568_v7 = vld [vmem:[%s7461_s24 + $0xcc] ss:$16 sps:$4 sm:$0xff]  }
  0xac   : > { %1733 = vmatmul.mubr.bf16.vlgmr.msra.gmra.mxu0 %v7479_v8 }
  0xad   : > { %1926 = vmatmul.mubr.bf16.vlgmr.msra.gmra.mxu1 %v7482_v9  ;;  %2087 = vmatpush1.bf16.msra.mxu0 %v6222_v10  ;;  %v6342_v10 = vld [vmem:[#allocation9 + $0x1a8] ss:$16 sps:$4 sm:$0xff]  }
  0xae   : > { %2280 = vmatpush1.bf16.msra.mxu1 %v6225_v11  ;;  %1742 = vmatprep.mubr.bf16.mxu0 %v7485_v12  ;;  %v6345_v11 = vld [vmem:[#allocation9 + $0x3a8] ss:$16 sps:$4 sm:$0xff]  }
  0xaf   : > { %1935 = vmatprep.mubr.bf16.mxu1 %v7488_v13  ;;  %2088 = vmatprep.subr.bf16.mxu0 %v6236_v14  ;;  %v6356_v14 = vld [vmem:[#allocation9 + $0x18c] ss:$16 sps:$4 sm:$0xff]  }
  0xb0   : > { %2281 = vmatprep.subr.bf16.mxu1 %v6239_v15  ;;  %v6359_v15 = vld [vmem:[#allocation9 + $0x38c] ss:$16 sps:$4 sm:$0xff]  }
  0xb1   : > { %2089 = vmatpush1.bf16.msra.mxu0 %v6234_v16  ;;  %v6354_v16 = vld [vmem:[#allocation9 + $0x188] ss:$16 sps:$4 sm:$0xff]  }
  0xb2   : > { %2282 = vmatpush1.bf16.msra.mxu1 %v6237_v17  ;;  %2090 = vmatprep.subr.bf16.mxu0 %v6248_v18  ;;  %v7575_v17 = vld [vmem:[%s7461_s24 + $0xc0] ss:$16 sps:$4 sm:$0xff]   ;;  %v7578_v18 = vld [vmem:[%s7461_s24 + $0xc8] ss:$16 sps:$4 sm:$0xff]  }
  0xb3   : > { %2283 = vmatprep.subr.bf16.mxu1 %v6251_v19  ;;  %v6357_v19 = vld [vmem:[#allocation9 + $0x388] ss:$16 sps:$4 sm:$0xff]  }
  0xb4   : > { %1743 = vmatmul.mubr.bf16.gmra.mxu0 %v7495_v20 }
  0xb5   : > { %1936 = vmatmul.mubr.bf16.gmra.mxu1 %v7498_v21  ;;  %1752 = vmatprep.mubr.bf16.mxu0 %v7501_v22 }
  0xb6   : > { %1945 = vmatprep.mubr.bf16.mxu1 %v7504_v23  ;;  %2091 = vmatpush1.bf16.msra.mxu0 %v6246_v24  ;;  %v7581_v24 = vld [vmem:[%s7461_s24 + $0xe4] ss:$16 sps:$4 sm:$0xff]  }
  0xb7   : > { %2284 = vmatpush1.bf16.msra.mxu1 %v6249_v25  ;;  %2092 = vmatprep.subr.bf16.mxu0 %v6260_v26  ;;  %v6368_v25 = vld [vmem:[#allocation9 + $0x16c] ss:$16 sps:$4 sm:$0xff]  }
  0xb8   : > { %2285 = vmatprep.subr.bf16.mxu1 %v6263_v27  ;;  %v7584_v26 = vld [vmem:[%s7461_s24 + $0xec] ss:$16 sps:$4 sm:$0xff]  }
  0xb9   : > { %v6371_v27 = vld [vmem:[#allocation9 + $0x36c] ss:$16 sps:$4 sm:$0xff]  }
  0xba   : > { %2093 = vmatpush1.bf16.msra.mxu0 %v6258_v28  ;;  %v6366_v28 = vld [vmem:[#allocation9 + $0x168] ss:$16 sps:$4 sm:$0xff]  }
  0xbb   : > { %2286 = vmatpush1.bf16.msra.mxu1 %v6261_v31  ;;  %2094 = vmatprep.subr.bf16.mxu0 %v6272_v32  ;;  %v6369_v31 = vld [vmem:[#allocation9 + $0x368] ss:$16 sps:$4 sm:$0xff]  }
  0xbc   : > { %2287 = vmatprep.subr.bf16.mxu1 %v6275_v33  ;;  %1753 = vmatmul.mubr.bf16.gmra.mxu0 %v7511_v29  ;;  %v6378_v32 = vld [vmem:[#allocation9 + $0x148] ss:$16 sps:$4 sm:$0xff]   ;;  %v6380_v33 = vld [vmem:[#allocation9 + $0x14c] ss:$16 sps:$4 sm:$0xff]  }
  0xbd   : > { %1946 = vmatmul.mubr.bf16.gmra.mxu1 %v7514_v30  ;;  %1762 = vmatprep.mubr.bf16.mxu0 %v7517_v34 }
  0xbe   : > { %1955 = vmatprep.mubr.bf16.mxu1 %v7520_v35  ;;  %2095 = vmatpush1.bf16.msra.mxu0 %v6270_v36  ;;  %v6381_v36 = vld [vmem:[#allocation9 + $0x348] ss:$16 sps:$4 sm:$0xff]  }
  0xbf   : > { %2288 = vmatpush1.bf16.msra.mxu1 %v6273_v37  ;;  %2096 = vmatprep.subr.bf16.mxu0 %v6284_v38  ;;  %v6383_v37 = vld [vmem:[#allocation9 + $0x34c] ss:$16 sps:$4 sm:$0xff]   ;;  %v7591_v38 = vld [vmem:[%s7461_s24 + $0xe0] ss:$16 sps:$4 sm:$0xff]  }
  0xc0   : > { %2289 = vmatprep.subr.bf16.mxu1 %v6287_v39  ;;  %v7594_v39 = vld [vmem:[%s7461_s24 + $0xe8] ss:$16 sps:$4 sm:$0xff]  }
  0xc2   : > { %2097 = vmatpush1.bf16.msra.mxu0 %v6282_v40  ;;  %v7597_v40 = vld [vmem:[%s7461_s24 + $0x104] ss:$16 sps:$4 sm:$0xff]  }
  0xc3   : > { %2290 = vmatpush1.bf16.msra.mxu1 %v6285_v41  ;;  %2098 = vmatprep.subr.bf16.mxu0 %v6296_v43  ;;  %v7600_v41 = vld [vmem:[%s7461_s24 + $0x10c] ss:$16 sps:$4 sm:$0xff]   ;;  %v6390_v43 = vld [vmem:[#allocation9 + $0x128] ss:$16 sps:$4 sm:$0xff]  }
  0xc4   : > { %2291 = vmatprep.subr.bf16.mxu1 %v6299_v44  ;;  %1763 = vmatmul.mubr.bf16.gmra.mxu0 %v7527_v42  ;;  %v6392_v44 = vld [vmem:[#allocation9 + $0x12c] ss:$16 sps:$4 sm:$0xff]  }
  0xc5   : > { %1956 = vmatmul.mubr.bf16.gmra.mxu1 %v7530_v45  ;;  %1772 = vmatprep.mubr.bf16.mxu0 %v7533_v46 }
  0xc6   : > { %1965 = vmatprep.mubr.bf16.mxu1 %v7536_v47  ;;  %2099 = vmatpush1.bf16.msra.mxu0 %v6294_v48  ;;  %v6393_v48 = vld [vmem:[#allocation9 + $0x328] ss:$16 sps:$4 sm:$0xff]  }
  0xc7   : > { %2292 = vmatpush1.bf16.msra.mxu1 %v6297_v49  ;;  %2100 = vmatprep.subr.bf16.mxu0 %v6308_v50  ;;  %v6395_v49 = vld [vmem:[#allocation9 + $0x32c] ss:$16 sps:$4 sm:$0xff]   ;;  %v7607_v50 = vld [vmem:[%s7461_s24 + $0x100] ss:$16 sps:$4 sm:$0xff]  }
  0xc8   : > { %2293 = vmatprep.subr.bf16.mxu1 %v6311_v51  ;;  %v7610_v51 = vld [vmem:[%s7461_s24 + $0x108] ss:$16 sps:$4 sm:$0xff]  }
  0xca   : > { %2101 = vmatpush1.bf16.msra.mxu0 %v6306_v52  ;;  %v7613_v52 = vld [vmem:[%s7461_s24 + $0x124] ss:$16 sps:$4 sm:$0xff]  }
  0xcb   : > { %2294 = vmatpush1.bf16.msra.mxu1 %v6309_v55  ;;  %2102 = vmatprep.subr.bf16.mxu0 %v6320_v56  ;;  %v6402_v55 = vld [vmem:[#allocation9 + $0x108] ss:$16 sps:$4 sm:$0xff]   ;;  %v6404_v56 = vld [vmem:[#allocation9 + $0x10c] ss:$16 sps:$4 sm:$0xff]  }
  0xcc   : > { %2295 = vmatprep.subr.bf16.mxu1 %v6323_v57  ;;  %1773 = vmatmul.mubr.bf16.gmra.mxu0 %v7543_v53  ;;  %v6405_v57 = vld [vmem:[#allocation9 + $0x308] ss:$16 sps:$4 sm:$0xff]  }
  0xcd   : > { %1966 = vmatmul.mubr.bf16.gmra.mxu1 %v7546_v54  ;;  %1782 = vmatprep.mubr.bf16.mxu0 %v7549_v58 }
  0xce   : > { %1975 = vmatprep.mubr.bf16.mxu1 %v7552_v59  ;;  %2103 = vmatpush2.bf16.msra.mxu0 %v6318_v60  ;;  %v6407_v60 = vld [vmem:[#allocation9 + $0x30c] ss:$16 sps:$4 sm:$0xff]  }
  0xcf   : > { %2296 = vmatpush2.bf16.msra.mxu1 %v6321_v61  ;;  %2104 = vmatprep.subr.bf16.mxu0 %v6332_v62  ;;  %v7616_v61 = vld [vmem:[%s7461_s24 + $0x12c] ss:$16 sps:$4 sm:$0xff]  }
  0xd0   : > { %2297 = vmatprep.subr.bf16.mxu1 %v6335_v63  ;;  %v6410_v62 = vld [vmem:[%s11020_s3 + $0x74] ss:$8 sps:$4 sm:$0xff]  }
  0xd1   : > { %v7626_v63 = vld [vmem:[%s7461_s24 + $0x120] ss:$16 sps:$4 sm:$0xff]  }
  0xd2   : > { %2105 = vmatpush2.bf16.msra.mxu0 %v6330_v0  ;;  %v7629_v0 = vld [vmem:[%s7461_s24 + $0x128] ss:$16 sps:$4 sm:$0xff]  }
  0xd3   : > { %2298 = vmatpush2.bf16.msra.mxu1 %v6333_v1  ;;  %2106 = vmatprep.subr.bf16.mxu0 %v6344_v3  ;;  %v7632_v1 = vld [vmem:[%s7461_s24 + $0x144] ss:$16 sps:$4 sm:$0xff]   ;;  %v7635_v3 = vld [vmem:[%s7461_s24 + $0x14c] ss:$16 sps:$4 sm:$0xff]  }
  0xd4   : > { %2299 = vmatprep.subr.bf16.mxu1 %v6347_v4  ;;  %1783 = vmatmul.mubr.bf16.gmra.mxu0 %v7559_v2  ;;  %v7642_v4 = vld [vmem:[%s7461_s24 + $0x140] ss:$16 sps:$4 sm:$0xff]  }
  0xd5   : > { %1976 = vmatmul.mubr.bf16.gmra.mxu1 %v7562_v5  ;;  %1792 = vmatprep.mubr.bf16.mxu0 %v7565_v6 }
  0xd6   : > { %1985 = vmatprep.mubr.bf16.mxu1 %v7568_v7  ;;  %2107 = vmatpush2.bf16.msra.mxu0 %v6342_v10  ;;  %v7645_v10 = vld [vmem:[%s7461_s24 + $0x148] ss:$16 sps:$4 sm:$0xff]  }
  0xd7   : > { %2300 = vmatpush2.bf16.msra.mxu1 %v6345_v11  ;;  %2108 = vmatprep.subr.bf16.mxu0 %v6356_v14  ;;  %v7648_v11 = vld [vmem:[%s7461_s24 + $0x164] ss:$16 sps:$4 sm:$0xff]   ;;  %v7651_v14 = vld [vmem:[%s7461_s24 + $0x16c] ss:$16 sps:$4 sm:$0xff]  }
  0xd8   : > { %2301 = vmatprep.subr.bf16.mxu1 %v6359_v15  ;;  %v7658_v15 = vld [vmem:[%s7461_s24 + $0x160] ss:$16 sps:$4 sm:$0xff]  }
  0xda   : > { %2109 = vmatpush2.bf16.msra.mxu0 %v6354_v16  ;;  %v7661_v16 = vld [vmem:[%s7461_s24 + $0x168] ss:$16 sps:$4 sm:$0xff]  }
  0xdb   : > { %2302 = vmatpush2.bf16.msra.mxu1 %v6357_v19  ;;  %2110 = vmatprep.subr.bf16.mxu0 %v6368_v25  ;;  %v7664_v19 = vld [vmem:[%s7461_s24 + $0x184] ss:$16 sps:$4 sm:$0xff]   ;;  %v7667_v25 = vld [vmem:[%s7461_s24 + $0x18c] ss:$16 sps:$4 sm:$0xff]  }
  0xdc   : > { %2303 = vmatprep.subr.bf16.mxu1 %v6371_v27  ;;  %1793 = vmatmul.mubr.bf16.gmra.mxu0 %v7575_v17  ;;  %v6425_v27 = vld [vmem:[%s11020_s3 + $0x174] ss:$8 sps:$4 sm:$0xff]  }
  0xdd   : > { %1986 = vmatmul.mubr.bf16.gmra.mxu1 %v7578_v18  ;;  %1802 = vmatprep.mubr.bf16.mxu0 %v7581_v24 }
  0xde   : > { %1995 = vmatprep.mubr.bf16.mxu1 %v7584_v26  ;;  %2111 = vmatpush2.bf16.msra.mxu0 %v6366_v28  ;;  %v7677_v28 = vld [vmem:[%s7461_s24 + $0x180] ss:$16 sps:$4 sm:$0xff]  }
  0xdf   : > { %2304 = vmatpush2.bf16.msra.mxu1 %v6369_v31  ;;  %2112 = vmatprep.subr.bf16.mxu0 %v6380_v33  ;;  %v7680_v31 = vld [vmem:[%s7461_s24 + $0x188] ss:$16 sps:$4 sm:$0xff]   ;;  %v7686_v33 = vld [vmem:[%s7461_s24 + $0x1ac] ss:$16 sps:$4 sm:$0xff]  }
  0xe0   : > { %2305 = vmatprep.subr.bf16.mxu1 %v6383_v37  ;;  %v7696_v37 = vld [vmem:[%s7461_s24 + $0x1a8] ss:$16 sps:$4 sm:$0xff]  }
  0xe2   : > { %2113 = vmatpush2.bf16.msra.mxu0 %v6378_v32  ;;  %v7683_v32 = vld [vmem:[%s7461_s24 + $0x1a4] ss:$16 sps:$4 sm:$0xff]  }
  0xe3   : > { %2306 = vmatpush2.bf16.msra.mxu1 %v6381_v36  ;;  %2114 = vmatprep.subr.bf16.mxu0 %v6392_v44  ;;  %v7693_v36 = vld [vmem:[%s7461_s24 + $0x1a0] ss:$16 sps:$4 sm:$0xff]   ;;  %v7702_v44 = vld [vmem:[%s7461_s24 + $0x1cc] ss:$16 sps:$4 sm:$0xff]  }
  0xe4   : > { %1803 = vmatmul.mubr.bf16.gmra.mxu0 %v7591_v38  ;;  %2307 = vmatprep.subr.bf16.mxu1 %v6395_v49  ;;  %v7712_v49 = vld [vmem:[%s7461_s24 + $0x1c8] ss:$16 sps:$4 sm:$0xff]  }
  0xe5   : > { %1996 = vmatmul.mubr.bf16.gmra.mxu1 %v7594_v39  ;;  %1812 = vmatprep.mubr.bf16.mxu0 %v7597_v40  ;;  %11294 = vst [vmem:[#allocation28_spill] sm:$0xff] %v7712_v49 }
  0xe6   : > { %2005 = vmatprep.mubr.bf16.mxu1 %v7600_v41  ;;  %2115 = vmatpush2.bf16.msra.mxu0 %v6390_v43  ;;  %v7699_v43 = vld [vmem:[%s7461_s24 + $0x1c4] ss:$16 sps:$4 sm:$0xff]  }
  0xe7   : > { %2308 = vmatpush2.bf16.msra.mxu1 %v6393_v48  ;;  %2116 = vmatprep.subr.bf16.mxu0 %v6404_v56  ;;  %v7709_v48 = vld [vmem:[%s7461_s24 + $0x1c0] ss:$16 sps:$4 sm:$0xff]   ;;  %v7718_v56 = vld [vmem:[%s7461_s24 + $0x1ec] ss:$16 sps:$4 sm:$0xff]  }
  0xe8   : > { %2309 = vmatprep.subr.bf16.mxu1 %v6407_v60  ;;  %11296 = vst [vmem:[#allocation30_spill] sm:$0xff] %v7718_v56  ;;  %v7728_v60 = vld [vmem:[%s7461_s24 + $0x1e8] ss:$16 sps:$4 sm:$0xff]  }
  0xe9   : > { %11297 = vst [vmem:[#allocation31_spill] sm:$0xff] %v7728_v60 }
  0xea   : > { %2117 = vmatpush2.bf16.msra.mxu0 %v6402_v55  ;;  %v7715_v55 = vld [vmem:[%s7461_s24 + $0x1e4] ss:$16 sps:$4 sm:$0xff]  }
  0xeb   : > { %2310 = vmatpush2.bf16.msra.mxu1 %v6405_v57  ;;  %3060 = vmatprep.subr.bf16.mxu0 %v6410_v62  ;;  %11295 = vst [vmem:[#allocation29_spill] sm:$0xff] %v7715_v55  ;;  %v7725_v57 = vld [vmem:[%s7461_s24 + $0x1e0] ss:$16 sps:$4 sm:$0xff]   ;;  %v6990_v62 = vld [vmem:[%s7461_s24 + $0x4] ss:$16 sps:$4 sm:$0xff]  }
  0xec   : > { %1813 = vmatmul.mubr.bf16.gmra.mxu0 %v7607_v50  ;;  %3253 = vmatprep.subr.bf16.mxu1 %v6425_v27  ;;  %v6991_v27 = vld [vmem:[%s7461_s24 + $0xc] ss:$16 sps:$4 sm:$0xff]  }
  0xed   : > { %2006 = vmatmul.mubr.bf16.gmra.mxu1 %v7610_v51  ;;  %1822 = vmatprep.mubr.bf16.mxu0 %v7613_v52 }
  0xee   : > { %2015 = vmatprep.mubr.bf16.mxu1 %v7616_v61 }
  0xf4   : > { %1823 = vmatmul.mubr.bf16.gmra.mxu0 %v7626_v63 }
  0xf5   : > { %2016 = vmatmul.mubr.bf16.gmra.mxu1 %v7629_v0  ;;  %1832 = vmatprep.mubr.bf16.mxu0 %v7632_v1 }
  0xf6   : > { %2025 = vmatprep.mubr.bf16.mxu1 %v7635_v3 }
  0xfc   : > { %1833 = vmatmul.mubr.bf16.gmra.mxu0 %v7642_v4 }
  0xfd   : > { %2026 = vmatmul.mubr.bf16.gmra.mxu1 %v7645_v10  ;;  %1842 = vmatprep.mubr.bf16.mxu0 %v7648_v11 }
  0xfe   : > { %2035 = vmatprep.mubr.bf16.mxu1 %v7651_v14 }
 0x104   : > { %1843 = vmatmul.mubr.bf16.gmra.mxu0 %v7658_v15 }
 0x105   : > { %2036 = vmatmul.mubr.bf16.gmra.mxu1 %v7661_v16  ;;  %1852 = vmatprep.mubr.bf16.mxu0 %v7664_v19 }
 0x106   : > { %2045 = vmatprep.mubr.bf16.mxu1 %v7667_v25 }
 0x10c   : > { %1853 = vmatmul.mubr.bf16.gmra.mxu0 %v7677_v28 }
 0x10d   : > { %2046 = vmatmul.mubr.bf16.gmra.mxu1 %v7680_v31  ;;  %1862 = vmatprep.mubr.bf16.mxu0 %v7683_v32 }
 0x10e   : > { %2055 = vmatprep.mubr.bf16.mxu1 %v7686_v33 }
 0x114   : > { %1863 = vmatmul.mubr.bf16.gmra.mxu0 %v7693_v36 }
 0x115   : > { %2056 = vmatmul.mubr.bf16.gmra.mxu1 %v7696_v37  ;;  %1872 = vmatprep.mubr.bf16.mxu0 %v7699_v43 }
 0x116   : > { %2065 = vmatprep.mubr.bf16.mxu1 %v7702_v44 }
 0x11c   : > { %1873 = vmatmul.mubr.bf16.gmra.mxu0 %v7709_v48 }
 0x11d   : > { %2066 = vmatmul.mubr.bf16.gmra.mxu1 %v7712_v49  ;;  %1882 = vmatprep.mubr.bf16.mxu0 %v7715_v55  ;;  %v6408_v49 = vld [vmem:[%s11020_s3 + $0x70] ss:$8 sps:$4 sm:$0xff]   ;;  %v6413_v55 = vld [vmem:[%s11020_s3 + $0x64] ss:$8 sps:$4 sm:$0xff]  }
 0x11e   : > { %2075 = vmatprep.mubr.bf16.mxu1 %v7718_v56  ;;  %v6423_v56 = vld [vmem:[%s11020_s3 + $0x170] ss:$8 sps:$4 sm:$0xff]  }
 0x124   : > { %1883 = vmatmul.mubr.bf16.gmra.mxu0 %v7725_v57 }
 0x125   : > { %2076 = vmatmul.mubr.bf16.gmra.mxu1 %v7728_v60  ;;  %2118 = vmatprep.mubr.bf16.mxu0 %v6990_v62  ;;  %v6434_v60 = vld [vmem:[%s11020_s3 + $0x164] ss:$8 sps:$4 sm:$0xff]   ;;  %v6411_v62 = vld [vmem:[%s11020_s3 + $0x60] ss:$8 sps:$4 sm:$0xff]  }
 0x126   : > { %2311 = vmatprep.mubr.bf16.mxu1 %v6991_v27  ;;  %v6432_v27 = vld [vmem:[%s11020_s3 + $0x160] ss:$8 sps:$4 sm:$0xff]  }
 0x12c   : > { %2119 = vmatmul.mubr.bf16.vlgmr.msra.gmra.mxu0 %v7479_v8  ;;  %v6416_v8 = vld [vmem:[%s11020_s3 + $0x54] ss:$8 sps:$4 sm:$0xff]  }
 0x12d   : > { %2312 = vmatmul.mubr.bf16.vlgmr.msra.gmra.mxu1 %v7482_v9  ;;  %2128 = vmatprep.mubr.bf16.mxu0 %v7485_v12  ;;  %v6443_v9 = vld [vmem:[%s11020_s3 + $0x154] ss:$8 sps:$4 sm:$0xff]   ;;  %v6414_v12 = vld [vmem:[%s11020_s3 + $0x50] ss:$8 sps:$4 sm:$0xff]  }
 0x12e   : > { %2321 = vmatprep.mubr.bf16.mxu1 %v7488_v13  ;;  %3061 = vmatpush1.bf16.msra.mxu0 %v6408_v49  ;;  %v6441_v13 = vld [vmem:[%s11020_s3 + $0x150] ss:$8 sps:$4 sm:$0xff]   ;;  %v6419_v49 = vld [vmem:[%s11020_s3 + $0x44] ss:$8 sps:$4 sm:$0xff]  }
 0x12f   : > { %3254 = vmatpush1.bf16.msra.mxu1 %v6423_v56  ;;  %3062 = vmatprep.subr.bf16.mxu0 %v6413_v55  ;;  %v6452_v55 = vld [vmem:[%s11020_s3 + $0x144] ss:$8 sps:$4 sm:$0xff]   ;;  %v6417_v56 = vld [vmem:[%s11020_s3 + $0x40] ss:$8 sps:$4 sm:$0xff]  }
 0x130   : > { %3255 = vmatprep.subr.bf16.mxu1 %v6434_v60  ;;  %v6450_v60 = vld [vmem:[%s11020_s3 + $0x140] ss:$8 sps:$4 sm:$0xff]  }
 0x132   : > { %3063 = vmatpush1.bf16.msra.mxu0 %v6411_v62  ;;  %v6428_v62 = vld [vmem:[%s11020_s3 + $0x24] ss:$8 sps:$4 sm:$0xff]  }
 0x133   : > { %3256 = vmatpush1.bf16.msra.mxu1 %v6432_v27  ;;  %3064 = vmatprep.subr.bf16.mxu0 %v6416_v8  ;;  %v6470_v27 = vld [vmem:[%s11020_s3 + $0x124] ss:$8 sps:$4 sm:$0xff]   ;;  %v6426_v8 = vld [vmem:[%s11020_s3 + $0x20] ss:$8 sps:$4 sm:$0xff]  }
 0x134   : > { %3257 = vmatprep.subr.bf16.mxu1 %v6443_v9  ;;  %2129 = vmatmul.mubr.bf16.gmra.mxu0 %v7495_v20  ;;  %v6422_v20 = vld [vmem:[%s11020_s3 + $0x34] ss:$8 sps:$4 sm:$0xff]   ;;  %v6468_v9 = vld [vmem:[%s11020_s3 + $0x120] ss:$8 sps:$4 sm:$0xff]  }
 0x135   : > { %2322 = vmatmul.mubr.bf16.gmra.mxu1 %v7498_v21  ;;  %2138 = vmatprep.mubr.bf16.mxu0 %v7501_v22  ;;  %v6461_v21 = vld [vmem:[%s11020_s3 + $0x134] ss:$8 sps:$4 sm:$0xff]   ;;  %v6420_v22 = vld [vmem:[%s11020_s3 + $0x30] ss:$8 sps:$4 sm:$0xff]  }
 0x136   : > { %2331 = vmatprep.mubr.bf16.mxu1 %v7504_v23  ;;  %3065 = vmatpush1.bf16.msra.mxu0 %v6414_v12  ;;  %v6459_v23 = vld [vmem:[%s11020_s3 + $0x130] ss:$8 sps:$4 sm:$0xff]   ;;  %v6437_v12 = vld [vmem:[%s11020_s3 + $0x4] ss:$8 sps:$4 sm:$0xff]  }
 0x137   : > { %3258 = vmatpush1.bf16.msra.mxu1 %v6441_v13  ;;  %3066 = vmatprep.subr.bf16.mxu0 %v6419_v49  ;;  %v6479_v13 = vld [vmem:[%s11020_s3 + $0x104] ss:$8 sps:$4 sm:$0xff]   ;;  %v6435_v49 = vld [vmem:[%s11020_s3] ss:$8 sps:$4 sm:$0xff]  }
 0x138   : > { %3259 = vmatprep.subr.bf16.mxu1 %v6452_v55  ;;  %v6477_v55 = vld [vmem:[%s11020_s3 + $0x100] ss:$8 sps:$4 sm:$0xff]  }
 0x13a   : > { %3067 = vmatpush1.bf16.msra.mxu0 %v6417_v56  ;;  %v6446_v56 = vld [vmem:[%s11020_s3 + $0xe4] ss:$8 sps:$4 sm:$0xff]  }
 0x13b   : > { %3260 = vmatpush1.bf16.msra.mxu1 %v6450_v60  ;;  %3068 = vmatprep.subr.bf16.mxu0 %v6422_v20  ;;  %v6485_v60 = vld [vmem:[%s11020_s3 + $0x1e4] ss:$8 sps:$4 sm:$0xff]   ;;  %v6444_v20 = vld [vmem:[%s11020_s3 + $0xe0] ss:$8 sps:$4 sm:$0xff]  }
 0x13c   : > { %3261 = vmatprep.subr.bf16.mxu1 %v6461_v21  ;;  %2139 = vmatmul.mubr.bf16.gmra.mxu0 %v7511_v29  ;;  %v6431_v29 = vld [vmem:[%s11020_s3 + $0x14] ss:$8 sps:$4 sm:$0xff]   ;;  %v6483_v21 = vld [vmem:[%s11020_s3 + $0x1e0] ss:$8 sps:$4 sm:$0xff]  }
 0x13d   : > { %2332 = vmatmul.mubr.bf16.gmra.mxu1 %v7514_v30  ;;  %2148 = vmatprep.mubr.bf16.mxu0 %v7517_v34  ;;  %v6476_v30 = vld [vmem:[%s11020_s3 + $0x114] ss:$8 sps:$4 sm:$0xff]   ;;  %v6429_v34 = vld [vmem:[%s11020_s3 + $0x10] ss:$8 sps:$4 sm:$0xff]  }
 0x13e   : > { %2341 = vmatprep.mubr.bf16.mxu1 %v7520_v35  ;;  %3069 = vmatpush1.bf16.msra.mxu0 %v6420_v22  ;;  %v6474_v35 = vld [vmem:[%s11020_s3 + $0x110] ss:$8 sps:$4 sm:$0xff]   ;;  %v6455_v22 = vld [vmem:[%s11020_s3 + $0xc4] ss:$8 sps:$4 sm:$0xff]  }
 0x13f   : > { %3262 = vmatpush1.bf16.msra.mxu1 %v6459_v23  ;;  %3070 = vmatprep.subr.bf16.mxu0 %v6428_v62  ;;  %v6453_v23 = vld [vmem:[%s11020_s3 + $0xc0] ss:$8 sps:$4 sm:$0xff]   ;;  %v6458_v62 = vld [vmem:[%s11020_s3 + $0xb4] ss:$8 sps:$4 sm:$0xff]  }
 0x140   : > { %3263 = vmatprep.subr.bf16.mxu1 %v6470_v27  ;;  %v6462_v27 = vld [vmem:[%s11020_s3 + $0xa0] ss:$8 sps:$4 sm:$0xff]  }
 0x142   : > { %3071 = vmatpush1.bf16.msra.mxu0 %v6426_v8  ;;  %v6467_v8 = vld [vmem:[%s11020_s3 + $0x94] ss:$8 sps:$4 sm:$0xff]  }
 0x143   : > { %3264 = vmatpush1.bf16.msra.mxu1 %v6468_v9  ;;  %3072 = vmatprep.subr.bf16.mxu0 %v6431_v29  ;;  %v6471_v9 = vld [vmem:[%s11020_s3 + $0x80] ss:$8 sps:$4 sm:$0xff]   ;;  %v6497_v29 = vld [vmem:[%s11020_s3 + $0x1a4] ss:$8 sps:$4 sm:$0xff]  }
 0x144   : > { %3265 = vmatprep.subr.bf16.mxu1 %v6476_v30  ;;  %2149 = vmatmul.mubr.bf16.gmra.mxu0 %v7527_v42  ;;  %v6440_v42 = vld [vmem:[%s11020_s3 + $0xf4] ss:$8 sps:$4 sm:$0xff]  }
 0x145   : > { %2342 = vmatmul.mubr.bf16.gmra.mxu1 %v7530_v45  ;;  %2158 = vmatprep.mubr.bf16.mxu0 %v7533_v46  ;;  %v6482_v45 = vld [vmem:[%s11020_s3 + $0x1f4] ss:$8 sps:$4 sm:$0xff]   ;;  %v6438_v46 = vld [vmem:[%s11020_s3 + $0xf0] ss:$8 sps:$4 sm:$0xff]  }
 0x146   : > { %2351 = vmatprep.mubr.bf16.mxu1 %v7536_v47  ;;  %3073 = vmatpush1.bf16.msra.mxu0 %v6429_v34  ;;  %v6480_v47 = vld [vmem:[%s11020_s3 + $0x1f0] ss:$8 sps:$4 sm:$0xff]  }
 0x147   : > { %3266 = vmatpush1.bf16.msra.mxu1 %v6474_v35  ;;  %3074 = vmatprep.subr.bf16.mxu0 %v6437_v12 }
 0x148   : > { %3267 = vmatprep.subr.bf16.mxu1 %v6479_v13 }
 0x14a   : > { %3075 = vmatpush1.bf16.msra.mxu0 %v6435_v49 }
 0x14b   : > { %3268 = vmatpush1.bf16.msra.mxu1 %v6477_v55  ;;  %3076 = vmatprep.subr.bf16.mxu0 %v6440_v42  ;;  %v6509_v55 = vld [vmem:[%s11020_s3 + $0x184] ss:$8 sps:$4 sm:$0xff]  }
 0x14c   : > { %3269 = vmatprep.subr.bf16.mxu1 %v6482_v45  ;;  %2159 = vmatmul.mubr.bf16.gmra.mxu0 %v7543_v53  ;;  %v6449_v53 = vld [vmem:[%s11020_s3 + $0xd4] ss:$8 sps:$4 sm:$0xff]  }
 0x14d   : > { %2352 = vmatmul.mubr.bf16.gmra.mxu1 %v7546_v54  ;;  %2168 = vmatprep.mubr.bf16.mxu0 %v7549_v58  ;;  %v6488_v54 = vld [vmem:[%s11020_s3 + $0x1d4] ss:$8 sps:$4 sm:$0xff]   ;;  %v6447_v58 = vld [vmem:[%s11020_s3 + $0xd0] ss:$8 sps:$4 sm:$0xff]  }
 0x14e   : > { %2361 = vmatprep.mubr.bf16.mxu1 %v7552_v59  ;;  %3077 = vmatpush2.bf16.msra.mxu0 %v6438_v46  ;;  %v6486_v59 = vld [vmem:[%s11020_s3 + $0x1d0] ss:$8 sps:$4 sm:$0xff]   ;;  %v6507_v46 = vld [vmem:[%s11020_s3 + $0x180] ss:$8 sps:$4 sm:$0xff]  }
 0x14f   : > { %3270 = vmatpush2.bf16.msra.mxu1 %v6480_v47  ;;  %3078 = vmatprep.subr.bf16.mxu0 %v6446_v56 }
 0x150   : > { %3271 = vmatprep.subr.bf16.mxu1 %v6485_v60 }
 0x152   : > { %3079 = vmatpush2.bf16.msra.mxu0 %v6444_v20 }
 0x153   : > { %3272 = vmatpush2.bf16.msra.mxu1 %v6483_v21  ;;  %3080 = vmatprep.subr.bf16.mxu0 %v6449_v53 }
 0x154   : > { %3273 = vmatprep.subr.bf16.mxu1 %v6488_v54  ;;  %2169 = vmatmul.mubr.bf16.gmra.mxu0 %v7559_v2  ;;  %v6491_v2 = vld [vmem:[%s11020_s3 + $0x1c4] ss:$8 sps:$4 sm:$0xff]  }
 0x155   : > { %2362 = vmatmul.mubr.bf16.gmra.mxu1 %v7562_v5  ;;  %2178 = vmatprep.mubr.bf16.mxu0 %v7565_v6  ;;  %v6456_v5 = vld [vmem:[%s11020_s3 + $0xb0] ss:$8 sps:$4 sm:$0xff]   ;;  %v6489_v6 = vld [vmem:[%s11020_s3 + $0x1c0] ss:$8 sps:$4 sm:$0xff]  }
 0x156   : > { %2371 = vmatprep.mubr.bf16.mxu1 %v7568_v7  ;;  %3081 = vmatpush2.bf16.msra.mxu0 %v6447_v58  ;;  %v6464_v7 = vld [vmem:[%s11020_s3 + $0xa4] ss:$8 sps:$4 sm:$0xff]  }
 0x157   : > { %3274 = vmatpush2.bf16.msra.mxu1 %v6486_v59  ;;  %3082 = vmatprep.subr.bf16.mxu0 %v6455_v22 }
 0x158   : > { %3275 = vmatprep.subr.bf16.mxu1 %v6491_v2 }
 0x15a   : > { %3083 = vmatpush2.bf16.msra.mxu0 %v6453_v23 }
 0x15b   : > { %3084 = vmatprep.subr.bf16.mxu0 %v6458_v62  ;;  %3276 = vmatpush2.bf16.msra.mxu1 %v6489_v6 }
 0x15c   : > { %2179 = vmatmul.mubr.bf16.gmra.mxu0 %v7575_v17  ;;  %v6494_v17 = vld [vmem:[%s11020_s3 + $0x1b4] ss:$8 sps:$4 sm:$0xff]  }
 0x15d   : > { %2372 = vmatmul.mubr.bf16.gmra.mxu1 %v7578_v18  ;;  %2188 = vmatprep.mubr.bf16.mxu0 %v7581_v24  ;;  %v6465_v18 = vld [vmem:[%s11020_s3 + $0x90] ss:$8 sps:$4 sm:$0xff]  }
 0x15e   : > { %2381 = vmatprep.mubr.bf16.mxu1 %v7584_v26  ;;  %3085 = vmatpush2.bf16.msra.mxu0 %v6456_v5  ;;  %v6492_v24 = vld [vmem:[%s11020_s3 + $0x1b0] ss:$8 sps:$4 sm:$0xff]   ;;  %v6473_v26 = vld [vmem:[%s11020_s3 + $0x84] ss:$8 sps:$4 sm:$0xff]   ;;  %v11048_v5 = vlaneseq }
 0x15f   : > { %3086 = vmatprep.subr.bf16.mxu0 %v6464_v7  ;;  %3277 = vmatprep.subr.bf16.mxu1 %v6494_v17 }
 0x160   : > { %3278 = vmatpush2.bf16.msra.mxu1 %v6492_v24  ;;  %v8045_v6 = vshrl.u32 %v11048_v5, 7 }
 0x161   : > { %3279 = vmatprep.subr.bf16.mxu1 %v6497_v29 }
 0x162   : > { %3087 = vmatpush2.bf16.msra.mxu0 %v6462_v27  ;;  %11298 = vst [vmem:[#allocation32_spill] sm:$0xff] %v8045_v6  ;;  %v8082_v29 = vsub.s32 0, %v8045_v6 }
 0x163   : > { %3088 = vmatprep.subr.bf16.mxu0 %v6467_v8  ;;  %v8052_v8 = vsub.s32 1, %v8045_v6 }
 0x164   : > { %2189 = vmatmul.mubr.bf16.gmra.mxu0 %v7591_v38  ;;  %v6495_v38 = vld [vmem:[%s11020_s3 + $0x1a0] ss:$8 sps:$4 sm:$0xff]   ;;  %11301 = vst [vmem:[#allocation35_spill] sm:$0xff] %v8082_v29 }
 0x165   : > { %2382 = vmatmul.mubr.bf16.gmra.mxu1 %v7594_v39  ;;  %2198 = vmatprep.mubr.bf16.mxu0 %v7597_v40  ;;  %v6503_v39 = vld [vmem:[#allocation11 + $0x74] ss:$8 sps:$4 sm:$0xff]   ;;  %11299 = vst [vmem:[#allocation33_spill] sm:$0xff] %v8052_v8 }
 0x166   : > { %2391 = vmatprep.mubr.bf16.mxu1 %v7600_v41  ;;  %3089 = vmatpush2.bf16.msra.mxu0 %v6465_v18 }
 0x167   : > { %3090 = vmatprep.subr.bf16.mxu0 %v6473_v26  ;;  %3280 = vmatpush2.bf16.msra.mxu1 %v6495_v38 }
 0x16a   : > { %3091 = vmatpush2.bf16.msra.mxu0 %v6471_v9 }
 0x16b   : > { %3906 = vmatprep.subr.bf16.mxu0 %v6503_v39 }
 0x16c   : > { %v7940_v40 = vpop.f32.mrf.mxu0  ;;  %2199 = vmatmul.mubr.bf16.gmra.mxu0 %v7607_v50  ;;  %v6500_v50 = vld [vmem:[%s11020_s3 + $0x194] ss:$8 sps:$4 sm:$0xff]  }
 0x16d   : > { %v7942_v41 = vpop.f32.mrf.mxu1  ;;  %2392 = vmatmul.mubr.bf16.gmra.mxu1 %v7610_v51  ;;  %2208 = vmatprep.mubr.bf16.mxu0 %v7613_v52  ;;  %v6498_v52 = vld [vmem:[%s11020_s3 + $0x190] ss:$8 sps:$4 sm:$0xff]  }
 0x16e   : > { %2401 = vmatprep.mubr.bf16.mxu1 %v7616_v61  ;;  %v7948_v30 = vpop.f32.mrf.mxu0  ;;  %3281 = vmatprep.subr.bf16.mxu1 %v6500_v50 }
 0x16f   : > { %v7950_v34 = vpop.f32.mrf.mxu1  ;;  %3282 = vmatpush2.bf16.msra.mxu1 %v6498_v52 }
 0x170   : > { %v7952_v35 = vpop.f32.mrf.mxu0  ;;  %3283 = vmatprep.subr.bf16.mxu1 %v6509_v55  ;;  %v11303_v55 = vld [vmem:[#allocation28_spill] sm:$0xff] }
 0x171   : > { %v7954_v12 = vpop.f32.mrf.mxu1 }
 0x172   : > { %v7959_v13 = vpop.f32.mrf.mxu0 }
 0x173   : > { %v7961_v51 = vpop.f32.mrf.mxu1  ;;  %3284 = vmatpush2.bf16.msra.mxu1 %v6507_v46  ;;  %v11305_v46 = vld [vmem:[#allocation29_spill] sm:$0xff] }
 0x174   : > { %v7966_v61 = vpop.f32.mrf.mxu0  ;;  %2209 = vmatmul.mubr.bf16.gmra.mxu0 %v7626_v63 }
 0x175   : > { %v7968_v49 = vpop.f32.mrf.mxu1  ;;  %2402 = vmatmul.mubr.bf16.gmra.mxu1 %v7629_v0  ;;  %2218 = vmatprep.mubr.bf16.mxu0 %v7632_v1  ;;  %v6518_v1 = vld [vmem:[#allocation11 + $0x174] ss:$8 sps:$4 sm:$0xff]  }
 0x176   : > { %2411 = vmatprep.mubr.bf16.mxu1 %v7635_v3  ;;  %v7977_v42 = vpop.f32.mrf.mxu0  ;;  %4099 = vmatprep.subr.bf16.mxu1 %v6518_v1  ;;  %v11306_v1 = vld [vmem:[#allocation30_spill] sm:$0xff] }
 0x177   : > { %v7979_v45 = vpop.f32.mrf.mxu1 }
 0x178   : > { %v7984_v63 = vpop.f32.mrf.mxu0 }
 0x179   : > { %v7986_v0 = vpop.f32.mrf.mxu1 }
 0x17a   : > { %v7988_v3 = vpop.f32.mrf.mxu0 }
 0x17b   : > { %v7990_v47 = vpop.f32.mrf.mxu1 }
 0x17c   : > { %v7992_v56 = vpop.f32.mrf.mxu0  ;;  %2219 = vmatmul.mubr.bf16.gmra.mxu0 %v7642_v4 }
 0x17d   : > { %v7994_v60 = vpop.f32.mrf.mxu1  ;;  %2412 = vmatmul.mubr.bf16.gmra.mxu1 %v7645_v10  ;;  %2228 = vmatprep.mubr.bf16.mxu0 %v7648_v11 }
 0x17e   : > { %2421 = vmatprep.mubr.bf16.mxu1 %v7651_v14  ;;  %v8000_v20 = vpop.f32.mrf.mxu0 }
 0x17f   : > { %v8002_v21 = vpop.f32.mrf.mxu1 }
 0x180   : > { %v8004_v53 = vpop.f32.mrf.mxu0 }
 0x181   : > { %v8006_v54 = vpop.f32.mrf.mxu1 }
 0x182   : > { %v8008_v58 = vpop.f32.mrf.mxu0 }
 0x183   : > { %v8010_v59 = vpop.f32.mrf.mxu1 }
 0x184   : > { %v8012_v22 = vpop.f32.mrf.mxu0  ;;  %2229 = vmatmul.mubr.bf16.gmra.mxu0 %v7658_v15 }
 0x185   : > { %v8014_v4 = vpop.f32.mrf.mxu1  ;;  %2422 = vmatmul.mubr.bf16.gmra.mxu1 %v7661_v16  ;;  %2238 = vmatprep.mubr.bf16.mxu0 %v7664_v19 }
 0x186   : > { %2431 = vmatprep.mubr.bf16.mxu1 %v7667_v25  ;;  %v8020_v10 = vpop.f32.mrf.mxu0 }
 0x187   : > { %v8022_v11 = vpop.f32.mrf.mxu1 }
 0x188   : > { %v8024_v14 = vpop.f32.mrf.mxu0 }
 0x189   : > { %v8026_v23 = vpop.f32.mrf.mxu1 }
 0x18a   : > { %v8028_v62 = vpop.f32.mrf.mxu0 }
 0x18b   : > { %v8030_v2 = vpop.f32.mrf.mxu1 }
 0x18c   : > { %v8032_v15 = vpop.f32.mrf.mxu0  ;;  %2239 = vmatmul.mubr.bf16.gmra.mxu0 %v7677_v28 }
 0x18d   : > { %v8034_v16 = vpop.f32.mrf.mxu1  ;;  %2432 = vmatmul.mubr.bf16.gmra.mxu1 %v7680_v31  ;;  %2248 = vmatprep.mubr.bf16.mxu0 %v7683_v32  ;;  %v8061_v32 = vld [vmem:[%s11019_s2] sm:$0xf] }
 0x18e   : > { %2441 = vmatprep.mubr.bf16.mxu1 %v7686_v33  ;;  %v8040_v19 = vpop.f32.mrf.mxu0  ;;  %11300 = vst [vmem:[#allocation34_spill] sm:$0xff] %v8061_v32  ;;  %v8071_v18 = vrot.slane %v8061_v32, %v8052_v8  ;;  %v8099_v50 = vrot.slane %v8061_v32, %v8082_v29 }
 0x18f   : > { %v8042_v25 = vpop.f32.mrf.mxu1 }
 0x190   : > { %v8047_v7 = vpop.f32.mrf.mxu0  ;;  %v1741_v9 = vadd.f32 %v7959_v13, %v8071_v18  ;;  %v1737_v38 = vadd.f32 %v7948_v30, %v8071_v18 }
 0x191   : > { %v8049_v27 = vpop.f32.mrf.mxu1 }
 0x192   : > { %v8054_v28 = vpop.f32.mrf.mxu0  ;;  %v8095_v39 = vadd.f32 %v7961_v51, %v1741_v9  ;;  %v8108_v30 = vadd.f32 %v7950_v34, %v1737_v38  ;;  %v1739_v51 = vadd.f32 %v7952_v35, %v8099_v50  ;;  %v1735_v34 = vadd.f32 %v7940_v40, %v8099_v50 }
 0x193   : > { %v8056_v31 = vpop.f32.mrf.mxu1  ;;  %v1747_v35 = vadd.f32 %v7977_v42, %v8071_v18 }
 0x194   : > { %v8063_v33 = vpop.f32.mrf.mxu0  ;;  %2249 = vmatmul.mubr.bf16.gmra.mxu0 %v7693_v36  ;;  %11302 = vst [vmem:[#allocation36_spill] sm:$0xff] %v8095_v39  ;;  %11304 = vst [vmem:[#allocation28_spill] sm:$0xff] %v8108_v30  ;;  %v11309_v40 = vmax.f32 %v8095_v39, 0.0  ;;  %v8147_v6 = vadd.f32 %v7942_v41, %v1735_v34  ;;  %v6501_v39 = vld [vmem:[#allocation11 + $0x70] ss:$8 sps:$4 sm:$0xff]  }
 0x195   : > { %v8065_v17 = vpop.f32.mrf.mxu1  ;;  %2442 = vmatmul.mubr.bf16.gmra.mxu1 %v7696_v37  ;;  %2258 = vmatprep.mubr.bf16.mxu0 %v7699_v43 }
 0x196   : > { %2451 = vmatprep.mubr.bf16.mxu1 %v7702_v44  ;;  %v8075_v24 = vpop.f32.mrf.mxu0  ;;  %11311 = vst [vmem:[#allocation38_spill] sm:$0xff] %v8147_v6 }
 0x197   : > { %v8077_v26 = vpop.f32.mrf.mxu1 }
 0x198   : > { %v8084_v36 = vpop.f32.mrf.mxu0 }
 0x199   : > { %v8086_v37 = vpop.f32.mrf.mxu1 }
 0x19a   : > { %v8090_v43 = vpop.f32.mrf.mxu0 }
 0x19b   : > { %v8092_v44 = vpop.f32.mrf.mxu1 }
 0x19c   : > { %v8101_v13 = vpop.f32.mrf.mxu0  ;;  %2259 = vmatmul.mubr.bf16.gmra.mxu0 %v7709_v48  ;;  %v1751_v48 = vadd.f32 %v7988_v3, %v8071_v18 }
 0x19d   : > { %v8103_v52 = vpop.f32.mrf.mxu1  ;;  %2452 = vmatmul.mubr.bf16.gmra.mxu1 %v11303_v55  ;;  %2268 = vmatprep.mubr.bf16.mxu0 %v11305_v46  ;;  %v11060_v46 = vmax.f32 %v8108_v30, 0.0  ;;  %v1757_v30 = vadd.f32 %v8000_v20, %v8071_v18 }
 0x19e   : > { %2461 = vmatprep.mubr.bf16.mxu1 %v11306_v1  ;;  %v8114_v9 = vpop.f32.mrf.mxu0  ;;  %v8131_v1 = vadd.f32 %v7954_v12, %v1739_v51  ;;  %v8138_v3 = vadd.f32 %v7990_v47, %v1751_v48  ;;  %v11314_v51 = vld [vmem:[#allocation31_spill] sm:$0xff]  ;;  %v8156_v47 = vadd.f32 %v7979_v45, %v1747_v35  ;;  %v1745_v45 = vadd.f32 %v7966_v61, %v8099_v50 }
 0x19f   : > { %v8116_v5 = vpop.f32.mrf.mxu1  ;;  %v8144_v32 = vpack.c.bf16 %v11309_v40, %v11060_v46  ;;  %v1749_v40 = vadd.f32 %v7984_v63, %v8099_v50 }
 0x1a0   : > { %v8123_v38 = vpop.f32.mrf.mxu0  ;;  %11307 = vst [vmem:[#allocation29_spill] sm:$0xff] %v8131_v1  ;;  %11308 = vst [vmem:[#allocation30_spill] sm:$0xff] %v8138_v3  ;;  %v11317_v46 = vmax.f32 %v8131_v1, 0.0  ;;  %v11321_v20 = vmax.f32 %v8156_v47, 0.0 }
 0x1a1   : > { %v8125_v55 = vpop.f32.mrf.mxu1  ;;  %11310 = vst [vmem:[#allocation37_spill] sm:$0xff] %v8144_v32  ;;  %11315 = vst [vmem:[#allocation31_spill] sm:$0xff] %v8156_v47 }
 0x1a2   : > { %v8133_v29 = vpop.f32.mrf.mxu0 }
 0x1a3   : > { %v8135_v8 = vpop.f32.mrf.mxu1 }
 0x1a4   : > { %v8149_v42 = vpop.f32.mrf.mxu0  ;;  %2269 = vmatmul.mubr.bf16.gmra.mxu0 %v7725_v57  ;;  %v1761_v57 = vadd.f32 %v8008_v58, %v8071_v18 }
 0x1a5   : > { %11312 = vst [vmem:[#allocation39_spill] sm:$0xff] %v8149_v42  ;;  %v8151_v12 = vpop.f32.mrf.mxu1  ;;  %2462 = vmatmul.mubr.bf16.gmra.mxu1 %v11314_v51  ;;  %3092 = vmatprep.mubr.bf16.mxu0 %v8144_v32  ;;  %v11065_v51 = vmax.f32 %v8147_v6, 0.0  ;;  %v8186_v32 = vadd.f32 %v7986_v0, %v1749_v40  ;;  %v11322_v42 = vmax.f32 %v8138_v3, 0.0  ;;  %v8210_v40 = vadd.f32 %v8002_v21, %v1757_v30  ;;  %v6510_v3 = vld [vmem:[#allocation11 + $0x50] ss:$8 sps:$4 sm:$0xff]  }
 0x1a6   : > { %11313 = vst [vmem:[#allocation40_spill] sm:$0xff] %v8151_v12  ;;  %v8162_v41 = vpop.f32.mrf.mxu0  ;;  %v8193_v63 = vadd.f32 %v8010_v59, %v1761_v57  ;;  %v6504_v59 = vld [vmem:[#allocation11 + $0x60] ss:$8 sps:$4 sm:$0xff]   ;;  %v1771_v21 = vadd.f32 %v8028_v62, %v8071_v18 }
 0x1a7   : > { %v8164_v34 = vpop.f32.mrf.mxu1  ;;  %v8183_v58 = vpack.c.bf16 %v11317_v46, %v11065_v51  ;;  %11319 = vst [vmem:[#allocation43_spill] sm:$0xff] %v8186_v32  ;;  %v8199_v6 = vpack.c.bf16 %v11322_v42, %v11321_v20  ;;  %v8202_v46 = vadd.f32 %v7968_v49, %v1745_v45  ;;  %11326 = vst [vmem:[#allocation48_spill] sm:$0xff] %v8210_v40  ;;  %v6512_v20 = vld [vmem:[#allocation11 + $0x54] ss:$8 sps:$4 sm:$0xff]   ;;  %v11327_v62 = vmax.f32 %v8186_v32, 0.0 }
 0x1a8   : > { %v8172_v35 = vpop.f32.mrf.mxu0  ;;  %11320 = vst [vmem:[#allocation44_spill] sm:$0xff] %v8193_v63  ;;  %v1759_v42 = vadd.f32 %v8004_v53, %v8099_v50  ;;  %v6515_v53 = vld [vmem:[#allocation11 + $0x44] ss:$8 sps:$4 sm:$0xff]  }
 0x1a9   : > { %v8174_v48 = vpop.f32.mrf.mxu1  ;;  %11318 = vst [vmem:[#allocation42_spill] sm:$0xff] %v8183_v58  ;;  %11323 = vst [vmem:[#allocation45_spill] sm:$0xff] %v8199_v6  ;;  %v11072_v30 = vmax.f32 %v8202_v46, 0.0 }
 0x1aa   : > { %11316 = vst [vmem:[#allocation41_spill] sm:$0xff] %v8174_v48  ;;  %v8188_v61 = vpop.f32.mrf.mxu0  ;;  %v6506_v48 = vld [vmem:[#allocation11 + $0x64] ss:$8 sps:$4 sm:$0xff]   ;;  %11324 = vst [vmem:[#allocation46_spill] sm:$0xff] %v8202_v46 }
 0x1ab   : > { %v8190_v12 = vpop.f32.mrf.mxu1  ;;  %v8237_v1 = vpack.c.bf16 %v11327_v62, %v11072_v30 }
 0x1ac   : > { %v8204_v51 = vpop.f32.mrf.mxu0  ;;  %3093 = vmatmul.mubr.bf16.vlgmr.msra.gmra.mxu0 %v8183_v58 }
 0x1ad   : > { %v8206_v0 = vpop.f32.mrf.mxu1  ;;  %3102 = vmatprep.mubr.bf16.mxu0 %v8199_v6  ;;  %3907 = vmatpush1.bf16.msra.mxu0 %v6501_v39  ;;  %v1755_v39 = vadd.f32 %v7992_v56, %v8099_v50  ;;  %11328 = vst [vmem:[#allocation49_spill] sm:$0xff] %v8237_v1  ;;  %v8240_v6 = vadd.f32 %v8006_v54, %v1759_v42 }
 0x1ae   : > { %11325 = vst [vmem:[#allocation47_spill] sm:$0xff] %v8206_v0  ;;  %v8216_v49 = vpop.f32.mrf.mxu0  ;;  %3908 = vmatprep.subr.bf16.mxu0 %v6506_v48  ;;  %v1767_v48 = vadd.f32 %v8020_v10, %v8071_v18  ;;  %v8247_v0 = vadd.f32 %v8030_v2, %v1771_v21  ;;  %v11331_v10 = vmax.f32 %v8210_v40, 0.0  ;;  %v6513_v2 = vld [vmem:[#allocation11 + $0x40] ss:$8 sps:$4 sm:$0xff]   ;;  %v6519_v40 = vld [vmem:[#allocation11 + $0x30] ss:$8 sps:$4 sm:$0xff]  }
 0x1af   : > { %v8218_v45 = vpop.f32.mrf.mxu1  ;;  %11329 = vst [vmem:[#allocation50_spill] sm:$0xff] %v8240_v6  ;;  %v8256_v62 = vadd.f32 %v7994_v60, %v1755_v39 }
 0x1b0   : > { %v8226_v57 = vpop.f32.mrf.mxu0  ;;  %11330 = vst [vmem:[#allocation51_spill] sm:$0xff] %v8247_v0 }
 0x1b1   : > { %v8228_v47 = vpop.f32.mrf.mxu1  ;;  %3909 = vmatpush1.bf16.msra.mxu0 %v6504_v59  ;;  %v11332_v59 = vmax.f32 %v8193_v63, 0.0  ;;  %11334 = vst [vmem:[#allocation53_spill] sm:$0xff] %v8256_v62 }
 0x1b2   : > { %v8242_v56 = vpop.f32.mrf.mxu0  ;;  %3910 = vmatprep.subr.bf16.mxu0 %v6512_v20  ;;  %v8264_v20 = vadd.f32 %v8022_v11, %v1767_v48  ;;  %v1781_v11 = vadd.f32 %v8054_v28, %v8071_v18  ;;  %v11079_v48 = vmax.f32 %v8256_v62, 0.0  ;;  %v11336_v28 = vmax.f32 %v8240_v6, 0.0 }
 0x1b3   : > { %v8244_v58 = vpop.f32.mrf.mxu1  ;;  %v8253_v46 = vpack.c.bf16 %v11332_v59, %v11331_v10  ;;  %v1769_v10 = vadd.f32 %v8024_v14, %v8099_v50  ;;  %v6521_v59 = vld [vmem:[#allocation11 + $0x34] ss:$8 sps:$4 sm:$0xff]   ;;  %v6527_v14 = vld [vmem:[#allocation11 + $0x24] ss:$8 sps:$4 sm:$0xff]  }
 0x1b4   : > { %v8258_v54 = vpop.f32.mrf.mxu0  ;;  %3103 = vmatmul.mubr.bf16.gmra.mxu0 %v8237_v1  ;;  %11335 = vst [vmem:[#allocation54_spill] sm:$0xff] %v8264_v20  ;;  %v8291_v30 = vpack.c.bf16 %v11336_v28, %v11079_v48  ;;  %v8301_v1 = vadd.f32 %v8056_v31, %v1781_v11  ;;  %v6525_v31 = vld [vmem:[#allocation11 + $0x20] ss:$8 sps:$4 sm:$0xff]  }
 0x1b5   : > { %11333 = vst [vmem:[#allocation52_spill] sm:$0xff] %v8253_v46  ;;  %v8260_v42 = vpop.f32.mrf.mxu1  ;;  %3112 = vmatprep.mubr.bf16.mxu0 %v8253_v46  ;;  %3911 = vmatpush1.bf16.msra.mxu0 %v6510_v3  ;;  %v1765_v3 = vadd.f32 %v8012_v22, %v8099_v50  ;;  %v8294_v63 = vadd.f32 %v8026_v23, %v1769_v10 }
 0x1b6   : > { %v8270_v60 = vpop.f32.mrf.mxu0  ;;  %3912 = vmatprep.subr.bf16.mxu0 %v6515_v53  ;;  %v1777_v53 = vadd.f32 %v8040_v19, %v8071_v18  ;;  %11337 = vst [vmem:[#allocation55_spill] sm:$0xff] %v8291_v30  ;;  %11339 = vst [vmem:[#allocation57_spill] sm:$0xff] %v8301_v1  ;;  %v11340_v19 = vmax.f32 %v8264_v20, 0.0  ;;  %v6531_v20 = vld [vmem:[#allocation11 + $0x10] ss:$8 sps:$4 sm:$0xff]  }
 0x1b7   : > { %v8272_v39 = vpop.f32.mrf.mxu1  ;;  %11338 = vst [vmem:[#allocation56_spill] sm:$0xff] %v8294_v63  ;;  %v8310_v28 = vadd.f32 %v8014_v4, %v1765_v3 }
 0x1b8   : > { %v8280_v21 = vpop.f32.mrf.mxu0 }
 0x1b9   : > { %v8282_v32 = vpop.f32.mrf.mxu1  ;;  %3913 = vmatpush1.bf16.msra.mxu0 %v6513_v2  ;;  %v11341_v2 = vmax.f32 %v8247_v0, 0.0  ;;  %11343 = vst [vmem:[#allocation59_spill] sm:$0xff] %v8310_v28 }
 0x1ba   : > { %v8296_v22 = vpop.f32.mrf.mxu0  ;;  %3914 = vmatprep.subr.bf16.mxu0 %v6521_v59  ;;  %v8318_v59 = vadd.f32 %v8042_v25, %v1777_v53  ;;  %v1791_v25 = vadd.f32 %v8090_v43, %v8071_v18  ;;  %v11086_v53 = vmax.f32 %v8310_v28, 0.0  ;;  %v11345_v43 = vmax.f32 %v8294_v63, 0.0 }
 0x1bb   : > { %v8298_v46 = vpop.f32.mrf.mxu1  ;;  %v8307_v62 = vpack.c.bf16 %v11341_v2, %v11340_v19  ;;  %v1779_v19 = vadd.f32 %v8047_v7, %v8099_v50  ;;  %v6533_v2 = vld [vmem:[#allocation11 + $0x14] ss:$8 sps:$4 sm:$0xff]   ;;  %v6539_v7 = vld [vmem:[#allocation11 + $0x4] ss:$8 sps:$4 sm:$0xff]  }
 0x1bc   : > { %v8312_v23 = vpop.f32.mrf.mxu0  ;;  %3113 = vmatmul.mubr.bf16.gmra.mxu0 %v8291_v30  ;;  %11344 = vst [vmem:[#allocation60_spill] sm:$0xff] %v8318_v59  ;;  %v8345_v48 = vpack.c.bf16 %v11345_v43, %v11086_v53  ;;  %v8355_v30 = vadd.f32 %v8092_v44, %v1791_v25  ;;  %v6537_v44 = vld [vmem:[#allocation11] ss:$8 sps:$4 sm:$0xff]  }
 0x1bd   : > { %11342 = vst [vmem:[#allocation58_spill] sm:$0xff] %v8307_v62  ;;  %v8314_v10 = vpop.f32.mrf.mxu1  ;;  %3122 = vmatprep.mubr.bf16.mxu0 %v8307_v62  ;;  %3915 = vmatpush1.bf16.msra.mxu0 %v6519_v40  ;;  %v1775_v40 = vadd.f32 %v8032_v15, %v8099_v50  ;;  %v8348_v0 = vadd.f32 %v8049_v27, %v1779_v19 }
 0x1be   : > { %v8324_v4 = vpop.f32.mrf.mxu0  ;;  %3916 = vmatprep.subr.bf16.mxu0 %v6527_v14  ;;  %v1787_v14 = vadd.f32 %v8075_v24, %v8071_v18  ;;  %11346 = vst [vmem:[#allocation61_spill] sm:$0xff] %v8345_v48  ;;  %11348 = vst [vmem:[#allocation63_spill] sm:$0xff] %v8355_v30  ;;  %v11349_v24 = vmax.f32 %v8318_v59, 0.0  ;;  %v6543_v59 = vld [vmem:[#allocation11 + $0xf0] ss:$8 sps:$4 sm:$0xff]  }
 0x1bf   : > { %v8326_v3 = vpop.f32.mrf.mxu1  ;;  %11347 = vst [vmem:[#allocation62_spill] sm:$0xff] %v8348_v0  ;;  %v8364_v43 = vadd.f32 %v8034_v16, %v1775_v40 }
 0x1c0   : > { %v8334_v11 = vpop.f32.mrf.mxu0 }
 0x1c1   : > { %v8336_v6 = vpop.f32.mrf.mxu1  ;;  %3917 = vmatpush1.bf16.msra.mxu0 %v6525_v31  ;;  %v11350_v31 = vmax.f32 %v8301_v1, 0.0  ;;  %11352 = vst [vmem:[#allocation65_spill] sm:$0xff] %v8364_v43 }
 0x1c2   : > { %v8350_v15 = vpop.f32.mrf.mxu0  ;;  %3918 = vmatprep.subr.bf16.mxu0 %v6533_v2  ;;  %v8372_v2 = vadd.f32 %v8077_v26, %v1787_v14  ;;  %v1801_v26 = vadd.f32 %v8133_v29, %v8071_v18  ;;  %v11093_v14 = vmax.f32 %v8364_v43, 0.0  ;;  %v11354_v29 = vmax.f32 %v8348_v0, 0.0 }
 0x1c3   : > { %v8352_v62 = vpop.f32.mrf.mxu1  ;;  %v8361_v28 = vpack.c.bf16 %v11350_v31, %v11349_v24  ;;  %v1789_v24 = vadd.f32 %v8084_v36, %v8099_v50  ;;  %v6545_v31 = vld [vmem:[#allocation11 + $0xf4] ss:$8 sps:$4 sm:$0xff]   ;;  %v6551_v36 = vld [vmem:[#allocation11 + $0xe4] ss:$8 sps:$4 sm:$0xff]  }
 0x1c4   : > { %v8366_v27 = vpop.f32.mrf.mxu0  ;;  %3123 = vmatmul.mubr.bf16.gmra.mxu0 %v8345_v48  ;;  %11353 = vst [vmem:[#allocation66_spill] sm:$0xff] %v8372_v2  ;;  %v8399_v53 = vpack.c.bf16 %v11354_v29, %v11093_v14  ;;  %v8409_v48 = vadd.f32 %v8135_v8, %v1801_v26  ;;  %v6549_v8 = vld [vmem:[#allocation11 + $0xe0] ss:$8 sps:$4 sm:$0xff]  }
 0x1c5   : > { %11351 = vst [vmem:[#allocation64_spill] sm:$0xff] %v8361_v28  ;;  %v8368_v19 = vpop.f32.mrf.mxu1  ;;  %3132 = vmatprep.mubr.bf16.mxu0 %v8361_v28  ;;  %3919 = vmatpush1.bf16.msra.mxu0 %v6531_v20  ;;  %v1785_v20 = vadd.f32 %v8063_v33, %v8099_v50  ;;  %v8402_v1 = vadd.f32 %v8086_v37, %v1789_v24 }
 0x1c6   : > { %v8378_v16 = vpop.f32.mrf.mxu0  ;;  %3920 = vmatprep.subr.bf16.mxu0 %v6539_v7  ;;  %v1797_v7 = vadd.f32 %v8114_v9, %v8071_v18  ;;  %11355 = vst [vmem:[#allocation67_spill] sm:$0xff] %v8399_v53  ;;  %11357 = vst [vmem:[#allocation69_spill] sm:$0xff] %v8409_v48  ;;  %v11358_v9 = vmax.f32 %v8372_v2, 0.0  ;;  %v6555_v2 = vld [vmem:[#allocation11 + $0xd0] ss:$8 sps:$4 sm:$0xff]  }
 0x1c7   : > { %v8380_v40 = vpop.f32.mrf.mxu1  ;;  %11356 = vst [vmem:[#allocation68_spill] sm:$0xff] %v8402_v1  ;;  %v8418_v29 = vadd.f32 %v8065_v17, %v1785_v20 }
 0x1c8   : > { %v8388_v25 = vpop.f32.mrf.mxu0 }
 0x1c9   : > { %v8390_v63 = vpop.f32.mrf.mxu1  ;;  %3921 = vmatpush1.bf16.msra.mxu0 %v6537_v44  ;;  %v11359_v44 = vmax.f32 %v8355_v30, 0.0  ;;  %11361 = vst [vmem:[#allocation71_spill] sm:$0xff] %v8418_v29 }
 0x1ca   : > { %v8404_v33 = vpop.f32.mrf.mxu0  ;;  %3922 = vmatprep.subr.bf16.mxu0 %v6545_v31  ;;  %v8426_v31 = vadd.f32 %v8116_v5, %v1797_v7  ;;  %v1811_v5 = vadd.f32 %v8188_v61, %v8071_v18  ;;  %v11100_v7 = vmax.f32 %v8418_v29, 0.0  ;;  %v11363_v61 = vmax.f32 %v8402_v1, 0.0 }
 0x1cb   : > { %v8406_v28 = vpop.f32.mrf.mxu1  ;;  %v8415_v43 = vpack.c.bf16 %v11359_v44, %v11358_v9  ;;  %v1799_v9 = vadd.f32 %v8123_v38, %v8099_v50  ;;  %v6557_v44 = vld [vmem:[#allocation11 + $0xd4] ss:$8 sps:$4 sm:$0xff]   ;;  %v6563_v38 = vld [vmem:[#allocation11 + $0xc4] ss:$8 sps:$4 sm:$0xff]  }
 0x1cc   : > { %v8420_v37 = vpop.f32.mrf.mxu0  ;;  %3133 = vmatmul.mubr.bf16.gmra.mxu0 %v8399_v53  ;;  %11362 = vst [vmem:[#allocation72_spill] sm:$0xff] %v8426_v31  ;;  %v8453_v14 = vpack.c.bf16 %v11363_v61, %v11100_v7  ;;  %v8463_v53 = vadd.f32 %v8190_v12, %v1811_v5  ;;  %v6561_v12 = vld [vmem:[#allocation11 + $0xc0] ss:$8 sps:$4 sm:$0xff]  }
 0x1cd   : > { %11360 = vst [vmem:[#allocation70_spill] sm:$0xff] %v8415_v43  ;;  %v8422_v24 = vpop.f32.mrf.mxu1  ;;  %3142 = vmatprep.mubr.bf16.mxu0 %v8415_v43  ;;  %3923 = vmatpush2.bf16.msra.mxu0 %v6543_v59  ;;  %v1795_v59 = vadd.f32 %v8101_v13, %v8099_v50  ;;  %v8456_v30 = vadd.f32 %v8125_v55, %v1799_v9 }
 0x1ce   : > { %v8432_v17 = vpop.f32.mrf.mxu0  ;;  %3924 = vmatprep.subr.bf16.mxu0 %v6551_v36  ;;  %v1807_v36 = vadd.f32 %v8162_v41, %v8071_v18  ;;  %11364 = vst [vmem:[#allocation73_spill] sm:$0xff] %v8453_v14  ;;  %11366 = vst [vmem:[#allocation75_spill] sm:$0xff] %v8463_v53  ;;  %v11367_v41 = vmax.f32 %v8426_v31, 0.0 }
 0x1cf   : > { %v8434_v20 = vpop.f32.mrf.mxu1  ;;  %11365 = vst [vmem:[#allocation74_spill] sm:$0xff] %v8456_v30  ;;  %v8472_v61 = vadd.f32 %v8103_v52, %v1795_v59 }
 0x1d0   : > { %v8442_v26 = vpop.f32.mrf.mxu0 }
 0x1d1   : > { %v8444_v0 = vpop.f32.mrf.mxu1  ;;  %3925 = vmatpush2.bf16.msra.mxu0 %v6549_v8  ;;  %v11368_v8 = vmax.f32 %v8409_v48, 0.0  ;;  %11370 = vst [vmem:[#allocation77_spill] sm:$0xff] %v8472_v61  ;;  %v6567_v48 = vld [vmem:[#allocation11 + $0xb0] ss:$8 sps:$4 sm:$0xff]  }
 0x1d2   : > { %v8458_v13 = vpop.f32.mrf.mxu0  ;;  %3926 = vmatprep.subr.bf16.mxu0 %v6557_v44  ;;  %v8480_v44 = vadd.f32 %v8164_v34, %v1807_v36  ;;  %v1821_v34 = vadd.f32 %v8242_v56, %v8071_v18  ;;  %v11107_v36 = vmax.f32 %v8472_v61, 0.0  ;;  %v11375_v56 = vmax.f32 %v8456_v30, 0.0 }
 0x1d3   : > { %v8460_v43 = vpop.f32.mrf.mxu1  ;;  %v8469_v29 = vpack.c.bf16 %v11368_v8, %v11367_v41  ;;  %v1809_v41 = vadd.f32 %v8172_v35, %v8099_v50  ;;  %v6569_v8 = vld [vmem:[#allocation11 + $0xb4] ss:$8 sps:$4 sm:$0xff]   ;;  %v6575_v35 = vld [vmem:[#allocation11 + $0xa4] ss:$8 sps:$4 sm:$0xff]  }
 0x1d4   : > { %v8474_v55 = vpop.f32.mrf.mxu0  ;;  %3143 = vmatmul.mubr.bf16.gmra.mxu0 %v8453_v14  ;;  %11372 = vst [vmem:[#allocation79_spill] sm:$0xff] %v8480_v44  ;;  %v8507_v7 = vpack.c.bf16 %v11375_v56, %v11107_v36  ;;  %v11383_v56 = vld [vmem:[#allocation40_spill] sm:$0xff] }
 0x1d5   : > { %11369 = vst [vmem:[#allocation76_spill] sm:$0xff] %v8469_v29  ;;  %v8476_v9 = vpop.f32.mrf.mxu1  ;;  %3152 = vmatprep.mubr.bf16.mxu0 %v8469_v29  ;;  %3927 = vmatpush2.bf16.msra.mxu0 %v6555_v2  ;;  %v11373_v2 = vld [vmem:[#allocation39_spill] sm:$0xff]  ;;  %v11377_v29 = vld [vmem:[#allocation41_spill] sm:$0xff] }
 0x1d6   : > { %11371 = vst [vmem:[#allocation78_spill] sm:$0xff] %v8476_v9  ;;  %v8486_v52 = vpop.f32.mrf.mxu0  ;;  %3928 = vmatprep.subr.bf16.mxu0 %v6563_v38  ;;  %v1805_v1 = vadd.f32 %v11373_v2, %v8099_v50  ;;  %v1817_v38 = vadd.f32 %v8216_v49, %v8071_v18  ;;  %11376 = vst [vmem:[#allocation80_spill] sm:$0xff] %v8507_v7  ;;  %v8510_v14 = vadd.f32 %v11377_v29, %v1809_v41 }
 0x1d7   : > { %v8488_v59 = vpop.f32.mrf.mxu1  ;;  %v11380_v49 = vmax.f32 %v8480_v44, 0.0 }
 0x1d8   : > { %v8496_v5 = vpop.f32.mrf.mxu0  ;;  %11378 = vst [vmem:[#allocation41_spill] sm:$0xff] %v8510_v14  ;;  %v8526_v36 = vadd.f32 %v11383_v56, %v1805_v1  ;;  %v6581_v56 = vld [vmem:[#allocation11 + $0x94] ss:$8 sps:$4 sm:$0xff]  }
 0x1d9   : > { %v8498_v31 = vpop.f32.mrf.mxu1  ;;  %3929 = vmatpush2.bf16.msra.mxu0 %v6561_v12  ;;  %v11381_v12 = vmax.f32 %v8463_v53, 0.0 }
 0x1da   : > { %11374 = vst [vmem:[#allocation39_spill] sm:$0xff] %v8498_v31  ;;  %v8512_v2 = vpop.f32.mrf.mxu0  ;;  %3930 = vmatprep.subr.bf16.mxu0 %v6569_v8  ;;  %v8517_v31 = vadd.f32 %v8244_v58, %v1821_v34  ;;  %11384 = vst [vmem:[#allocation40_spill] sm:$0xff] %v8526_v36  ;;  %v8534_v8 = vadd.f32 %v8218_v45, %v1817_v38  ;;  %v6573_v58 = vld [vmem:[#allocation11 + $0xa0] ss:$8 sps:$4 sm:$0xff]   ;;  %v1831_v45 = vadd.f32 %v8296_v22, %v8071_v18 }
 0x1db   : > { %v8514_v9 = vpop.f32.mrf.mxu1  ;;  %v8523_v61 = vpack.c.bf16 %v11381_v12, %v11380_v49  ;;  %v1819_v49 = vadd.f32 %v8226_v57, %v8099_v50  ;;  %v11114_v38 = vmax.f32 %v8526_v36, 0.0  ;;  %v11387_v22 = vmax.f32 %v8510_v14, 0.0  ;;  %v6587_v57 = vld [vmem:[#allocation11 + $0x84] ss:$8 sps:$4 sm:$0xff]  }
 0x1dc   : > { %11379 = vst [vmem:[#allocation81_spill] sm:$0xff] %v8517_v31  ;;  %v8528_v29 = vpop.f32.mrf.mxu0  ;;  %3153 = vmatmul.mubr.bf16.gmra.mxu0 %v8507_v7  ;;  %11386 = vst [vmem:[#allocation84_spill] sm:$0xff] %v8534_v8 }
 0x1dd   : > { %11382 = vst [vmem:[#allocation82_spill] sm:$0xff] %v8523_v61  ;;  %v8530_v41 = vpop.f32.mrf.mxu1  ;;  %3162 = vmatprep.mubr.bf16.mxu0 %v8523_v61  ;;  %3931 = vmatpush2.bf16.msra.mxu0 %v6567_v48  ;;  %v1815_v48 = vadd.f32 %v8204_v51, %v8099_v50  ;;  %v6579_v61 = vld [vmem:[#allocation11 + $0x90] ss:$8 sps:$4 sm:$0xff]   ;;  %v8561_v30 = vpack.c.bf16 %v11387_v22, %v11114_v38  ;;  %v11394_v22 = vld [vmem:[#allocation47_spill] sm:$0xff] }
 0x1de   : > { %11385 = vst [vmem:[#allocation83_spill] sm:$0xff] %v8530_v41  ;;  %v8540_v1 = vpop.f32.mrf.mxu0  ;;  %3932 = vmatprep.subr.bf16.mxu0 %v6575_v35  ;;  %v1827_v35 = vadd.f32 %v8270_v60, %v8071_v18  ;;  %v8564_v7 = vadd.f32 %v8228_v47, %v1819_v49  ;;  %v8571_v41 = vadd.f32 %v8298_v46, %v1831_v45  ;;  %v11391_v60 = vmax.f32 %v8534_v8, 0.0  ;;  %v6585_v46 = vld [vmem:[#allocation11 + $0x80] ss:$8 sps:$4 sm:$0xff]  }
 0x1df   : > { %v8542_v12 = vpop.f32.mrf.mxu1  ;;  %11388 = vst [vmem:[#allocation85_spill] sm:$0xff] %v8561_v30  ;;  %v8580_v38 = vadd.f32 %v11394_v22, %v1815_v48  ;;  %v1841_v48 = vadd.f32 %v8350_v15, %v8071_v18  ;;  %v1825_v45 = vadd.f32 %v8258_v54, %v8099_v50 }
 0x1e0   : > { %v8550_v34 = vpop.f32.mrf.mxu0  ;;  %11389 = vst [vmem:[#allocation86_spill] sm:$0xff] %v8564_v7  ;;  %11390 = vst [vmem:[#allocation87_spill] sm:$0xff] %v8571_v41  ;;  %v11400_v8 = vmax.f32 %v8564_v7, 0.0 }
 0x1e1   : > { %v8552_v44 = vpop.f32.mrf.mxu1  ;;  %3933 = vmatpush2.bf16.msra.mxu0 %v6573_v58  ;;  %v11392_v58 = vmax.f32 %v8517_v31, 0.0  ;;  %11395 = vst [vmem:[#allocation47_spill] sm:$0xff] %v8580_v38 }
 0x1e2   : > { %v8566_v51 = vpop.f32.mrf.mxu0  ;;  %3934 = vmatprep.subr.bf16.mxu0 %v6581_v56  ;;  %v8588_v56 = vadd.f32 %v8272_v39, %v1827_v35  ;;  %v11398_v35 = vld [vmem:[#allocation32_spill] sm:$0xff] }
 0x1e3   : > { %v8568_v53 = vpop.f32.mrf.mxu1  ;;  %v8577_v36 = vpack.c.bf16 %v11392_v58, %v11391_v60  ;;  %v1829_v60 = vadd.f32 %v8280_v21, %v8099_v50  ;;  %v1837_v21 = vadd.f32 %v8324_v4, %v8071_v18  ;;  %v8623_v4 = vadd.f32 %v8352_v62, %v1841_v48 }
 0x1e4   : > { %v8582_v47 = vpop.f32.mrf.mxu0  ;;  %3163 = vmatmul.mubr.bf16.gmra.mxu0 %v8561_v30  ;;  %11397 = vst [vmem:[#allocation90_spill] sm:$0xff] %v8588_v56 }
 0x1e5   : > { %11393 = vst [vmem:[#allocation88_spill] sm:$0xff] %v8577_v36  ;;  %v8584_v49 = vpop.f32.mrf.mxu1  ;;  %3172 = vmatprep.mubr.bf16.mxu0 %v8577_v36  ;;  %3935 = vmatpush2.bf16.msra.mxu0 %v6579_v61  ;;  %v11121_v61 = vmax.f32 %v8580_v38, 0.0  ;;  %v8620_v54 = vadd.f32 %v8282_v32, %v1829_v60  ;;  %11403 = vst [vmem:[#allocation94_spill] sm:$0xff] %v8623_v4  ;;  %v11406_v38 = vsub.s32 3, %v11398_v35  ;;  %v11410_v60 = vsub.s32 2, %v11398_v35 }
 0x1e6   : > { %11396 = vst [vmem:[#allocation89_spill] sm:$0xff] %v8584_v49  ;;  %v8596_v58 = vpop.f32.mrf.mxu0  ;;  %3936 = vmatprep.subr.bf16.mxu0 %v6587_v57  ;;  %v11124_v57 = vmax.f32 %v8588_v56, 0.0  ;;  %v8641_v32 = vadd.f32 %v8260_v42, %v1825_v45  ;;  %v8644_v62 = vadd.f32 %v8326_v3, %v1837_v21  ;;  %v1839_v42 = vadd.f32 %v8334_v11, %v8099_v50 }
 0x1e7   : > { %v8598_v22 = vpop.f32.mrf.mxu1  ;;  %v8617_v39 = vpack.c.bf16 %v11400_v8, %v11121_v61  ;;  %11402 = vst [vmem:[#allocation93_spill] sm:$0xff] %v8620_v54  ;;  %v11407_v8 = vld [vmem:[#allocation34_spill] sm:$0xff]  ;;  %v1847_v45 = vadd.f32 %v8378_v16, %v8071_v18  ;;  %v11414_v49 = vmax.f32 %v8623_v4, 0.0 }
 0x1e8   : > { %v8607_v31 = vpop.f32.mrf.mxu0  ;;  %v8638_v61 = vrot.slane %v11407_v8, %v11406_v38  ;;  %11408 = vst [vmem:[#allocation34_spill] sm:$0xff] %v8641_v32  ;;  %11409 = vst [vmem:[#allocation96_spill] sm:$0xff] %v8644_v62  ;;  %v8649_v48 = vrot.slane %v11407_v8, %v11410_v60  ;;  %v11130_v60 = vmax.f32 %v8641_v32, 0.0 }
 0x1e9   : > { %v8609_v15 = vpop.f32.mrf.mxu1  ;;  %3937 = vmatpush2.bf16.msra.mxu0 %v6585_v46  ;;  %11401 = vst [vmem:[#allocation92_spill] sm:$0xff] %v8617_v39  ;;  %v11404_v46 = vmax.f32 %v8571_v41, 0.0 }
 0x1ea   : > { %11399 = vst [vmem:[#allocation91_spill] sm:$0xff] %v8609_v15  ;;  %v8625_v36 = vpop.f32.mrf.mxu0 }
 0x1eb   : > { %v8627_v30 = vpop.f32.mrf.mxu1  ;;  %v8633_v14 = vpack.c.bf16 %v11404_v46, %v11124_v57  ;;  %v1851_v46 = vadd.f32 %v8404_v33, %v8071_v18  ;;  %v1835_v57 = vadd.f32 %v8312_v23, %v8099_v50  ;;  %v11411_v33 = vmax.f32 %v8620_v54, 0.0 }
 0x1ec   : > { %v2120_v7 = vpop.f32.mrf.mxu0  ;;  %3173 = vmatmul.mubr.bf16.gmra.mxu0 %v8617_v39  ;;  %v8675_v39 = vadd.f32 %v8336_v6, %v1839_v42 }
 0x1ed   : > { %11405 = vst [vmem:[#allocation95_spill] sm:$0xff] %v8633_v14  ;;  %v2313_v56 = vpop.f32.mrf.mxu1  ;;  %3182 = vmatprep.mubr.bf16.mxu0 %v8633_v14  ;;  %v2121_v38 = vadd.f32 %v2120_v7, %v8649_v48  ;;  %v11413_v7 = vmax.f32 %v8644_v62, 0.0  ;;  %v8684_v16 = vadd.f32 %v8406_v28, %v1851_v46  ;;  %v8692_v6 = vadd.f32 %v8314_v10, %v1835_v57 }
 0x1ee   : > { %v2122_v3 = vpop.f32.mrf.mxu0  ;;  %11412 = vst [vmem:[#allocation97_spill] sm:$0xff] %v8675_v39  ;;  %v8700_v28 = vadd.f32 %v8380_v40, %v1847_v45  ;;  %v1849_v10 = vadd.f32 %v8388_v25, %v8099_v50  ;;  %v1857_v25 = vadd.f32 %v8432_v17, %v8071_v18  ;;  %v6516_v17 = vld [vmem:[#allocation11 + $0x170] ss:$8 sps:$4 sm:$0xff]  }
 0x1ef   : > { %v2315_v21 = vpop.f32.mrf.mxu1  ;;  %v2123_v8 = vadd.f32 %v2122_v3, %v8638_v61  ;;  %v8672_v3 = vpack.c.bf16 %v11411_v33, %v11130_v60  ;;  %v8681_v15 = vpack.c.bf16 %v11414_v49, %v11413_v7  ;;  %11415 = vst [vmem:[#allocation98_spill] sm:$0xff] %v8684_v16  ;;  %11418 = vst [vmem:[#allocation101_spill] sm:$0xff] %v8692_v6 }
 0x1f0   : > { %v2124_v41 = vpop.f32.mrf.mxu0  ;;  %v8694_v42 = vadd.f32 %v2313_v56, %v2121_v38  ;;  %v1845_v49 = vadd.f32 %v8366_v27, %v8099_v50  ;;  %11420 = vst [vmem:[#allocation103_spill] sm:$0xff] %v8700_v28  ;;  %v1861_v56 = vadd.f32 %v8458_v13, %v8071_v18 }
 0x1f1   : > { %v2317_v11 = vpop.f32.mrf.mxu1  ;;  %v2125_v14 = vadd.f32 %v2124_v41, %v8649_v48  ;;  %v8686_v41 = vadd.f32 %v2315_v21, %v2123_v8  ;;  %v11137_v8 = vmax.f32 %v8692_v6, 0.0 }
 0x1f2   : > { %v2126_v23 = vpop.f32.mrf.mxu0  ;;  %11419 = vst [vmem:[#allocation102_spill] sm:$0xff] %v8694_v42 }
 0x1f3   : > { %v2319_v35 = vpop.f32.mrf.mxu1  ;;  %11416 = vst [vmem:[#allocation99_spill] sm:$0xff] %v8686_v41  ;;  %v8688_v32 = vadd.f32 %v2317_v11, %v2125_v14  ;;  %v2127_v33 = vadd.f32 %v2126_v23, %v8638_v61  ;;  %v11139_v14 = vmax.f32 %v8675_v39, 0.0  ;;  %v11132_v40 = vmax.f32 %v8686_v41, 0.0  ;;  %v6524_v41 = vld [vmem:[#allocation11 + $0x164] ss:$8 sps:$4 sm:$0xff]  }
 0x1f4   : > { %v2130_v60 = vpop.f32.mrf.mxu0  ;;  %3183 = vmatmul.mubr.bf16.gmra.mxu0 %v8672_v3  ;;  %v11138_v11 = vmax.f32 %v8694_v42, 0.0 }
 0x1f5   : > { %11417 = vst [vmem:[#allocation100_spill] sm:$0xff] %v8688_v32  ;;  %v2323_v54 = vpop.f32.mrf.mxu1  ;;  %v8702_v21 = vadd.f32 %v2319_v35, %v2127_v33  ;;  %3192 = vmatprep.mubr.bf16.mxu0 %v8681_v15  ;;  %v2131_v13 = vadd.f32 %v2130_v60, %v8649_v48  ;;  %v8721_v33 = vadd.f32 %v8368_v19, %v1845_v49 }
 0x1f6   : > { %v2132_v38 = vpop.f32.mrf.mxu0  ;;  %v8735_v60 = vpack.c.bf16 %v11139_v14, %v11137_v8  ;;  %v8738_v19 = vadd.f32 %v8390_v63, %v1849_v10  ;;  %v8741_v49 = vadd.f32 %v8460_v43, %v1861_v56  ;;  %v11428_v63 = vmax.f32 %v8700_v28, 0.0 }
 0x1f7   : > { %11421 = vst [vmem:[#allocation104_spill] sm:$0xff] %v8702_v21  ;;  %v2325_v46 = vpop.f32.mrf.mxu1  ;;  %v11133_v35 = vmax.f32 %v8702_v21, 0.0  ;;  %v2133_v45 = vadd.f32 %v2132_v38, %v8638_v61  ;;  %11422 = vst [vmem:[#allocation105_spill] sm:$0xff] %v8721_v33  ;;  %v11429_v43 = vmax.f32 %v8684_v16, 0.0  ;;  %v8762_v56 = vadd.f32 %v8434_v20, %v1857_v25 }
 0x1f8   : > { %v2134_v23 = vpop.f32.mrf.mxu0  ;;  %11423 = vst [vmem:[#allocation106_spill] sm:$0xff] %v8738_v19  ;;  %11424 = vst [vmem:[#allocation107_spill] sm:$0xff] %v8741_v49  ;;  %v1859_v20 = vadd.f32 %v8442_v26, %v8099_v50  ;;  %v1855_v26 = vadd.f32 %v8420_v37, %v8099_v50  ;;  %v6528_v37 = vld [vmem:[#allocation11 + $0x150] ss:$8 sps:$4 sm:$0xff]   ;;  %v11436_v25 = vmax.f32 %v8738_v19, 0.0 }
 0x1f9   : > { %v2327_v7 = vpop.f32.mrf.mxu1  ;;  %v2135_v57 = vadd.f32 %v2134_v23, %v8649_v48  ;;  %v8729_v38 = vpack.c.bf16 %v11133_v35, %v11132_v40  ;;  %v11425_v23 = vmax.f32 %v8688_v32, 0.0  ;;  %v8749_v21 = vadd.f32 %v2325_v46, %v2133_v45  ;;  %11430 = vst [vmem:[#allocation110_spill] sm:$0xff] %v8762_v56  ;;  %v6522_v45 = vld [vmem:[#allocation11 + $0x160] ss:$8 sps:$4 sm:$0xff]  }
 0x1fa   : > { %v2136_v40 = vpop.f32.mrf.mxu0  ;;  %v8759_v10 = vpack.c.bf16 %v11429_v43, %v11428_v63  ;;  %v6530_v43 = vld [vmem:[#allocation11 + $0x154] ss:$8 sps:$4 sm:$0xff]   ;;  %v8803_v32 = vadd.f32 %v8444_v0, %v1859_v20 }
 0x1fb   : > { %v8747_v27 = vpack.c.bf16 %v11425_v23, %v11138_v11  ;;  %v2329_v35 = vpop.f32.mrf.mxu1  ;;  %11426 = vst [vmem:[#allocation108_spill] sm:$0xff] %v8749_v21  ;;  %v8751_v6 = vadd.f32 %v2327_v7, %v2135_v57  ;;  %v2137_v8 = vadd.f32 %v2136_v40, %v8638_v61  ;;  %3285 = vmatprep.mubr.bf16.mxu1 %v8729_v38 }
 0x1fc   : > { %v8764_v23 = vadd.f32 %v2323_v54, %v2131_v13  ;;  %v2140_v11 = vpop.f32.mrf.mxu0  ;;  %3193 = vmatmul.mubr.bf16.gmra.mxu0 %v8735_v60  ;;  %v11435_v54 = vmax.f32 %v8721_v33, 0.0  ;;  %11437 = vst [vmem:[#allocation113_spill] sm:$0xff] %v8803_v32  ;;  %v6576_v33 = vld [vmem:[#allocation11 + $0x1d0] ss:$8 sps:$4 sm:$0xff]  }
 0x1fd   : > { %11427 = vst [vmem:[#allocation109_spill] sm:$0xff] %v8751_v6  ;;  %v2333_v46 = vpop.f32.mrf.mxu1  ;;  %3286 = vmatmul.mubr.bf16.vlgmr.msra.gmra.mxu1 %v8747_v27  ;;  %v8769_v40 = vadd.f32 %v2329_v35, %v2137_v8  ;;  %3202 = vmatprep.mubr.bf16.mxu0 %v8759_v10  ;;  %v1871_v35 = vadd.f32 %v8512_v2, %v8071_v18 }
 0x1fe   : > { %11431 = vst [vmem:[#allocation111_spill] sm:$0xff] %v8764_v23  ;;  %4100 = vmatpush1.bf16.msra.mxu1 %v6516_v17  ;;  %v2142_v13 = vpop.f32.mrf.mxu0  ;;  %v2141_v7 = vadd.f32 %v2140_v11, %v8649_v48  ;;  %v1867_v2 = vadd.f32 %v8486_v52, %v8071_v18  ;;  %v11433_v17 = vmax.f32 %v8749_v21, 0.0  ;;  %v8800_v11 = vpack.c.bf16 %v11436_v25, %v11435_v54  ;;  %v6536_v54 = vld [vmem:[#allocation11 + $0x144] ss:$8 sps:$4 sm:$0xff]  }
 0x1ff   : > { %11432 = vst [vmem:[#allocation112_spill] sm:$0xff] %v8769_v40  ;;  %v2335_v63 = vpop.f32.mrf.mxu1  ;;  %4101 = vmatprep.subr.bf16.mxu1 %v6524_v41  ;;  %v2143_v14 = vadd.f32 %v2142_v13, %v8638_v61  ;;  %v11434_v13 = vmax.f32 %v8769_v40, 0.0  ;;  %v11438_v52 = vmax.f32 %v8764_v23, 0.0  ;;  %v8818_v25 = vadd.f32 %v8514_v9, %v1871_v35 }
 0x200   : > { %v2144_v41 = vpop.f32.mrf.mxu0  ;;  %v1865_v9 = vadd.f32 %v8474_v55, %v8099_v50 }
 0x201   : > { %v2337_v57 = vpop.f32.mrf.mxu1  ;;  %v2145_v8 = vadd.f32 %v2144_v41, %v8649_v48  ;;  %v8794_v42 = vpack.c.bf16 %v11434_v13, %v11433_v17  ;;  %v11440_v17 = vmax.f32 %v8762_v56, 0.0  ;;  %v11441_v13 = vmax.f32 %v8741_v49, 0.0  ;;  %v6593_v56 = vld [vmem:[#allocation11 + $0x1a4] ss:$8 sps:$4 sm:$0xff]  }
 0x202   : > { %4102 = vmatpush1.bf16.msra.mxu1 %v6522_v45  ;;  %v11439_v45 = vmax.f32 %v8751_v6, 0.0  ;;  %v2146_v21 = vpop.f32.mrf.mxu0  ;;  %v8820_v0 = vadd.f32 %v2335_v63, %v2143_v14  ;;  %v8836_v14 = vadd.f32 %v8488_v59, %v1867_v2  ;;  %v6542_v59 = vld [vmem:[#allocation11 + $0x134] ss:$8 sps:$4 sm:$0xff]  }
 0x203   : > { %v2339_v40 = vpop.f32.mrf.mxu1  ;;  %4103 = vmatprep.subr.bf16.mxu1 %v6530_v43  ;;  %v8815_v62 = vpack.c.bf16 %v11441_v13, %v11440_v17  ;;  %v8822_v20 = vadd.f32 %v2337_v57, %v2145_v8  ;;  %3295 = vmatprep.mubr.bf16.mxu1 %v8794_v42  ;;  %v8827_v43 = vadd.f32 %v8422_v24, %v1855_v26  ;;  %v6534_v24 = vld [vmem:[#allocation11 + $0x140] ss:$8 sps:$4 sm:$0xff]  }
 0x204   : > { %v8809_v41 = vpack.c.bf16 %v11439_v45, %v11438_v52  ;;  %11442 = vst [vmem:[#allocation114_spill] sm:$0xff] %v8820_v0  ;;  %v2147_v52 = vadd.f32 %v2146_v21, %v8638_v61  ;;  %v8829_v45 = vadd.f32 %v2333_v46, %v2141_v7  ;;  %v2150_v23 = vpop.f32.mrf.mxu0  ;;  %3203 = vmatmul.mubr.bf16.gmra.mxu0 %v8800_v11  ;;  %v11148_v8 = vmax.f32 %v8820_v0, 0.0  ;;  %v11447_v63 = vld [vmem:[#allocation78_spill] sm:$0xff] }
 0x205   : > { %11443 = vst [vmem:[#allocation115_spill] sm:$0xff] %v8822_v20  ;;  %11444 = vst [vmem:[#allocation116_spill] sm:$0xff] %v8827_v43  ;;  %v2343_v17 = vpop.f32.mrf.mxu1  ;;  %3212 = vmatprep.mubr.bf16.mxu0 %v8815_v62  ;;  %v1869_v57 = vadd.f32 %v8496_v5, %v8099_v50  ;;  %v1881_v7 = vadd.f32 %v8566_v51, %v8071_v18  ;;  %v1877_v5 = vadd.f32 %v8540_v1, %v8071_v18  ;;  %v6540_v1 = vld [vmem:[#allocation11 + $0x130] ss:$8 sps:$4 sm:$0xff]  }
 0x206   : > { %11445 = vst [vmem:[#allocation117_spill] sm:$0xff] %v8829_v45  ;;  %3296 = vmatmul.mubr.bf16.gmra.mxu1 %v8809_v41  ;;  %v8838_v21 = vadd.f32 %v2339_v40, %v2147_v52  ;;  %v2152_v55 = vpop.f32.mrf.mxu0  ;;  %v2151_v13 = vadd.f32 %v2150_v23, %v8649_v48  ;;  %v8857_v46 = vadd.f32 %v11447_v63, %v1865_v9  ;;  %v11449_v51 = vmax.f32 %v8827_v43, 0.0  ;;  %v11451_v9 = vld [vmem:[#allocation39_spill] sm:$0xff] }
 0x207   : > { %4104 = vmatpush1.bf16.msra.mxu1 %v6528_v37  ;;  %v2345_v35 = vpop.f32.mrf.mxu1  ;;  %v2153_v2 = vadd.f32 %v2152_v55, %v8638_v61  ;;  %v11450_v23 = vmax.f32 %v8803_v32, 0.0  ;;  %v8874_v63 = vadd.f32 %v11451_v9, %v1869_v57  ;;  %v8877_v40 = vadd.f32 %v8568_v53, %v1881_v7 }
 0x208   : > { %11446 = vst [vmem:[#allocation118_spill] sm:$0xff] %v8838_v21  ;;  %4105 = vmatprep.subr.bf16.mxu1 %v6536_v54  ;;  %v2154_v52 = vpop.f32.mrf.mxu0  ;;  %v11448_v55 = vmax.f32 %v8838_v21, 0.0  ;;  %v6548_v21 = vld [vmem:[#allocation11 + $0x124] ss:$8 sps:$4 sm:$0xff]   ;;  %v11456_v53 = vmax.f32 %v8836_v14, 0.0  ;;  %v11457_v7 = vmax.f32 %v8818_v25, 0.0  ;;  %v8898_v9 = vadd.f32 %v8542_v12, %v1877_v5 }
 0x209   : > { %v2347_v54 = vpop.f32.mrf.mxu1  ;;  %v2155_v26 = vadd.f32 %v2154_v52, %v8649_v48  ;;  %v8871_v6 = vpack.c.bf16 %v11450_v23, %v11449_v51  ;;  %v11453_v52 = vmax.f32 %v8822_v20, 0.0  ;;  %v8885_v39 = vadd.f32 %v2345_v35, %v2153_v2 }
 0x20a   : > { %v8865_v37 = vpack.c.bf16 %v11448_v55, %v11148_v8  ;;  %v2156_v55 = vpop.f32.mrf.mxu0  ;;  %v8895_v23 = vpack.c.bf16 %v11457_v7, %v11456_v53  ;;  %v1879_v12 = vadd.f32 %v8550_v34, %v8099_v50  ;;  %v6554_v53 = vld [vmem:[#allocation11 + $0x114] ss:$8 sps:$4 sm:$0xff]   ;;  %v1875_v34 = vadd.f32 %v8528_v29, %v8099_v50  ;;  %v6552_v29 = vld [vmem:[#allocation11 + $0x110] ss:$8 sps:$4 sm:$0xff]  }
 0x20b   : > { %4106 = vmatpush1.bf16.msra.mxu1 %v6534_v24  ;;  %v11452_v24 = vmax.f32 %v8829_v45, 0.0  ;;  %v2349_v8 = vpop.f32.mrf.mxu1  ;;  %11454 = vst [vmem:[#allocation78_spill] sm:$0xff] %v8885_v39  ;;  %v8887_v51 = vadd.f32 %v2347_v54, %v2155_v26  ;;  %v2157_v57 = vadd.f32 %v2156_v55, %v8638_v61  ;;  %v6546_v54 = vld [vmem:[#allocation11 + $0x120] ss:$8 sps:$4 sm:$0xff]   ;;  %v11463_v5 = vmax.f32 %v8874_v63, 0.0 }
 0x20c   : > { %4107 = vmatprep.subr.bf16.mxu1 %v6542_v59  ;;  %3305 = vmatprep.mubr.bf16.mxu1 %v8865_v37  ;;  %v2160_v59 = vpop.f32.mrf.mxu0  ;;  %v8939_v20 = vadd.f32 %v8552_v44, %v1879_v12 }
 0x20d   : > { %v8883_v0 = vpack.c.bf16 %v11453_v52, %v11452_v24  ;;  %11455 = vst [vmem:[#allocation39_spill] sm:$0xff] %v8887_v51  ;;  %v8900_v24 = vadd.f32 %v2343_v17, %v2151_v13  ;;  %v2353_v35 = vpop.f32.mrf.mxu1  ;;  %3213 = vmatmul.mubr.bf16.gmra.mxu0 %v8871_v6  ;;  %v8905_v2 = vadd.f32 %v2349_v8, %v2157_v57  ;;  %v11460_v57 = vmax.f32 %v8885_v39, 0.0 }
 0x20e   : > { %3222 = vmatprep.mubr.bf16.mxu0 %v8895_v23  ;;  %v2162_v13 = vpop.f32.mrf.mxu0  ;;  %v1891_v8 = vadd.f32 %v8625_v36, %v8071_v18  ;;  %v2161_v52 = vadd.f32 %v2160_v59, %v8649_v48  ;;  %v1887_v36 = vadd.f32 %v8596_v58, %v8071_v18  ;;  %v11462_v17 = vmax.f32 %v8857_v46, 0.0 }
 0x20f   : > { %11458 = vst [vmem:[#allocation119_spill] sm:$0xff] %v8900_v24  ;;  %3306 = vmatmul.mubr.bf16.gmra.mxu1 %v8883_v0  ;;  %11459 = vst [vmem:[#allocation120_spill] sm:$0xff] %v8905_v2  ;;  %v2355_v55 = vpop.f32.mrf.mxu1  ;;  %v2163_v7 = vadd.f32 %v2162_v13, %v8638_v61  ;;  %v11461_v13 = vmax.f32 %v8905_v2, 0.0  ;;  %v11464_v18 = vmax.f32 %v8900_v24, 0.0  ;;  %v11465_v58 = vmax.f32 %v8887_v51, 0.0 }
 0x210   : > { %4108 = vmatpush1.bf16.msra.mxu1 %v6540_v1  ;;  %v8936_v59 = vpack.c.bf16 %v11463_v5, %v11462_v17  ;;  %v6560_v17 = vld [vmem:[#allocation11 + $0x104] ss:$8 sps:$4 sm:$0xff]   ;;  %v8954_v5 = vadd.f32 %v8627_v30, %v1891_v8  ;;  %v8965_v24 = vadd.f32 %v2353_v35, %v2161_v52  ;;  %v8970_v30 = vadd.f32 %v8598_v22, %v1887_v36  ;;  %v6564_v8 = vld [vmem:[#allocation11 + $0x1f0] ss:$8 sps:$4 sm:$0xff]  }
 0x211   : > { %4109 = vmatprep.subr.bf16.mxu1 %v6548_v21  ;;  %v2164_v21 = vpop.f32.mrf.mxu0  ;;  %v2357_v26 = vpop.f32.mrf.mxu1  ;;  %v8930_v45 = vpack.c.bf16 %v11461_v13, %v11460_v57  ;;  %v11466_v57 = vmax.f32 %v8898_v9, 0.0  ;;  %v11467_v13 = vmax.f32 %v8877_v40, 0.0  ;;  %v8956_v44 = vadd.f32 %v2355_v55, %v2163_v7  ;;  %v6558_v55 = vld [vmem:[#allocation11 + $0x100] ss:$8 sps:$4 sm:$0xff]  }
 0x212   : > { %v2165_v1 = vadd.f32 %v2164_v21, %v8649_v48  ;;  %v1889_v35 = vadd.f32 %v8607_v31, %v8099_v50  ;;  %v11475_v52 = vmax.f32 %v8965_v24, 0.0 }
 0x213   : > { %v2166_v21 = vpop.f32.mrf.mxu0  ;;  %v2359_v39 = vpop.f32.mrf.mxu1  ;;  %v8951_v2 = vpack.c.bf16 %v11467_v13, %v11466_v57  ;;  %11468 = vst [vmem:[#allocation121_spill] sm:$0xff] %v8956_v44  ;;  %3315 = vmatprep.mubr.bf16.mxu1 %v8930_v45  ;;  %v1885_v13 = vadd.f32 %v8582_v47, %v8099_v50  ;;  %v11473_v50 = vmax.f32 %v8939_v20, 0.0 }
 0x214   : > { %4110 = vmatpush1.bf16.msra.mxu1 %v6546_v54  ;;  %v8945_v54 = vpack.c.bf16 %v11465_v58, %v11464_v18  ;;  %v8958_v12 = vadd.f32 %v2357_v26, %v2165_v1  ;;  %v2167_v18 = vadd.f32 %v2166_v21, %v8638_v61  ;;  %v11470_v58 = vld [vmem:[#allocation83_spill] sm:$0xff] }
 0x215   : > { %4111 = vmatprep.subr.bf16.mxu1 %v6554_v53  ;;  %v8963_v53 = vadd.f32 %v11470_v58, %v1875_v34  ;;  %11471 = vst [vmem:[#allocation83_spill] sm:$0xff] %v8965_v24  ;;  %v2170_v51 = vpop.f32.mrf.mxu0  ;;  %v2363_v57 = vpop.f32.mrf.mxu1  ;;  %3223 = vmatmul.mubr.bf16.gmra.mxu0 %v8936_v59  ;;  %v6566_v34 = vld [vmem:[#allocation11 + $0x1f4] ss:$8 sps:$4 sm:$0xff]  }
 0x216   : > { %11469 = vst [vmem:[#allocation122_spill] sm:$0xff] %v8958_v12  ;;  %v8972_v26 = vadd.f32 %v2359_v39, %v2167_v18  ;;  %3232 = vmatprep.mubr.bf16.mxu0 %v8951_v2  ;;  %v11159_v39 = vmax.f32 %v8956_v44, 0.0  ;;  %v2171_v18 = vadd.f32 %v2170_v51, %v8649_v48  ;;  %v11474_v51 = vld [vmem:[#allocation91_spill] sm:$0xff] }
 0x217   : > { %3316 = vmatmul.mubr.bf16.gmra.mxu1 %v8945_v54  ;;  %v2172_v1 = vpop.f32.mrf.mxu0  ;;  %v2365_v7 = vpop.f32.mrf.mxu1  ;;  %v11162_v21 = vmax.f32 %v8963_v53, 0.0  ;;  %v9003_v31 = vadd.f32 %v11474_v51, %v1889_v35  ;;  %v11479_v35 = vmax.f32 %v8970_v30, 0.0  ;;  %v11480_v51 = vmax.f32 %v8954_v5, 0.0 }
 0x218   : > { %11472 = vst [vmem:[#allocation123_spill] sm:$0xff] %v8972_v26  ;;  %4112 = vmatpush1.bf16.msra.mxu1 %v6552_v29  ;;  %v11160_v36 = vmax.f32 %v8972_v26, 0.0  ;;  %v2173_v29 = vadd.f32 %v2172_v1, %v8638_v61  ;;  %v9026_v24 = vadd.f32 %v2363_v57, %v2171_v18  ;;  %v6578_v57 = vld [vmem:[#allocation11 + $0x1d4] ss:$8 sps:$4 sm:$0xff]  }
 0x219   : > { %4113 = vmatprep.subr.bf16.mxu1 %v6560_v17  ;;  %v2174_v58 = vpop.f32.mrf.mxu0  ;;  %v2367_v17 = vpop.f32.mrf.mxu1  ;;  %v9000_v47 = vpack.c.bf16 %v11473_v50, %v11162_v21  ;;  %v9021_v21 = vpack.c.bf16 %v11480_v51, %v11479_v35 }
 0x21a   : > { %v2175_v22 = vadd.f32 %v2174_v58, %v8649_v48  ;;  %v8994_v1 = vpack.c.bf16 %v11160_v36, %v11159_v39  ;;  %v6572_v39 = vld [vmem:[#allocation11 + $0x1e4] ss:$8 sps:$4 sm:$0xff]   ;;  %v9011_v36 = vadd.f32 %v2365_v7, %v2173_v29 }
 0x21b   : > { %v2176_v44 = vpop.f32.mrf.mxu0  ;;  %v2369_v26 = vpop.f32.mrf.mxu1 }
 0x21c   : > { %4114 = vmatpush1.bf16.msra.mxu1 %v6558_v55  ;;  %v11476_v55 = vmax.f32 %v8958_v12, 0.0  ;;  %11477 = vst [vmem:[#allocation91_spill] sm:$0xff] %v9011_v36  ;;  %v9013_v4 = vadd.f32 %v2367_v17, %v2175_v22  ;;  %v2177_v50 = vadd.f32 %v2176_v44, %v8638_v61  ;;  %3325 = vmatprep.mubr.bf16.mxu1 %v8994_v1  ;;  %v6570_v22 = vld [vmem:[#allocation11 + $0x1e0] ss:$8 sps:$4 sm:$0xff]   ;;  %v11170_v18 = vmax.f32 %v9011_v36, 0.0 }
 0x21d   : > { %4115 = vmatprep.subr.bf16.mxu1 %v6566_v34  ;;  %v2180_v34 = vpop.f32.mrf.mxu0  ;;  %v2373_v7 = vpop.f32.mrf.mxu1  ;;  %3233 = vmatmul.mubr.bf16.gmra.mxu0 %v9000_v47  ;;  %v6584_v36 = vld [vmem:[#allocation11 + $0x1c4] ss:$8 sps:$4 sm:$0xff]  }
 0x21e   : > { %v9009_v58 = vpack.c.bf16 %v11476_v55, %v11475_v52  ;;  %11478 = vst [vmem:[#allocation124_spill] sm:$0xff] %v9013_v4  ;;  %v11481_v52 = vld [vmem:[#allocation89_spill] sm:$0xff]  ;;  %v9030_v44 = vadd.f32 %v2369_v26, %v2177_v50  ;;  %3242 = vmatprep.mubr.bf16.mxu0 %v9021_v21  ;;  %v2181_v50 = vadd.f32 %v2180_v34, %v8649_v48  ;;  %v11485_v34 = vmax.f32 %v9013_v4, 0.0 }
 0x21f   : > { %v9024_v55 = vadd.f32 %v11481_v52, %v1885_v13  ;;  %11482 = vst [vmem:[#allocation89_spill] sm:$0xff] %v9026_v24  ;;  %v2182_v13 = vpop.f32.mrf.mxu0  ;;  %v2375_v35 = vpop.f32.mrf.mxu1 }
 0x220   : > { %3326 = vmatmul.mubr.bf16.gmra.mxu1 %v9009_v58  ;;  %11483 = vst [vmem:[#allocation125_spill] sm:$0xff] %v9030_v44  ;;  %v11171_v51 = vmax.f32 %v9030_v44, 0.0  ;;  %v2183_v52 = vadd.f32 %v2182_v13, %v8638_v61  ;;  %v11484_v13 = vmax.f32 %v9003_v31, 0.0 }
 0x221   : > { %4116 = vmatpush2.bf16.msra.mxu1 %v6564_v8  ;;  %v11172_v26 = vmax.f32 %v9024_v55, 0.0  ;;  %v11174_v8 = vmax.f32 %v9026_v24, 0.0  ;;  %v2184_v12 = vpop.f32.mrf.mxu0  ;;  %v2377_v29 = vpop.f32.mrf.mxu1 }
 0x222   : > { %4117 = vmatprep.subr.bf16.mxu1 %v6572_v39  ;;  %v2185_v17 = vadd.f32 %v2184_v12, %v8649_v48  ;;  %v9046_v39 = vpack.c.bf16 %v11171_v51, %v11170_v18  ;;  %v9060_v44 = vadd.f32 %v2375_v35, %v2183_v52  ;;  %v6582_v35 = vld [vmem:[#allocation11 + $0x1c0] ss:$8 sps:$4 sm:$0xff]  }
 0x223   : > { %v9052_v28 = vpack.c.bf16 %v11484_v13, %v11172_v26  ;;  %v9058_v19 = vpack.c.bf16 %v11485_v34, %v11174_v8  ;;  %v2186_v12 = vpop.f32.mrf.mxu0  ;;  %v9066_v13 = vadd.f32 %v2373_v7, %v2181_v50 }
 0x224   : > { %11486 = vst [vmem:[#allocation126_spill] sm:$0xff] %v9060_v44  ;;  %v9062_v18 = vadd.f32 %v2377_v29, %v2185_v17  ;;  %v2187_v51 = vadd.f32 %v2186_v12, %v8638_v61  ;;  %3335 = vmatprep.mubr.bf16.mxu1 %v9046_v39  ;;  %v6590_v12 = vld [vmem:[#allocation11 + $0x1b4] ss:$8 sps:$4 sm:$0xff]   ;;  %v11180_v7 = vmax.f32 %v9060_v44, 0.0  ;;  %v6588_v29 = vld [vmem:[#allocation11 + $0x1b0] ss:$8 sps:$4 sm:$0xff]  }
 0x225   : > { %4118 = vmatpush2.bf16.msra.mxu1 %v6570_v22  ;;  %v2379_v22 = vpop.f32.mrf.mxu1  ;;  %11488 = vst [vmem:[#allocation128_spill] sm:$0xff] %v9066_v13  ;;  %v2190_v26 = vpop.f32.mrf.mxu0  ;;  %3243 = vmatmul.mubr.bf16.gmra.mxu0 %v9052_v28  ;;  %v11183_v4 = vmax.f32 %v9066_v13, 0.0 }
 0x226   : > { %4119 = vmatprep.subr.bf16.mxu1 %v6578_v57  ;;  %11487 = vst [vmem:[#allocation127_spill] sm:$0xff] %v9062_v18  ;;  %v9070_v34 = vadd.f32 %v2379_v22, %v2187_v51  ;;  %v11490_v57 = vld [vmem:[#allocation37_spill] sm:$0xff]  ;;  %v2191_v51 = vadd.f32 %v2190_v26, %v8649_v48 }
 0x227   : > { %v2383_v24 = vpop.f32.mrf.mxu1  ;;  %3938 = vmatprep.mubr.bf16.mxu0 %v11490_v57  ;;  %v2192_v17 = vpop.f32.mrf.mxu0 }
 0x228   : > { %3336 = vmatmul.mubr.bf16.gmra.mxu1 %v9058_v19  ;;  %11489 = vst [vmem:[#allocation129_spill] sm:$0xff] %v9070_v34  ;;  %v11181_v50 = vmax.f32 %v9070_v34, 0.0  ;;  %v2193_v8 = vadd.f32 %v2192_v17, %v8638_v61  ;;  %v11491_v17 = vmax.f32 %v9062_v18, 0.0 }
 0x229   : > { %4120 = vmatpush2.bf16.msra.mxu1 %v6576_v33  ;;  %v2385_v52 = vpop.f32.mrf.mxu1  ;;  %v2194_v33 = vpop.f32.mrf.mxu0 }
 0x22a   : > { %4121 = vmatprep.subr.bf16.mxu1 %v6584_v36  ;;  %v2195_v57 = vadd.f32 %v2194_v33, %v8649_v48  ;;  %v9084_v36 = vpack.c.bf16 %v11181_v50, %v11180_v7  ;;  %v9090_v16 = vpack.c.bf16 %v11491_v17, %v11183_v4  ;;  %v9092_v32 = vadd.f32 %v2385_v52, %v2193_v8  ;;  %v11496_v17 = vld [vmem:[#allocation42_spill] sm:$0xff] }
 0x22b   : > { %v2387_v22 = vpop.f32.mrf.mxu1  ;;  %v2196_v43 = vpop.f32.mrf.mxu0  ;;  %v9098_v7 = vadd.f32 %v2383_v24, %v2191_v51  ;;  %v6591_v8 = vld [vmem:[#allocation11 + $0x1a0] ss:$8 sps:$4 sm:$0xff]   ;;  %v6594_v52 = vld [vmem:[#allocation11 + $0x190] ss:$8 sps:$4 sm:$0xff]  }
 0x22c   : > { %11492 = vst [vmem:[#allocation37_spill] sm:$0xff] %v9090_v16  ;;  %11493 = vst [vmem:[#allocation130_spill] sm:$0xff] %v9092_v32  ;;  %v2197_v33 = vadd.f32 %v2196_v43, %v8638_v61  ;;  %3345 = vmatprep.mubr.bf16.mxu1 %v9084_v36  ;;  %v11189_v24 = vmax.f32 %v9092_v32, 0.0 }
 0x22d   : > { %4122 = vmatpush2.bf16.msra.mxu1 %v6582_v35  ;;  %v2389_v26 = vpop.f32.mrf.mxu1  ;;  %v9094_v35 = vadd.f32 %v2387_v22, %v2195_v57  ;;  %11495 = vst [vmem:[#allocation132_spill] sm:$0xff] %v9098_v7  ;;  %v2200_v50 = vpop.f32.mrf.mxu0  ;;  %3939 = vmatmul.mubr.bf16.vlgmr.msra.gmra.mxu0 %v11496_v17  ;;  %v6596_v57 = vld [vmem:[#allocation11 + $0x194] ss:$8 sps:$4 sm:$0xff]   ;;  %v11192_v17 = vmax.f32 %v9098_v7, 0.0 }
 0x22e   : > { %4123 = vmatprep.subr.bf16.mxu1 %v6590_v12  ;;  %v9102_v4 = vadd.f32 %v2389_v26, %v2197_v33  ;;  %v11498_v12 = vld [vmem:[#allocation45_spill] sm:$0xff]  ;;  %v2201_v26 = vadd.f32 %v2200_v50, %v8649_v48 }
 0x22f   : > { %11494 = vst [vmem:[#allocation131_spill] sm:$0xff] %v9094_v35  ;;  %v2393_v13 = vpop.f32.mrf.mxu1  ;;  %3948 = vmatprep.mubr.bf16.mxu0 %v11498_v12  ;;  %v2202_v22 = vpop.f32.mrf.mxu0 }
 0x230   : > { %3346 = vmatmul.mubr.bf16.gmra.mxu1 %v9090_v16  ;;  %11497 = vst [vmem:[#allocation42_spill] sm:$0xff] %v9102_v4  ;;  %v11190_v51 = vmax.f32 %v9102_v4, 0.0  ;;  %v2203_v44 = vadd.f32 %v2202_v22, %v8638_v61  ;;  %v11499_v22 = vmax.f32 %v9094_v35, 0.0  ;;  %v6599_v16 = vld [vmem:[#allocation11 + $0x184] ss:$8 sps:$4 sm:$0xff]  }
 0x231   : > { %4124 = vmatpush2.bf16.msra.mxu1 %v6588_v29  ;;  %v2395_v43 = vpop.f32.mrf.mxu1  ;;  %v2204_v29 = vpop.f32.mrf.mxu0 }
 0x232   : > { %4125 = vmatprep.subr.bf16.mxu1 %v6593_v56  ;;  %v2205_v12 = vadd.f32 %v2204_v29, %v8649_v48  ;;  %v9116_v56 = vpack.c.bf16 %v11190_v51, %v11189_v24  ;;  %v9122_v18 = vpack.c.bf16 %v11499_v22, %v11192_v17  ;;  %v9124_v49 = vadd.f32 %v2395_v43, %v2203_v44  ;;  %v11504_v22 = vld [vmem:[#allocation49_spill] sm:$0xff]  ;;  %v6597_v44 = vld [vmem:[#allocation11 + $0x180] ss:$8 sps:$4 sm:$0xff]  }
 0x233   : > { %v2397_v33 = vpop.f32.mrf.mxu1  ;;  %v2206_v34 = vpop.f32.mrf.mxu0  ;;  %v9130_v24 = vadd.f32 %v2393_v13, %v2201_v26 }
 0x234   : > { %11500 = vst [vmem:[#allocation45_spill] sm:$0xff] %v9122_v18  ;;  %11501 = vst [vmem:[#allocation133_spill] sm:$0xff] %v9124_v49  ;;  %v2207_v29 = vadd.f32 %v2206_v34, %v8638_v61  ;;  %3355 = vmatprep.mubr.bf16.mxu1 %v9116_v56  ;;  %v11197_v13 = vmax.f32 %v9124_v49, 0.0 }
 0x235   : > { %4126 = vmatpush2.bf16.msra.mxu1 %v6591_v8  ;;  %v2399_v50 = vpop.f32.mrf.mxu1  ;;  %v9126_v8 = vadd.f32 %v2397_v33, %v2205_v12  ;;  %11503 = vst [vmem:[#allocation135_spill] sm:$0xff] %v9130_v24  ;;  %v2210_v51 = vpop.f32.mrf.mxu0  ;;  %3949 = vmatmul.mubr.bf16.gmra.mxu0 %v11504_v22  ;;  %v11200_v32 = vmax.f32 %v9130_v24, 0.0 }
 0x236   : > { %4127 = vmatprep.subr.bf16.mxu1 %v6596_v57  ;;  %v9134_v17 = vadd.f32 %v2399_v50, %v2207_v29  ;;  %v11506_v57 = vld [vmem:[#allocation52_spill] sm:$0xff]  ;;  %v2211_v50 = vadd.f32 %v2210_v51, %v8649_v48 }
 0x237   : > { %11502 = vst [vmem:[#allocation134_spill] sm:$0xff] %v9126_v8  ;;  %v2403_v7 = vpop.f32.mrf.mxu1  ;;  %3958 = vmatprep.mubr.bf16.mxu0 %v11506_v57  ;;  %v11201_v43 = vmax.f32 %v9126_v8, 0.0  ;;  %v2212_v33 = vpop.f32.mrf.mxu0 }
 0x238   : > { %3356 = vmatmul.mubr.bf16.gmra.mxu1 %v9122_v18  ;;  %11505 = vst [vmem:[#allocation49_spill] sm:$0xff] %v9134_v17  ;;  %v11198_v26 = vmax.f32 %v9134_v17, 0.0  ;;  %v2213_v12 = vadd.f32 %v2212_v33, %v8638_v61  ;;  %v11507_v33 = vld [vmem:[#allocation75_spill] sm:$0xff] }
 0x239   : > { %4128 = vmatpush2.bf16.msra.mxu1 %v6594_v52  ;;  %v2405_v34 = vpop.f32.mrf.mxu1  ;;  %v2214_v29 = vpop.f32.mrf.mxu0  ;;  %v9154_v57 = vpack.c.bf16 %v11201_v43, %v11200_v32  ;;  %v11508_v35 = vmax.f32 %v11507_v33, 0.0  ;;  %v11512_v32 = vld [vmem:[#allocation55_spill] sm:$0xff] }
 0x23a   : > { %4129 = vmatprep.subr.bf16.mxu1 %v6599_v16  ;;  %v2215_v22 = vadd.f32 %v2214_v29, %v8649_v48  ;;  %v9148_v16 = vpack.c.bf16 %v11198_v26, %v11197_v13  ;;  %v9158_v18 = vadd.f32 %v2405_v34, %v2213_v12  ;;  %v9164_v13 = vadd.f32 %v2403_v7, %v2211_v50 }
 0x23b   : > { %v2407_v52 = vpop.f32.mrf.mxu1  ;;  %v2216_v51 = vpop.f32.mrf.mxu0 }
 0x23c   : > { %11509 = vst [vmem:[#allocation52_spill] sm:$0xff] %v9158_v18  ;;  %v2217_v29 = vadd.f32 %v2216_v51, %v8638_v61  ;;  %3365 = vmatprep.mubr.bf16.mxu1 %v9148_v16  ;;  %11511 = vst [vmem:[#allocation136_spill] sm:$0xff] %v9164_v13  ;;  %v11209_v50 = vmax.f32 %v9164_v13, 0.0  ;;  %v11520_v13 = vld [vmem:[#allocation61_spill] sm:$0xff] }
 0x23d   : > { %4130 = vmatpush2.bf16.msra.mxu1 %v6597_v44  ;;  %v2409_v4 = vpop.f32.mrf.mxu1  ;;  %v9160_v44 = vadd.f32 %v2407_v52, %v2215_v22  ;;  %v2220_v26 = vpop.f32.mrf.mxu0  ;;  %3959 = vmatmul.mubr.bf16.gmra.mxu0 %v11512_v32  ;;  %v11206_v22 = vmax.f32 %v9158_v18, 0.0 }
 0x23e   : > { %4914 = vmatprep.subr.mxu1 %v11508_v35  ;;  %v9168_v33 = vadd.f32 %v2409_v4, %v2217_v29  ;;  %v11514_v35 = vld [vmem:[#allocation58_spill] sm:$0xff]  ;;  %v2221_v43 = vadd.f32 %v2220_v26, %v8649_v48 }
 0x23f   : > { %11510 = vst [vmem:[#allocation75_spill] sm:$0xff] %v9160_v44  ;;  %v2413_v24 = vpop.f32.mrf.mxu1  ;;  %3968 = vmatprep.mubr.bf16.mxu0 %v11514_v35  ;;  %v11210_v34 = vmax.f32 %v9160_v44, 0.0  ;;  %v2222_v12 = vpop.f32.mrf.mxu0 }
 0x240   : > { %3366 = vmatmul.mubr.bf16.gmra.mxu1 %v9154_v57  ;;  %11513 = vst [vmem:[#allocation55_spill] sm:$0xff] %v9168_v33  ;;  %v11207_v51 = vmax.f32 %v9168_v33, 0.0  ;;  %v2223_v7 = vadd.f32 %v2222_v12, %v8638_v61  ;;  %v9196_v18 = vadd.f32 %v2413_v24, %v2221_v43 }
 0x241   : > { %v2415_v52 = vpop.f32.mrf.mxu1  ;;  %v2224_v49 = vpop.f32.mrf.mxu0  ;;  %v9188_v35 = vpack.c.bf16 %v11210_v34, %v11209_v50  ;;  %v11522_v34 = vld [vmem:[#allocation64_spill] sm:$0xff] }
 0x242   : > { %v2225_v4 = vadd.f32 %v2224_v49, %v8649_v48  ;;  %v9182_v29 = vpack.c.bf16 %v11207_v51, %v11206_v22  ;;  %v9190_v17 = vadd.f32 %v2415_v52, %v2223_v7  ;;  %11519 = vst [vmem:[#allocation140_spill] sm:$0xff] %v9196_v18  ;;  %v11219_v43 = vmax.f32 %v9196_v18, 0.0  ;;  %v11528_v18 = vld [vmem:[#allocation67_spill] sm:$0xff] }
 0x243   : > { %v2417_v32 = vpop.f32.mrf.mxu1  ;;  %11516 = vst [vmem:[#allocation137_spill] sm:$0xff] %v9188_v35  ;;  %v2226_v12 = vpop.f32.mrf.mxu0 }
 0x244   : > { %11515 = vst [vmem:[#allocation58_spill] sm:$0xff] %v9182_v29  ;;  %11517 = vst [vmem:[#allocation138_spill] sm:$0xff] %v9190_v17  ;;  %v9192_v26 = vadd.f32 %v2417_v32, %v2225_v4  ;;  %v2227_v49 = vadd.f32 %v2226_v12, %v8638_v61  ;;  %3375 = vmatprep.mubr.bf16.mxu1 %v9182_v29  ;;  %v11216_v4 = vmax.f32 %v9190_v17, 0.0 }
 0x245   : > { %v2419_v8 = vpop.f32.mrf.mxu1  ;;  %v2230_v22 = vpop.f32.mrf.mxu0  ;;  %3969 = vmatmul.mubr.bf16.gmra.mxu0 %v11520_v13 }
 0x246   : > { %11518 = vst [vmem:[#allocation139_spill] sm:$0xff] %v9192_v26  ;;  %v9200_v50 = vadd.f32 %v2419_v8, %v2227_v49  ;;  %3978 = vmatprep.mubr.bf16.mxu0 %v11522_v34  ;;  %v11220_v52 = vmax.f32 %v9192_v26, 0.0  ;;  %v2231_v44 = vadd.f32 %v2230_v22, %v8649_v48 }
 0x247   : > { %v2423_v51 = vpop.f32.mrf.mxu1  ;;  %v2232_v7 = vpop.f32.mrf.mxu0 }
 0x248   : > { %3376 = vmatmul.mubr.bf16.gmra.mxu1 %v9188_v35  ;;  %11521 = vst [vmem:[#allocation61_spill] sm:$0xff] %v9200_v50  ;;  %v11217_v12 = vmax.f32 %v9200_v50, 0.0  ;;  %v2233_v24 = vadd.f32 %v2232_v7, %v8638_v61  ;;  %v9220_v49 = vpack.c.bf16 %v11220_v52, %v11219_v43  ;;  %v9228_v17 = vadd.f32 %v2423_v51, %v2231_v44  ;;  %v11530_v52 = vld [vmem:[#allocation70_spill] sm:$0xff] }
 0x249   : > { %v2425_v32 = vpop.f32.mrf.mxu1  ;;  %v2234_v33 = vpop.f32.mrf.mxu0 }
 0x24a   : > { %v2235_v8 = vadd.f32 %v2234_v33, %v8649_v48  ;;  %v9214_v34 = vpack.c.bf16 %v11217_v12, %v11216_v4  ;;  %11524 = vst [vmem:[#allocation141_spill] sm:$0xff] %v9220_v49  ;;  %v9222_v29 = vadd.f32 %v2425_v32, %v2233_v24  ;;  %11527 = vst [vmem:[#allocation144_spill] sm:$0xff] %v9228_v17  ;;  %v11229_v51 = vmax.f32 %v9228_v17, 0.0  ;;  %v11536_v17 = vld [vmem:[#allocation73_spill] sm:$0xff] }
 0x24b   : > { %v2427_v13 = vpop.f32.mrf.mxu1  ;;  %v2236_v7 = vpop.f32.mrf.mxu0 }
 0x24c   : > { %11523 = vst [vmem:[#allocation64_spill] sm:$0xff] %v9214_v34  ;;  %11525 = vst [vmem:[#allocation142_spill] sm:$0xff] %v9222_v29  ;;  %v9224_v22 = vadd.f32 %v2427_v13, %v2235_v8  ;;  %v2237_v33 = vadd.f32 %v2236_v7, %v8638_v61  ;;  %3385 = vmatprep.mubr.bf16.mxu1 %v9214_v34  ;;  %v11226_v8 = vmax.f32 %v9222_v29, 0.0 }
 0x24d   : > { %v2429_v35 = vpop.f32.mrf.mxu1  ;;  %v2240_v4 = vpop.f32.mrf.mxu0  ;;  %3979 = vmatmul.mubr.bf16.gmra.mxu0 %v11528_v18 }
 0x24e   : > { %11526 = vst [vmem:[#allocation143_spill] sm:$0xff] %v9224_v22  ;;  %v9232_v43 = vadd.f32 %v2429_v35, %v2237_v33  ;;  %3988 = vmatprep.mubr.bf16.mxu0 %v11530_v52  ;;  %v11230_v32 = vmax.f32 %v9224_v22, 0.0  ;;  %v2241_v26 = vadd.f32 %v2240_v4, %v8649_v48 }
 0x24f   : > { %v2433_v12 = vpop.f32.mrf.mxu1  ;;  %v2242_v24 = vpop.f32.mrf.mxu0 }
 0x250   : > { %3386 = vmatmul.mubr.bf16.gmra.mxu1 %v9220_v49  ;;  %11529 = vst [vmem:[#allocation67_spill] sm:$0xff] %v9232_v43  ;;  %v11227_v7 = vmax.f32 %v9232_v43, 0.0  ;;  %v2243_v44 = vadd.f32 %v2242_v24, %v8638_v61  ;;  %v9252_v33 = vpack.c.bf16 %v11230_v32, %v11229_v51  ;;  %v9260_v29 = vadd.f32 %v2433_v12, %v2241_v26  ;;  %v11538_v32 = vld [vmem:[#allocation76_spill] sm:$0xff] }
 0x251   : > { %v2435_v13 = vpop.f32.mrf.mxu1  ;;  %v2244_v50 = vpop.f32.mrf.mxu0 }
 0x252   : > { %v2245_v35 = vadd.f32 %v2244_v50, %v8649_v48  ;;  %v9246_v52 = vpack.c.bf16 %v11227_v7, %v11226_v8  ;;  %11532 = vst [vmem:[#allocation145_spill] sm:$0xff] %v9252_v33  ;;  %v9254_v34 = vadd.f32 %v2435_v13, %v2243_v44  ;;  %11535 = vst [vmem:[#allocation148_spill] sm:$0xff] %v9260_v29  ;;  %v11239_v12 = vmax.f32 %v9260_v29, 0.0  ;;  %v11544_v29 = vld [vmem:[#allocation80_spill] sm:$0xff] }
 0x253   : > { %v2437_v18 = vpop.f32.mrf.mxu1  ;;  %v2246_v24 = vpop.f32.mrf.mxu0 }
 0x254   : > { %11531 = vst [vmem:[#allocation70_spill] sm:$0xff] %v9246_v52  ;;  %11533 = vst [vmem:[#allocation146_spill] sm:$0xff] %v9254_v34  ;;  %v9256_v4 = vadd.f32 %v2437_v18, %v2245_v35  ;;  %v2247_v50 = vadd.f32 %v2246_v24, %v8638_v61  ;;  %3395 = vmatprep.mubr.bf16.mxu1 %v9246_v52  ;;  %v11236_v35 = vmax.f32 %v9254_v34, 0.0 }
 0x255   : > { %v2439_v49 = vpop.f32.mrf.mxu1  ;;  %v2250_v8 = vpop.f32.mrf.mxu0  ;;  %3989 = vmatmul.mubr.bf16.gmra.mxu0 %v11536_v17 }
 0x256   : > { %11534 = vst [vmem:[#allocation147_spill] sm:$0xff] %v9256_v4  ;;  %v9264_v51 = vadd.f32 %v2439_v49, %v2247_v50  ;;  %3998 = vmatprep.mubr.bf16.mxu0 %v11538_v32  ;;  %v11240_v13 = vmax.f32 %v9256_v4, 0.0  ;;  %v2251_v22 = vadd.f32 %v2250_v8, %v8649_v48 }
 0x257   : > { %v2443_v7 = vpop.f32.mrf.mxu1  ;;  %v2252_v44 = vpop.f32.mrf.mxu0 }
 0x258   : > { %3396 = vmatmul.mubr.bf16.gmra.mxu1 %v9252_v33  ;;  %11537 = vst [vmem:[#allocation73_spill] sm:$0xff] %v9264_v51  ;;  %v11237_v24 = vmax.f32 %v9264_v51, 0.0  ;;  %v2253_v26 = vadd.f32 %v2252_v44, %v8638_v61  ;;  %v9284_v50 = vpack.c.bf16 %v11240_v13, %v11239_v12  ;;  %v9292_v34 = vadd.f32 %v2443_v7, %v2251_v22  ;;  %v11546_v13 = vld [vmem:[#allocation82_spill] sm:$0xff] }
 0x259   : > { %v2445_v18 = vpop.f32.mrf.mxu1  ;;  %v2254_v43 = vpop.f32.mrf.mxu0 }
 0x25a   : > { %v2255_v49 = vadd.f32 %v2254_v43, %v8649_v48  ;;  %v9278_v32 = vpack.c.bf16 %v11237_v24, %v11236_v35  ;;  %11540 = vst [vmem:[#allocation149_spill] sm:$0xff] %v9284_v50  ;;  %v9286_v52 = vadd.f32 %v2445_v18, %v2253_v26  ;;  %11543 = vst [vmem:[#allocation152_spill] sm:$0xff] %v9292_v34  ;;  %v11249_v7 = vmax.f32 %v9292_v34, 0.0  ;;  %v11552_v34 = vld [vmem:[#allocation85_spill] sm:$0xff] }
 0x25b   : > { %v2447_v17 = vpop.f32.mrf.mxu1  ;;  %v2256_v44 = vpop.f32.mrf.mxu0 }
 0x25c   : > { %11539 = vst [vmem:[#allocation76_spill] sm:$0xff] %v9278_v32  ;;  %11541 = vst [vmem:[#allocation150_spill] sm:$0xff] %v9286_v52  ;;  %v9288_v8 = vadd.f32 %v2447_v17, %v2255_v49  ;;  %v2257_v43 = vadd.f32 %v2256_v44, %v8638_v61  ;;  %3405 = vmatprep.mubr.bf16.mxu1 %v9278_v32  ;;  %v11246_v49 = vmax.f32 %v9286_v52, 0.0 }
 0x25d   : > { %v2449_v33 = vpop.f32.mrf.mxu1  ;;  %v2260_v35 = vpop.f32.mrf.mxu0  ;;  %3999 = vmatmul.mubr.bf16.gmra.mxu0 %v11544_v29 }
 0x25e   : > { %11542 = vst [vmem:[#allocation151_spill] sm:$0xff] %v9288_v8  ;;  %v9296_v12 = vadd.f32 %v2449_v33, %v2257_v43  ;;  %4008 = vmatprep.mubr.bf16.mxu0 %v11546_v13  ;;  %v11250_v18 = vmax.f32 %v9288_v8, 0.0  ;;  %v2261_v4 = vadd.f32 %v2260_v35, %v8649_v48 }
 0x25f   : > { %v2453_v24 = vpop.f32.mrf.mxu1  ;;  %v2262_v26 = vpop.f32.mrf.mxu0 }
 0x260   : > { %3406 = vmatmul.mubr.bf16.gmra.mxu1 %v9284_v50  ;;  %11545 = vst [vmem:[#allocation80_spill] sm:$0xff] %v9296_v12  ;;  %v11247_v44 = vmax.f32 %v9296_v12, 0.0  ;;  %v2263_v22 = vadd.f32 %v2262_v26, %v8638_v61  ;;  %v9316_v43 = vpack.c.bf16 %v11250_v18, %v11249_v7  ;;  %v9324_v52 = vadd.f32 %v2453_v24, %v2261_v4  ;;  %v11554_v18 = vld [vmem:[#allocation88_spill] sm:$0xff] }
 0x261   : > { %v2455_v17 = vpop.f32.mrf.mxu1  ;;  %v2264_v51 = vpop.f32.mrf.mxu0 }
 0x262   : > { %v2265_v33 = vadd.f32 %v2264_v51, %v8649_v48  ;;  %v9310_v13 = vpack.c.bf16 %v11247_v44, %v11246_v49  ;;  %11548 = vst [vmem:[#allocation153_spill] sm:$0xff] %v9316_v43  ;;  %v9318_v32 = vadd.f32 %v2455_v17, %v2263_v22  ;;  %11551 = vst [vmem:[#allocation156_spill] sm:$0xff] %v9324_v52  ;;  %v11257_v24 = vmax.f32 %v9324_v52, 0.0  ;;  %v11565_v52 = vld [vmem:[#allocation40_spill] sm:$0xff] }
 0x263   : > { %v2457_v29 = vpop.f32.mrf.mxu1  ;;  %v2266_v26 = vpop.f32.mrf.mxu0 }
 0x264   : > { %11547 = vst [vmem:[#allocation82_spill] sm:$0xff] %v9310_v13  ;;  %11549 = vst [vmem:[#allocation154_spill] sm:$0xff] %v9318_v32  ;;  %v9320_v35 = vadd.f32 %v2457_v29, %v2265_v33  ;;  %v2267_v51 = vadd.f32 %v2266_v26, %v8638_v61  ;;  %3415 = vmatprep.mubr.bf16.mxu1 %v9310_v13  ;;  %v11255_v33 = vmax.f32 %v9318_v32, 0.0  ;;  %v11566_v32 = vmax.f32 %v11565_v52, 0.0 }
 0x265   : > { %v2459_v50 = vpop.f32.mrf.mxu1  ;;  %v2270_v49 = vpop.f32.mrf.mxu0  ;;  %4009 = vmatmul.mubr.bf16.gmra.mxu0 %v11552_v34 }
 0x266   : > { %11550 = vst [vmem:[#allocation155_spill] sm:$0xff] %v9320_v35  ;;  %v9328_v7 = vadd.f32 %v2459_v50, %v2267_v51  ;;  %4018 = vmatprep.mubr.bf16.mxu0 %v11554_v18  ;;  %v11258_v17 = vmax.f32 %v9320_v35, 0.0  ;;  %v2271_v8 = vadd.f32 %v2270_v49, %v8649_v48  ;;  %v11567_v35 = vld [vmem:[#allocation69_spill] sm:$0xff] }
 0x267   : > { %v2463_v44 = vpop.f32.mrf.mxu1  ;;  %v2272_v22 = vpop.f32.mrf.mxu0 }
 0x268   : > { %3416 = vmatmul.mubr.bf16.gmra.mxu1 %v9316_v43  ;;  %11553 = vst [vmem:[#allocation85_spill] sm:$0xff] %v9328_v7  ;;  %v11256_v26 = vmax.f32 %v9328_v7, 0.0  ;;  %v2273_v4 = vadd.f32 %v2272_v22, %v8638_v61  ;;  %v9348_v51 = vpack.c.bf16 %v11258_v17, %v11257_v24  ;;  %v11560_v17 = vld [vmem:[#allocation95_spill] sm:$0xff]  ;;  %v11568_v7 = vmax.f32 %v11567_v35, 0.0 }
 0x269   : > { %v2465_v29 = vpop.f32.mrf.mxu1  ;;  %v2274_v12 = vpop.f32.mrf.mxu0 }
 0x26a   : > { %v2275_v50 = vadd.f32 %v2274_v12, %v8649_v48  ;;  %v9342_v18 = vpack.c.bf16 %v11256_v26, %v11255_v33  ;;  %v9350_v43 = vadd.f32 %v2465_v29, %v2273_v4  ;;  %v9356_v48 = vadd.f32 %v2463_v44, %v2271_v8  ;;  %v11558_v26 = vld [vmem:[#allocation92_spill] sm:$0xff] }
 0x26b   : > { %v2467_v34 = vpop.f32.mrf.mxu1  ;;  %v2276_v22 = vpop.f32.mrf.mxu0 }
 0x26c   : > { %11555 = vst [vmem:[#allocation88_spill] sm:$0xff] %v9350_v43  ;;  %v9352_v49 = vadd.f32 %v2467_v34, %v2275_v50  ;;  %v2277_v13 = vadd.f32 %v2276_v22, %v8638_v61  ;;  %3425 = vmatprep.mubr.bf16.mxu1 %v9342_v18  ;;  %11557 = vst [vmem:[#allocation158_spill] sm:$0xff] %v9356_v48  ;;  %v11260_v61 = vmax.f32 %v9350_v43, 0.0  ;;  %v11259_v44 = vmax.f32 %v9356_v48, 0.0  ;;  %v11575_v48 = vld [vmem:[#allocation63_spill] sm:$0xff] }
 0x26d   : > { %v2469_v12 = vpop.f32.mrf.mxu1  ;;  %v9358_v33 = vpop.f32.mrf.mxu0  ;;  %4019 = vmatmul.mubr.bf16.gmra.mxu0 %v11558_v26  ;;  %v11576_v43 = vmax.f32 %v11575_v48, 0.0  ;;  %v11581_v48 = vld [vmem:[#allocation71_spill] sm:$0xff] }
 0x26e   : > { %11556 = vst [vmem:[#allocation157_spill] sm:$0xff] %v9352_v49  ;;  %v9362_v24 = vadd.f32 %v2469_v12, %v2277_v13  ;;  %4028 = vmatprep.mubr.bf16.mxu0 %v11560_v17  ;;  %v11261_v29 = vmax.f32 %v9352_v49, 0.0  ;;  %v11682_v49 = vld [vmem:[#allocation137_spill] sm:$0xff] }
 0x26f   : > { %v9366_v4 = vpop.f32.mrf.mxu0 }
 0x270   : > { %3426 = vmatmul.mubr.bf16.gmra.mxu1 %v9348_v51  ;;  %11559 = vst [vmem:[#allocation92_spill] sm:$0xff] %v9362_v24  ;;  %v11262_v8 = vmax.f32 %v9362_v24, 0.0  ;;  %v9383_v17 = vpack.c.bf16 %v11261_v29, %v11259_v44  ;;  %v11561_v29 = vld [vmem:[#allocation41_spill] sm:$0xff] }
 0x271   : > { %v9371_v34 = vpop.f32.mrf.mxu0 }
 0x272   : > { %v9377_v13 = vpack.c.bf16 %v11262_v8, %v11260_v61  ;;  %v11562_v8 = vmax.f32 %v11561_v29, 0.0 }
 0x273   : > { %v9385_v26 = vpop.f32.mrf.mxu0 }
 0x274   : > { %3435 = vmatprep.mubr.bf16.mxu1 %v9377_v13 }
 0x275   : > { %v9388_v50 = vpop.f32.mrf.mxu0  ;;  %4029 = vmatmul.mubr.bf16.gmra.mxu0 %v8672_v3 }
 0x276   : > { %4038 = vmatprep.mubr.bf16.mxu0 %v8681_v15  ;;  %v11563_v15 = vld [vmem:[#allocation79_spill] sm:$0xff] }
 0x277   : > { %v9394_v22 = vpop.f32.mrf.mxu0  ;;  %v11564_v3 = vmax.f32 %v11563_v15, 0.0  ;;  %v11573_v15 = vld [vmem:[#allocation77_spill] sm:$0xff] }
 0x278   : > { %3436 = vmatmul.mubr.bf16.gmra.mxu1 %v9383_v17 }
 0x279   : > { %4131 = vmatprep.mubr.bf16.mxu1 %v8729_v38  ;;  %v9396_v12 = vpop.f32.mrf.mxu0 }
 0x27b   : > { %v9398_v44 = vpop.f32.mrf.mxu0 }
 0x27d   : > { %v9400_v61 = vpop.f32.mrf.mxu0  ;;  %4039 = vmatmul.mubr.bf16.gmra.mxu0 %v8735_v60 }
 0x27e   : > { %4048 = vmatprep.mubr.bf16.mxu0 %v8759_v10 }
 0x27f   : > { %v9410_v38 = vpop.f32.mrf.mxu0 }
 0x280   : > { %4132 = vmatmul.mubr.bf16.vlgmr.msra.gmra.mxu1 %v8747_v27  ;;  %v11569_v27 = vld [vmem:[#allocation74_spill] sm:$0xff] }
 0x281   : > { %4915 = vmatpush1.msra.mxu1 %v11562_v8  ;;  %4141 = vmatprep.mubr.bf16.mxu1 %v8794_v42  ;;  %v9416_v60 = vpop.f32.mrf.mxu0  ;;  %v11570_v29 = vmax.f32 %v11569_v27, 0.0  ;;  %v11571_v8 = vld [vmem:[#allocation72_spill] sm:$0xff]  ;;  %v11579_v27 = vld [vmem:[#allocation66_spill] sm:$0xff] }
 0x282   : > { %4916 = vmatprep.subr.mxu1 %v11564_v3  ;;  %v11572_v10 = vmax.f32 %v11571_v8, 0.0  ;;  %v11574_v3 = vmax.f32 %v11573_v15, 0.0 }
 0x283   : > { %4917 = vmatpush1.msra.mxu1 %v11566_v32  ;;  %v9422_v42 = vpop.f32.mrf.mxu0  ;;  %v11577_v32 = vld [vmem:[#allocation68_spill] sm:$0xff] }
 0x284   : > { %4918 = vmatprep.subr.mxu1 %v11568_v7  ;;  %v11578_v7 = vmax.f32 %v11577_v32, 0.0  ;;  %v11589_v32 = vld [vmem:[#allocation65_spill] sm:$0xff] }
 0x285   : > { %4919 = vmatpush1.msra.mxu1 %v11570_v29  ;;  %v9428_v52 = vpop.f32.mrf.mxu0  ;;  %4049 = vmatmul.mubr.bf16.gmra.mxu0 %v8800_v11  ;;  %v11580_v29 = vmax.f32 %v11579_v27, 0.0  ;;  %v11583_v11 = vld [vmem:[#allocation57_spill] sm:$0xff] }
 0x286   : > { %4920 = vmatprep.subr.mxu1 %v11572_v10  ;;  %4058 = vmatprep.mubr.bf16.mxu0 %v8815_v62  ;;  %v11584_v10 = vmax.f32 %v11583_v11, 0.0 }
 0x287   : > { %4921 = vmatpush1.msra.mxu1 %v11574_v3  ;;  %v9436_v35 = vpop.f32.mrf.mxu0  ;;  %v11587_v3 = vld [vmem:[#allocation60_spill] sm:$0xff] }
 0x288   : > { %4922 = vmatprep.subr.mxu1 %v11576_v43  ;;  %4142 = vmatmul.mubr.bf16.gmra.mxu1 %v8809_v41  ;;  %v11582_v43 = vmax.f32 %v11581_v48, 0.0  ;;  %v11585_v41 = vld [vmem:[#allocation62_spill] sm:$0xff] }
 0x289   : > { %4923 = vmatpush1.msra.mxu1 %v11578_v7  ;;  %4151 = vmatprep.mubr.bf16.mxu1 %v8865_v37  ;;  %v9442_v8 = vpop.f32.mrf.mxu0  ;;  %v11586_v62 = vmax.f32 %v11585_v41, 0.0  ;;  %v11588_v37 = vmax.f32 %v11587_v3, 0.0  ;;  %v11590_v7 = vmax.f32 %v11589_v32, 0.0  ;;  %v11596_v41 = vld [vmem:[#allocation54_spill] sm:$0xff]  ;;  %v11598_v3 = vld [vmem:[#allocation59_spill] sm:$0xff]  ;;  %v11600_v32 = vld [vmem:[#allocation44_spill] sm:$0xff] }
 0x28a   : > { %4924 = vmatprep.subr.mxu1 %v11580_v29  ;;  %v11591_v29 = vld [vmem:[#allocation51_spill] sm:$0xff] }
 0x28b   : > { %4925 = vmatpush1.msra.mxu1 %v11582_v43  ;;  %v9448_v15 = vpop.f32.mrf.mxu0  ;;  %v11592_v48 = vmax.f32 %v11591_v29, 0.0  ;;  %v11593_v43 = vld [vmem:[#allocation56_spill] sm:$0xff] }
 0x28c   : > { %4926 = vmatprep.subr.mxu1 %v11584_v10  ;;  %v11594_v11 = vmax.f32 %v11593_v43, 0.0 }
 0x28d   : > { %4927 = vmatpush1.msra.mxu1 %v11586_v62  ;;  %v9454_v27 = vpop.f32.mrf.mxu0  ;;  %4059 = vmatmul.mubr.bf16.gmra.mxu0 %v8871_v6  ;;  %v11597_v62 = vmax.f32 %v11596_v41, 0.0 }
 0x28e   : > { %4928 = vmatprep.subr.mxu1 %v11588_v37  ;;  %4068 = vmatprep.mubr.bf16.mxu0 %v8895_v23  ;;  %v11599_v37 = vmax.f32 %v11598_v3, 0.0  ;;  %v11605_v23 = vld [vmem:[#allocation48_spill] sm:$0xff] }
 0x28f   : > { %4929 = vmatpush1.msra.mxu1 %v11590_v7  ;;  %v9463_v10 = vpop.f32.mrf.mxu0  ;;  %v11601_v7 = vmax.f32 %v11600_v32, 0.0  ;;  %v11606_v43 = vmax.f32 %v11605_v23, 0.0  ;;  %v11615_v23 = vld [vmem:[#allocation46_spill] sm:$0xff] }
 0x290   : > { %4930 = vmatprep.subr.mxu1 %v11592_v48  ;;  %4152 = vmatmul.mubr.bf16.gmra.mxu1 %v8883_v0  ;;  %11595 = vst [vmem:[#allocation95_spill] sm:$0xff] %v9463_v10  ;;  %v11602_v0 = vld [vmem:[#allocation50_spill] sm:$0xff] }
 0x291   : > { %4931 = vmatpush1.msra.mxu1 %v11594_v11  ;;  %4161 = vmatprep.mubr.bf16.mxu1 %v8930_v45  ;;  %v9470_v6 = vpop.f32.mrf.mxu0  ;;  %v11603_v29 = vmax.f32 %v11602_v0, 0.0  ;;  %v11607_v45 = vld [vmem:[#allocation53_spill] sm:$0xff]  ;;  %v11613_v0 = vld [vmem:[#allocation31_spill] sm:$0xff] }
 0x292   : > { %4932 = vmatprep.subr.mxu1 %v11597_v62  ;;  %v11608_v11 = vmax.f32 %v11607_v45, 0.0  ;;  %v11609_v62 = vld [vmem:[#allocation30_spill] sm:$0xff]  ;;  %v11617_v45 = vld [vmem:[#allocation36_spill] sm:$0xff] }
 0x293   : > { %4933 = vmatpush1.msra.mxu1 %v11599_v37  ;;  %v9476_v48 = vpop.f32.mrf.mxu0  ;;  %v11610_v3 = vmax.f32 %v11609_v62, 0.0  ;;  %v11611_v37 = vld [vmem:[#allocation43_spill] sm:$0xff] }
 0x294   : > { %4934 = vmatprep.subr.mxu1 %v11601_v7  ;;  %11604 = vst [vmem:[#allocation41_spill] sm:$0xff] %v9476_v48  ;;  %v11612_v32 = vmax.f32 %v11611_v37, 0.0  ;;  %v11686_v48 = vld [vmem:[#allocation141_spill] sm:$0xff] }
 0x295   : > { %4935 = vmatpush1.msra.mxu1 %v11603_v29  ;;  %v9482_v41 = vpop.f32.mrf.mxu0  ;;  %4069 = vmatmul.mubr.bf16.gmra.mxu0 %v8936_v59  ;;  %v11614_v29 = vmax.f32 %v11613_v0, 0.0 }
 0x296   : > { %4936 = vmatprep.subr.mxu1 %v11606_v43  ;;  %4078 = vmatprep.mubr.bf16.mxu0 %v8951_v2  ;;  %v11616_v43 = vmax.f32 %v11615_v23, 0.0  ;;  %v11621_v2 = vld [vmem:[#allocation28_spill] sm:$0xff]  ;;  %v11626_v23 = vmax.f32 %v9003_v31, 0.0  ;;  %v11630_v31 = vmax.f32 %v8939_v20, 0.0  ;;  %v11634_v20 = vmax.f32 %v8874_v63, 0.0 }
 0x297   : > { %4937 = vmatpush1.msra.mxu1 %v11608_v11  ;;  %v9491_v7 = vpop.f32.mrf.mxu0  ;;  %v11618_v11 = vmax.f32 %v11617_v45, 0.0  ;;  %v11622_v37 = vmax.f32 %v11621_v2, 0.0  ;;  %v11627_v45 = vmax.f32 %v8970_v30, 0.0  ;;  %v11641_v2 = vld [vmem:[#allocation110_spill] sm:$0xff] }
 0x298   : > { %4938 = vmatprep.subr.mxu1 %v11610_v3  ;;  %4162 = vmatmul.mubr.bf16.gmra.mxu1 %v8945_v54  ;;  %v11619_v54 = vld [vmem:[#allocation29_spill] sm:$0xff] }
 0x299   : > { %4939 = vmatpush1.msra.mxu1 %v11612_v32  ;;  %4171 = vmatprep.mubr.bf16.mxu1 %v8994_v1  ;;  %v9498_v59 = vpop.f32.mrf.mxu0  ;;  %v11620_v62 = vmax.f32 %v11619_v54, 0.0  ;;  %v11623_v1 = vld [vmem:[#allocation38_spill] sm:$0xff] }
 0x29a   : > { %4940 = vmatprep.subr.mxu1 %v11614_v29  ;;  %v11624_v32 = vmax.f32 %v11623_v1, 0.0  ;;  %v11625_v29 = vmax.f32 %v8954_v5, 0.0  ;;  %v11629_v5 = vmax.f32 %v8877_v40, 0.0 }
 0x29b   : > { %4941 = vmatpush1.msra.mxu1 %v11616_v43  ;;  %v9504_v3 = vpop.f32.mrf.mxu0 }
 0x29c   : > { %4942 = vmatprep.subr.mxu1 %v11618_v11  ;;  %v11628_v11 = vmax.f32 %v9024_v55, 0.0  ;;  %v11633_v55 = vmax.f32 %v8818_v25, 0.0 }
 0x29d   : > { %4943 = vmatpush1.msra.mxu1 %v11620_v62  ;;  %v9510_v0 = vpop.f32.mrf.mxu0  ;;  %4079 = vmatmul.mubr.bf16.gmra.mxu0 %v9000_v47  ;;  %v11639_v62 = vld [vmem:[#allocation113_spill] sm:$0xff] }
 0x29e   : > { %4944 = vmatprep.subr.mxu1 %v11622_v37  ;;  %4088 = vmatprep.mubr.bf16.mxu0 %v9021_v21  ;;  %v11631_v21 = vmax.f32 %v8898_v9, 0.0  ;;  %v11635_v9 = vmax.f32 %v8836_v14, 0.0  ;;  %v11643_v37 = vld [vmem:[#allocation116_spill] sm:$0xff] }
 0x29f   : > { %4945 = vmatpush1.msra.mxu1 %v11624_v32  ;;  %v9519_v43 = vpop.f32.mrf.mxu0  ;;  %v11644_v1 = vmax.f32 %v11643_v37, 0.0 }
 0x2a0   : > { %4946 = vmatprep.subr.mxu1 %v11625_v29  ;;  %4172 = vmatmul.mubr.bf16.gmra.mxu1 %v9009_v58  ;;  %v11647_v29 = vld [vmem:[#allocation37_spill] sm:$0xff] }
 0x2a1   : > { %4947 = vmatpush2.msra.mxu1 %v11626_v23  ;;  %4181 = vmatprep.mubr.bf16.mxu1 %v9046_v39  ;;  %v9526_v47 = vpop.f32.mrf.mxu0  ;;  %v11632_v39 = vmax.f32 %v8963_v53, 0.0  ;;  %v11636_v53 = vmax.f32 %v8857_v46, 0.0  ;;  %v11645_v46 = vld [vmem:[#allocation98_spill] sm:$0xff] }
 0x2a2   : > { %4948 = vmatprep.subr.mxu1 %v11627_v45  ;;  %v11646_v32 = vmax.f32 %v11645_v46, 0.0  ;;  %v11648_v23 = vld [vmem:[#allocation106_spill] sm:$0xff] }
 0x2a3   : > { %4949 = vmatpush2.msra.mxu1 %v11628_v11  ;;  %v9532_v58 = vpop.f32.mrf.mxu0  ;;  %v11649_v45 = vmax.f32 %v11648_v23, 0.0 }
 0x2a4   : > { %4950 = vmatprep.subr.mxu1 %v11629_v5  ;;  %v11650_v5 = vld [vmem:[#allocation103_spill] sm:$0xff] }
 0x2a5   : > { %4951 = vmatpush2.msra.mxu1 %v11630_v31  ;;  %v9538_v30 = vpop.f32.mrf.mxu0  ;;  %4089 = vmatmul.mubr.bf16.gmra.mxu0 %v9052_v28  ;;  %v11637_v28 = vld [vmem:[#allocation107_spill] sm:$0xff]  ;;  %v11651_v31 = vmax.f32 %v11650_v5, 0.0 }
 0x2a6   : > { %4952 = vmatprep.subr.mxu1 %v11631_v21  ;;  %v11638_v25 = vmax.f32 %v11637_v28, 0.0  ;;  %v11652_v21 = vld [vmem:[#allocation105_spill] sm:$0xff]  ;;  %v11667_v5 = vld [vmem:[#allocation35_spill] sm:$0xff] }
 0x2a7   : > { %4953 = vmatpush2.msra.mxu1 %v11632_v39  ;;  %v9547_v40 = vpop.f32.mrf.mxu0  ;;  %v11653_v39 = vmax.f32 %v11652_v21, 0.0  ;;  %v11668_v21 = vld [vmem:[#allocation90_spill] sm:$0xff] }
 0x2a8   : > { %4954 = vmatprep.subr.mxu1 %v11633_v55  ;;  %4182 = vmatmul.mubr.bf16.gmra.mxu1 %v9058_v19  ;;  %v11640_v19 = vmax.f32 %v11639_v62, 0.0  ;;  %v11658_v62 = vld [vmem:[#allocation96_spill] sm:$0xff] }
 0x2a9   : > { %4955 = vmatpush2.msra.mxu1 %v11634_v20  ;;  %4191 = vmatprep.mubr.bf16.mxu1 %v9084_v36  ;;  %v9553_v54 = vpop.f32.mrf.mxu0  ;;  %v11642_v36 = vmax.f32 %v11641_v2, 0.0  ;;  %v11654_v20 = vld [vmem:[#allocation94_spill] sm:$0xff]  ;;  %v11660_v2 = vld [vmem:[#allocation101_spill] sm:$0xff] }
 0x2aa   : > { %4956 = vmatprep.subr.mxu1 %v11635_v9  ;;  %v11655_v9 = vmax.f32 %v11654_v20, 0.0  ;;  %v11670_v20 = vld [vmem:[#allocation34_spill] sm:$0xff] }
 0x2ab   : > { %4957 = vmatpush2.msra.mxu1 %v11636_v53  ;;  %v9559_v63 = vpop.f32.mrf.mxu0  ;;  %v11656_v53 = vld [vmem:[#allocation97_spill] sm:$0xff] }
 0x2ac   : > { %4958 = vmatprep.subr.mxu1 %v11638_v25  ;;  %v11657_v28 = vmax.f32 %v11656_v53, 0.0 }
 0x2ad   : > { %4959 = vmatpush2.msra.mxu1 %v11640_v19  ;;  %v9565_v14 = vpop.f32.mrf.mxu0  ;;  %v2728_v19 = vld [vmem:[%s11021_s4] sm:$0x3] }
 0x2ae   : > { %4960 = vmatprep.subr.mxu1 %v11642_v36  ;;  %v11661_v36 = vmax.f32 %v11660_v2, 0.0 }
 0x2af   : > { %4961 = vmatpush2.msra.mxu1 %v11644_v1  ;;  %v9573_v11 = vpop.f32.mrf.mxu0  ;;  %v11662_v1 = vld [vmem:[#allocation87_spill] sm:$0xff] }
 0x2b0   : > { %4962 = vmatprep.subr.mxu1 %v11646_v32  ;;  %4192 = vmatmul.mubr.bf16.gmra.mxu1 %v11647_v29  ;;  %v11663_v46 = vmax.f32 %v11662_v1, 0.0  ;;  %v11664_v32 = vld [vmem:[#allocation45_spill] sm:$0xff] }
 0x2b1   : > { %4963 = vmatpush2.msra.mxu1 %v11649_v45  ;;  %4201 = vmatprep.mubr.bf16.mxu1 %v9116_v56  ;;  %v9579_v55 = vpop.f32.mrf.mxu0  ;;  %v11659_v56 = vmax.f32 %v11658_v62, 0.0  ;;  %v11665_v29 = vld [vmem:[#allocation93_spill] sm:$0xff] }
 0x2b2   : > { %4964 = vmatprep.subr.mxu1 %v11651_v31  ;;  %v11666_v23 = vmax.f32 %v11665_v29, 0.0  ;;  %v9605_v31 = vrot.slane %v2728_v19, %v11667_v5 }
 0x2b3   : > { %4965 = vmatpush2.msra.mxu1 %v11653_v39  ;;  %v9585_v25 = vpop.f32.mrf.mxu0  ;;  %v11669_v39 = vmax.f32 %v11668_v21, 0.0 }
 0x2b4   : > { %4966 = vmatprep.subr.mxu1 %v11655_v9  ;;  %v11671_v9 = vmax.f32 %v11670_v20, 0.0 }
 0x2b5   : > { %4967 = vmatpush2.msra.mxu1 %v11657_v28  ;;  %v9594_v37 = vpop.f32.mrf.mxu0  ;;  %v11672_v28 = vld [vmem:[#allocation33_spill] sm:$0xff] }
 0x2b6   : > { %4968 = vmatprep.subr.mxu1 %v11659_v56  ;;  %v9614_v62 = vrot.slane %v2728_v19, %v11672_v28  ;;  %v11673_v56 = vld [vmem:[#allocation81_spill] sm:$0xff] }
 0x2b7   : > { %4969 = vmatpush2.msra.mxu1 %v11661_v36  ;;  %v9602_v45 = vpop.f32.mrf.mxu0  ;;  %v11674_v2 = vmax.f32 %v11673_v56, 0.0  ;;  %v11681_v56 = vld [vmem:[#allocation58_spill] sm:$0xff] }
 0x2b8   : > { %4970 = vmatprep.subr.mxu1 %v11663_v46  ;;  %4202 = vmatmul.mubr.bf16.gmra.mxu1 %v11664_v32  ;;  %v3095_v46 = vadd.f32 %v9358_v33, %v9605_v31  ;;  %v11677_v32 = vld [vmem:[#allocation84_spill] sm:$0xff]  ;;  %v3097_v20 = vadd.f32 %v9366_v4, %v9614_v62  ;;  %v3101_v4 = vadd.f32 %v9385_v26, %v9614_v62 }
 0x2b9   : > { %4971 = vmatpush2.msra.mxu1 %v11666_v23  ;;  %4211 = vmatprep.mubr.bf16.mxu1 %v9148_v16  ;;  %v9611_v53 = vpop.f32.mrf.mxu0  ;;  %v11675_v16 = vld [vmem:[#allocation86_spill] sm:$0xff]  ;;  %v11678_v29 = vmax.f32 %v11677_v32, 0.0  ;;  %v11679_v23 = vld [vmem:[#allocation47_spill] sm:$0xff]  ;;  %v11683_v26 = vld [vmem:[#allocation64_spill] sm:$0xff] }
 0x2ba   : > { %4972 = vmatprep.subr.mxu1 %v11669_v39  ;;  %v11676_v36 = vmax.f32 %v11675_v16, 0.0  ;;  %v11680_v21 = vmax.f32 %v11679_v23, 0.0  ;;  %v3099_v16 = vadd.f32 %v9371_v34, %v9605_v31 }
 0x2bb   : > { %4973 = vmatpush2.msra.mxu1 %v11671_v9  ;;  %v9620_v1 = vpop.f32.mrf.mxu0 }
 0x2bc   : > { %4974 = vmatprep.subr.mxu1 %v11674_v2 }
 0x2bd   : > { %4975 = vmatpush2.msra.mxu1 %v11676_v36  ;;  %v9628_v39 = vpop.f32.mrf.mxu0  ;;  %v3287_v19 = vpop.f32.mrf.mxu1 }
 0x2be   : > { %4976 = vmatprep.subr.mxu1 %v11678_v29  ;;  %v9632_v9 = vadd.f32 %v3287_v19, %v3095_v46 }
 0x2bf   : > { %4977 = vmatpush2.msra.mxu1 %v11680_v21  ;;  %v9636_v2 = vpop.f32.mrf.mxu0  ;;  %v3289_v33 = vpop.f32.mrf.mxu1  ;;  %v3105_v21 = vadd.f32 %v9388_v50, %v9605_v31  ;;  %v3109_v50 = vadd.f32 %v9396_v12, %v9605_v31 }
 0x2c0   : > { %4212 = vmatmul.mubr.bf16.gmra.mxu1 %v9154_v57  ;;  %v9640_v36 = vadd.f32 %v3289_v33, %v3097_v20  ;;  %v3107_v20 = vadd.f32 %v9394_v22, %v9614_v62  ;;  %v3111_v22 = vadd.f32 %v9398_v44, %v9614_v62  ;;  %6600 = vtanh.f32 %v9632_v9 }
 0x2c1   : > { %4221 = vmatprep.mubr.bf16.mxu1 %v11681_v56  ;;  %v9642_v32 = vpop.f32.mrf.mxu0  ;;  %v3291_v29 = vpop.f32.mrf.mxu1 }
 0x2c2   : > { %v9646_v46 = vadd.f32 %v3291_v29, %v3099_v16  ;;  %6602 = vtanh.f32 %v9640_v36 }
 0x2c3   : > { %v9648_v23 = vpop.f32.mrf.mxu0  ;;  %v3293_v57 = vpop.f32.mrf.mxu1 }
 0x2c4   : > { %v9652_v19 = vadd.f32 %v3293_v57, %v3101_v4  ;;  %6604 = vtanh.f32 %v9646_v46 }
 0x2c5   : > { %v9654_v56 = vpop.f32.mrf.mxu0 }
 0x2c6   : > { %v3297_v34 = vpop.f32.mrf.mxu1  ;;  %6606 = vtanh.f32 %v9652_v19 }
 0x2c7   : > { %v9658_v33 = vadd.f32 %v3297_v34, %v3105_v21  ;;  %v9662_v16 = vpop.f32.mrf.mxu0 }
 0x2c8   : > { %4222 = vmatmul.mubr.bf16.gmra.mxu1 %v11682_v49  ;;  %v3299_v29 = vpop.f32.mrf.mxu1 }
 0x2c9   : > { %4231 = vmatprep.mubr.bf16.mxu1 %v11683_v26  ;;  %v9666_v4 = vadd.f32 %v3299_v29, %v3107_v20  ;;  %v9668_v57 = vpop.f32.mrf.mxu0  ;;  %v3115_v26 = vadd.f32 %v9400_v61, %v9605_v31  ;;  %v3117_v20 = vadd.f32 %v9410_v38, %v9614_v62  ;;  %v3119_v61 = vadd.f32 %v9416_v60, %v9605_v31 }
 0x2ca   : > { %v3301_v24 = vpop.f32.mrf.mxu1  ;;  %v3121_v38 = vadd.f32 %v9422_v42, %v9614_v62  ;;  %v11693_v42 = vld [vmem:[#allocation76_spill] sm:$0xff]  ;;  %6608 = vtanh.f32 %v9658_v33 }
 0x2cb   : > { %v9672_v21 = vadd.f32 %v3301_v24, %v3109_v50  ;;  %v9674_v34 = vpop.f32.mrf.mxu0  ;;  %v11687_v24 = vld [vmem:[#allocation70_spill] sm:$0xff]  ;;  %6610 = vtanh.f32 %v9666_v4 }
 0x2cc   : > { %v3303_v49 = vpop.f32.mrf.mxu1 }
 0x2cd   : > { %v9678_v28 = vadd.f32 %v3303_v49, %v3111_v22  ;;  %v9680_v5 = vpop.f32.mrf.mxu0  ;;  %6612 = vtanh.f32 %v9672_v21 }
 0x2cf   : > { %11684 = vst [vmem:[#allocation79_spill] sm:$0xff] %v9678_v28  ;;  %v3307_v12 = vpop.f32.mrf.mxu1  ;;  %v9688_v44 = vpop.f32.mrf.mxu0 }
 0x2d0   : > { %v9684_v29 = vadd.f32 %v3307_v12, %v3115_v26  ;;  %4232 = vmatmul.mubr.bf16.gmra.mxu1 %v11686_v48 }
 0x2d1   : > { %4241 = vmatprep.mubr.bf16.mxu1 %v11687_v24  ;;  %v3309_v50 = vpop.f32.mrf.mxu1  ;;  %v9694_v49 = vpop.f32.mrf.mxu0  ;;  %v3125_v24 = vadd.f32 %v9428_v52, %v9605_v31  ;;  %v3129_v52 = vadd.f32 %v9442_v8, %v9605_v31 }
 0x2d2   : > { %11685 = vst [vmem:[#allocation40_spill] sm:$0xff] %v9684_v29  ;;  %v9692_v22 = vadd.f32 %v3309_v50, %v3117_v20  ;;  %v3127_v20 = vadd.f32 %v9436_v35, %v9614_v62  ;;  %v3131_v35 = vadd.f32 %v9448_v15, %v9614_v62 }
 0x2d3   : > { %v3311_v10 = vpop.f32.mrf.mxu1  ;;  %v9700_v12 = vpop.f32.mrf.mxu0 }
 0x2d4   : > { %11688 = vst [vmem:[#allocation69_spill] sm:$0xff] %v9692_v22  ;;  %v9698_v26 = vadd.f32 %v3311_v10, %v3119_v61  ;;  %v11692_v22 = vld [vmem:[#allocation145_spill] sm:$0xff] }
 0x2d5   : > { %v3313_v48 = vpop.f32.mrf.mxu1  ;;  %v9706_v28 = vpop.f32.mrf.mxu0 }
 0x2d6   : > { %11689 = vst [vmem:[#allocation74_spill] sm:$0xff] %v9698_v26  ;;  %v9704_v29 = vadd.f32 %v3313_v48, %v3121_v38  ;;  %v11736_v19 = vld [vmem:[#allocation79_spill] sm:$0xff] }
 0x2d7   : > { %v3317_v60 = vpop.f32.mrf.mxu1  ;;  %v9714_v10 = vpop.f32.mrf.mxu0  ;;  %6614 = vtanh.f32 %v11736_v19 }
 0x2d8   : > { %11690 = vst [vmem:[#allocation72_spill] sm:$0xff] %v9704_v29  ;;  %v9710_v50 = vadd.f32 %v3317_v60, %v3125_v24  ;;  %4242 = vmatmul.mubr.bf16.gmra.mxu1 %v11692_v22 }
 0x2d9   : > { %4251 = vmatprep.mubr.bf16.mxu1 %v11693_v42  ;;  %v3319_v61 = vpop.f32.mrf.mxu1  ;;  %v9720_v48 = vpop.f32.mrf.mxu0  ;;  %v3135_v42 = vadd.f32 %v9454_v27, %v9605_v31 }
 0x2da   : > { %11691 = vst [vmem:[#allocation77_spill] sm:$0xff] %v9710_v50  ;;  %v9718_v38 = vadd.f32 %v3319_v61, %v3127_v20  ;;  %v11698_v61 = vld [vmem:[#allocation149_spill] sm:$0xff] }
 0x2db   : > { %v3321_v29 = vpop.f32.mrf.mxu1  ;;  %v9726_v60 = vpop.f32.mrf.mxu0  ;;  %v11739_v4 = vld [vmem:[#allocation69_spill] sm:$0xff] }
 0x2dc   : > { %11694 = vst [vmem:[#allocation63_spill] sm:$0xff] %v9718_v38  ;;  %v9724_v24 = vadd.f32 %v3321_v29, %v3129_v52  ;;  %v11699_v38 = vld [vmem:[#allocation82_spill] sm:$0xff]  ;;  %v3139_v52 = vadd.f32 %v9470_v6, %v9605_v31  ;;  %v11704_v6 = vld [vmem:[#allocation153_spill] sm:$0xff] }
 0x2dd   : > { %v3323_v22 = vpop.f32.mrf.mxu1  ;;  %v9732_v26 = vpop.f32.mrf.mxu0 }
 0x2de   : > { %11695 = vst [vmem:[#allocation68_spill] sm:$0xff] %v9724_v24  ;;  %v9730_v50 = vadd.f32 %v3323_v22, %v3131_v35 }
 0x2df   : > { %v9738_v15 = vpop.f32.mrf.mxu0 }
 0x2e0   : > { %11696 = vst [vmem:[#allocation66_spill] sm:$0xff] %v9730_v50  ;;  %v3327_v8 = vpop.f32.mrf.mxu1  ;;  %4252 = vmatmul.mubr.bf16.gmra.mxu1 %v11698_v61 }
 0x2e1   : > { %v9734_v20 = vadd.f32 %v3327_v8, %v3135_v42  ;;  %4261 = vmatprep.mubr.bf16.mxu1 %v11699_v38  ;;  %v9744_v24 = vpop.f32.mrf.mxu0  ;;  %v3145_v8 = vadd.f32 %v9482_v41, %v9605_v31 }
 0x2e2   : > { %v9740_v29 = vpop.f32.mrf.mxu1 }
 0x2e3   : > { %11697 = vst [vmem:[#allocation71_spill] sm:$0xff] %v9734_v20  ;;  %v9748_v22 = vpop.f32.mrf.mxu0  ;;  %v3147_v20 = vadd.f32 %v9491_v7, %v9614_v62  ;;  %v3151_v7 = vadd.f32 %v9504_v3, %v9614_v62 }
 0x2e4   : > { %v3331_v27 = vpop.f32.mrf.mxu1  ;;  %11701 = vst [vmem:[#allocation62_spill] sm:$0xff] %v9748_v22 }
 0x2e5   : > { %v9746_v35 = vadd.f32 %v3331_v27, %v3139_v52  ;;  %v9754_v38 = vpop.f32.mrf.mxu0 }
 0x2e6   : > { %v9750_v42 = vpop.f32.mrf.mxu1  ;;  %11702 = vst [vmem:[#allocation60_spill] sm:$0xff] %v9754_v38 }
 0x2e7   : > { %11700 = vst [vmem:[#allocation57_spill] sm:$0xff] %v9746_v35  ;;  %v9762_v52 = vpop.f32.mrf.mxu0  ;;  %v3149_v35 = vadd.f32 %v9498_v59, %v9605_v31 }
 0x2e8   : > { %v3337_v61 = vpop.f32.mrf.mxu1  ;;  %4262 = vmatmul.mubr.bf16.gmra.mxu1 %v11704_v6  ;;  %11705 = vst [vmem:[#allocation51_spill] sm:$0xff] %v9762_v52 }
 0x2e9   : > { %v9758_v50 = vadd.f32 %v3337_v61, %v3145_v8  ;;  %4271 = vmatprep.mubr.bf16.mxu1 %v9342_v18  ;;  %v9768_v41 = vpop.f32.mrf.mxu0  ;;  %v3155_v18 = vadd.f32 %v9510_v0, %v9605_v31  ;;  %v3159_v0 = vadd.f32 %v9526_v47, %v9605_v31 }
 0x2ea   : > { %v3339_v27 = vpop.f32.mrf.mxu1 }
 0x2eb   : > { %11703 = vst [vmem:[#allocation65_spill] sm:$0xff] %v9758_v50  ;;  %v9766_v22 = vadd.f32 %v3339_v27, %v3147_v20  ;;  %v9774_v61 = vpop.f32.mrf.mxu0  ;;  %v3157_v20 = vadd.f32 %v9519_v43, %v9614_v62  ;;  %v3161_v43 = vadd.f32 %v9532_v58, %v9614_v62 }
 0x2ec   : > { %v3341_v38 = vpop.f32.mrf.mxu1 }
 0x2ed   : > { %v9772_v8 = vadd.f32 %v3341_v38, %v3149_v35  ;;  %v9780_v59 = vpop.f32.mrf.mxu0 }
 0x2ee   : > { %v3343_v6 = vpop.f32.mrf.mxu1  ;;  %11706 = vst [vmem:[#allocation56_spill] sm:$0xff] %v9780_v59 }
 0x2ef   : > { %v9778_v52 = vadd.f32 %v3343_v6, %v3151_v7  ;;  %v9788_v35 = vpop.f32.mrf.mxu0 }
 0x2f0   : > { %v3347_v50 = vpop.f32.mrf.mxu1  ;;  %4272 = vmatmul.mubr.bf16.gmra.mxu1 %v9348_v51  ;;  %11707 = vst [vmem:[#allocation54_spill] sm:$0xff] %v9788_v35 }
 0x2f1   : > { %v9784_v27 = vadd.f32 %v3347_v50, %v3155_v18  ;;  %4281 = vmatprep.mubr.bf16.mxu1 %v9377_v13  ;;  %v9794_v6 = vpop.f32.mrf.mxu0  ;;  %v3165_v13 = vadd.f32 %v9538_v30, %v9605_v31 }
 0x2f2   : > { %v3349_v3 = vpop.f32.mrf.mxu1 }
 0x2f3   : > { %v9792_v38 = vadd.f32 %v3349_v3, %v3157_v20  ;;  %v9800_v51 = vpop.f32.mrf.mxu0  ;;  %v3167_v20 = vadd.f32 %v9547_v40, %v9614_v62 }
 0x2f4   : > { %v3351_v7 = vpop.f32.mrf.mxu1  ;;  %11708 = vst [vmem:[#allocation59_spill] sm:$0xff] %v9800_v51 }
 0x2f5   : > { %v9798_v50 = vadd.f32 %v3351_v7, %v3159_v0  ;;  %v9806_v47 = vpop.f32.mrf.mxu0  ;;  %v3169_v7 = vadd.f32 %v9553_v54, %v9605_v31 }
 0x2f6   : > { %v3353_v18 = vpop.f32.mrf.mxu1  ;;  %11709 = vst [vmem:[#allocation44_spill] sm:$0xff] %v9806_v47 }
 0x2f7   : > { %v9804_v35 = vadd.f32 %v3353_v18, %v3161_v43  ;;  %v9813_v0 = vpop.f32.mrf.mxu0  ;;  %v3171_v18 = vadd.f32 %v9559_v63, %v9614_v62 }
 0x2f8   : > { %v3357_v59 = vpop.f32.mrf.mxu1  ;;  %4282 = vmatmul.mubr.bf16.gmra.mxu1 %v9383_v17  ;;  %11710 = vst [vmem:[#allocation50_spill] sm:$0xff] %v9813_v0  ;;  %v3175_v17 = vadd.f32 %v9565_v14, %v9605_v31 }
 0x2f9   : > { %v9810_v3 = vadd.f32 %v3357_v59, %v3165_v13  ;;  %v9819_v43 = vpop.f32.mrf.mxu0 }
 0x2fa   : > { %v3359_v58 = vpop.f32.mrf.mxu1  ;;  %11711 = vst [vmem:[#allocation48_spill] sm:$0xff] %v9819_v43 }
 0x2fb   : > { %v9817_v51 = vadd.f32 %v3359_v58, %v3167_v20  ;;  %v9825_v59 = vpop.f32.mrf.mxu0  ;;  %v3177_v20 = vadd.f32 %v9573_v11, %v9614_v62 }
 0x2fc   : > { %v3361_v30 = vpop.f32.mrf.mxu1  ;;  %11712 = vst [vmem:[#allocation53_spill] sm:$0xff] %v9825_v59 }
 0x2fd   : > { %v9823_v47 = vadd.f32 %v3361_v30, %v3169_v7  ;;  %v9831_v54 = vpop.f32.mrf.mxu0  ;;  %v3179_v7 = vadd.f32 %v9579_v55, %v9605_v31 }
 0x2fe   : > { %v3363_v40 = vpop.f32.mrf.mxu1  ;;  %11713 = vst [vmem:[#allocation30_spill] sm:$0xff] %v9831_v54 }
 0x2ff   : > { %v9829_v13 = vadd.f32 %v3363_v40, %v3171_v18  ;;  %v9837_v63 = vpop.f32.mrf.mxu0  ;;  %v3181_v18 = vadd.f32 %v9585_v25, %v9614_v62 }
 0x300   : > { %v3367_v0 = vpop.f32.mrf.mxu1  ;;  %11714 = vst [vmem:[#allocation43_spill] sm:$0xff] %v9837_v63 }
 0x301   : > { %v9835_v58 = vadd.f32 %v3367_v0, %v3175_v17  ;;  %v9843_v14 = vpop.f32.mrf.mxu0  ;;  %v3185_v0 = vadd.f32 %v9594_v37, %v9605_v31 }
 0x302   : > { %v3369_v43 = vpop.f32.mrf.mxu1  ;;  %11715 = vst [vmem:[#allocation31_spill] sm:$0xff] %v9843_v14 }
 0x303   : > { %v9841_v30 = vadd.f32 %v3369_v43, %v3177_v20  ;;  %v9849_v11 = vpop.f32.mrf.mxu0  ;;  %v3187_v43 = vadd.f32 %v9602_v45, %v9614_v62 }
 0x304   : > { %v3371_v59 = vpop.f32.mrf.mxu1  ;;  %11716 = vst [vmem:[#allocation46_spill] sm:$0xff] %v9849_v11 }
 0x305   : > { %v9847_v40 = vadd.f32 %v3371_v59, %v3179_v7  ;;  %v9855_v55 = vpop.f32.mrf.mxu0  ;;  %v3189_v59 = vadd.f32 %v9611_v53, %v9605_v31 }
 0x306   : > { %v3373_v54 = vpop.f32.mrf.mxu1  ;;  %11717 = vst [vmem:[#allocation36_spill] sm:$0xff] %v9855_v55 }
 0x307   : > { %v9853_v17 = vadd.f32 %v3373_v54, %v3181_v18  ;;  %v9861_v25 = vpop.f32.mrf.mxu0  ;;  %v3191_v54 = vadd.f32 %v9620_v1, %v9614_v62 }
 0x308   : > { %v3377_v63 = vpop.f32.mrf.mxu1  ;;  %11718 = vst [vmem:[#allocation29_spill] sm:$0xff] %v9861_v25 }
 0x309   : > { %v9859_v20 = vadd.f32 %v3377_v63, %v3185_v0  ;;  %v9867_v37 = vpop.f32.mrf.mxu0  ;;  %v3195_v63 = vadd.f32 %v9628_v39, %v9605_v31 }
 0x30a   : > { %v3379_v14 = vpop.f32.mrf.mxu1  ;;  %11719 = vst [vmem:[#allocation28_spill] sm:$0xff] %v9867_v37 }
 0x30b   : > { %v9865_v7 = vadd.f32 %v3379_v14, %v3187_v43  ;;  %v9873_v45 = vpop.f32.mrf.mxu0  ;;  %v3197_v14 = vadd.f32 %v9636_v2, %v9614_v62 }
 0x30c   : > { %v3381_v11 = vpop.f32.mrf.mxu1  ;;  %11720 = vst [vmem:[#allocation38_spill] sm:$0xff] %v9873_v45 }
 0x30d   : > { %v9871_v18 = vadd.f32 %v3381_v11, %v3189_v59  ;;  %v9879_v53 = vpop.f32.mrf.mxu0  ;;  %v3199_v11 = vadd.f32 %v9642_v32, %v9605_v31 }
 0x30e   : > { %v3383_v55 = vpop.f32.mrf.mxu1  ;;  %11721 = vst [vmem:[#allocation107_spill] sm:$0xff] %v9879_v53 }
 0x30f   : > { %v9877_v0 = vadd.f32 %v3383_v55, %v3191_v54  ;;  %v9885_v1 = vpop.f32.mrf.mxu0  ;;  %v3201_v55 = vadd.f32 %v9648_v23, %v9614_v62 }
 0x310   : > { %v3387_v25 = vpop.f32.mrf.mxu1  ;;  %11722 = vst [vmem:[#allocation113_spill] sm:$0xff] %v9885_v1 }
 0x311   : > { %v9883_v43 = vadd.f32 %v3387_v25, %v3195_v63  ;;  %v9891_v39 = vpop.f32.mrf.mxu0  ;;  %v3205_v25 = vadd.f32 %v9654_v56, %v9605_v31 }
 0x312   : > { %v3389_v37 = vpop.f32.mrf.mxu1  ;;  %11723 = vst [vmem:[#allocation110_spill] sm:$0xff] %v9891_v39 }
 0x313   : > { %v9889_v59 = vadd.f32 %v3389_v37, %v3197_v14  ;;  %v9897_v2 = vpop.f32.mrf.mxu0  ;;  %v3207_v37 = vadd.f32 %v9662_v16, %v9614_v62 }
 0x314   : > { %v3391_v45 = vpop.f32.mrf.mxu1  ;;  %11724 = vst [vmem:[#allocation116_spill] sm:$0xff] %v9897_v2 }
 0x315   : > { %v9895_v54 = vadd.f32 %v3391_v45, %v3199_v11  ;;  %v9903_v32 = vpop.f32.mrf.mxu0  ;;  %v3209_v45 = vadd.f32 %v9668_v57, %v9605_v31 }
 0x316   : > { %v3393_v53 = vpop.f32.mrf.mxu1  ;;  %11725 = vst [vmem:[#allocation98_spill] sm:$0xff] %v9903_v32 }
 0x317   : > { %v9901_v63 = vadd.f32 %v3393_v53, %v3201_v55  ;;  %v9909_v23 = vpop.f32.mrf.mxu0  ;;  %v3211_v53 = vadd.f32 %v9674_v34, %v9614_v62  ;;  %v3219_v34 = vadd.f32 %v9694_v49, %v9605_v31  ;;  %v3225_v49 = vadd.f32 %v9706_v28, %v9605_v31 }
 0x318   : > { %v3397_v1 = vpop.f32.mrf.mxu1  ;;  %11726 = vst [vmem:[#allocation37_spill] sm:$0xff] %v9909_v23  ;;  %v3229_v28 = vadd.f32 %v9720_v48, %v9605_v31  ;;  %v3235_v48 = vadd.f32 %v9732_v26, %v9605_v31  ;;  %v11746_v26 = vld [vmem:[#allocation41_spill] sm:$0xff] }
 0x319   : > { %v9907_v14 = vadd.f32 %v3397_v1, %v3205_v25  ;;  %v9915_v56 = vpop.f32.mrf.mxu0  ;;  %v3215_v1 = vadd.f32 %v9680_v5, %v9605_v31  ;;  %v3221_v5 = vadd.f32 %v9700_v12, %v9614_v62  ;;  %v3227_v12 = vadd.f32 %v9714_v10, %v9614_v62 }
 0x31a   : > { %v3399_v39 = vpop.f32.mrf.mxu1  ;;  %v3231_v10 = vadd.f32 %v9726_v60, %v9614_v62 }
 0x31b   : > { %v9913_v11 = vadd.f32 %v3399_v39, %v3207_v37  ;;  %v9921_v16 = vpop.f32.mrf.mxu0  ;;  %v3217_v39 = vadd.f32 %v9688_v44, %v9614_v62 }
 0x31c   : > { %v3401_v2 = vpop.f32.mrf.mxu1 }
 0x31d   : > { %11727 = vst [vmem:[#allocation106_spill] sm:$0xff] %v9913_v11  ;;  %v9919_v55 = vadd.f32 %v3401_v2, %v3209_v45  ;;  %v9927_v57 = vpop.f32.mrf.mxu0 }
 0x31e   : > { %v3403_v32 = vpop.f32.mrf.mxu1 }
 0x31f   : > { %11728 = vst [vmem:[#allocation103_spill] sm:$0xff] %v9919_v55  ;;  %v9925_v25 = vadd.f32 %v3403_v32, %v3211_v53  ;;  %v9937_v45 = vpop.f32.mrf.mxu0 }
 0x320   : > { %v3407_v23 = vpop.f32.mrf.mxu1 }
 0x321   : > { %11729 = vst [vmem:[#allocation105_spill] sm:$0xff] %v9925_v25  ;;  %v9931_v37 = vadd.f32 %v3407_v23, %v3215_v1  ;;  %v9948_v23 = vpop.f32.mrf.mxu0  ;;  %v11737_v1 = vld [vmem:[#allocation40_spill] sm:$0xff] }
 0x322   : > { %v3409_v11 = vpop.f32.mrf.mxu1  ;;  %6616 = vtanh.f32 %v11737_v1  ;;  %v3141_v1 = vadd.f32 %v11746_v26, %v9614_v62 }
 0x323   : > { %11730 = vst [vmem:[#allocation94_spill] sm:$0xff] %v9931_v37  ;;  %v9935_v2 = vadd.f32 %v3409_v11, %v3217_v39  ;;  %v9962_v46 = vpop.f32.mrf.mxu0  ;;  %6618 = vtanh.f32 %v11739_v4 }
 0x324   : > { %v3411_v55 = vpop.f32.mrf.mxu1  ;;  %v3334_v26 = vadd.f32 %v9750_v42, %v3141_v1  ;;  %v11755_v42 = vld [vmem:[#allocation60_spill] sm:$0xff] }
 0x325   : > { %11731 = vst [vmem:[#allocation97_spill] sm:$0xff] %v9935_v2  ;;  %v9942_v32 = vadd.f32 %v3411_v55, %v3219_v34  ;;  %v11740_v34 = vld [vmem:[#allocation74_spill] sm:$0xff]  ;;  %v11754_v2 = vld [vmem:[#allocation57_spill] sm:$0xff]  ;;  %v3245_v1 = vadd.f32 %v11755_v42, %v9605_v31 }
 0x326   : > { %v3413_v44 = vpop.f32.mrf.mxu1  ;;  %6620 = vtanh.f32 %v11740_v34 }
 0x327   : > { %11732 = vst [vmem:[#allocation96_spill] sm:$0xff] %v9942_v32  ;;  %v9950_v11 = vadd.f32 %v3413_v44, %v3221_v5  ;;  %v9976_v5 = vpop.f32.mrf.mxu0 }
 0x328   : > { %v3417_v9 = vpop.f32.mrf.mxu1 }
 0x329   : > { %11733 = vst [vmem:[#allocation101_spill] sm:$0xff] %v9950_v11  ;;  %v9956_v53 = vadd.f32 %v3417_v9, %v3225_v49  ;;  %v11742_v49 = vld [vmem:[#allocation95_spill] sm:$0xff] }
 0x32a   : > { %v3419_v36 = vpop.f32.mrf.mxu1  ;;  %v3137_v9 = vadd.f32 %v11742_v49, %v9614_v62  ;;  %v11748_v49 = vld [vmem:[#allocation68_spill] sm:$0xff] }
 0x32b   : > { %11734 = vst [vmem:[#allocation87_spill] sm:$0xff] %v9956_v53  ;;  %v9964_v55 = vadd.f32 %v3419_v36, %v3227_v12  ;;  %v11743_v12 = vld [vmem:[#allocation72_spill] sm:$0xff]  ;;  %v11744_v36 = vld [vmem:[#allocation77_spill] sm:$0xff] }
 0x32c   : > { %v3421_v33 = vpop.f32.mrf.mxu1  ;;  %6622 = vtanh.f32 %v11743_v12  ;;  %v3330_v4 = vadd.f32 %v9740_v29, %v3137_v9  ;;  %v3239_v12 = vadd.f32 %v9744_v24, %v9605_v31  ;;  %v11751_v9 = vld [vmem:[#allocation71_spill] sm:$0xff] }
 0x32d   : > { %11735 = vst [vmem:[#allocation45_spill] sm:$0xff] %v9964_v55  ;;  %v9970_v39 = vadd.f32 %v3421_v33, %v3229_v28  ;;  %6624 = vtanh.f32 %v11744_v36  ;;  %v3237_v28 = vadd.f32 %v9738_v15, %v9614_v62  ;;  %v9988_v33 = vpop.eup %6600  ;;  %v9999_v15 = vpop.f32.mrf.mxu0  ;;  %v11750_v36 = vld [vmem:[#allocation66_spill] sm:$0xff]  ;;  %v11760_v55 = vld [vmem:[#allocation35_spill] sm:$0xff] }
 0x32e   : > { %v3423_v21 = vpop.f32.mrf.mxu1  ;;  %v9994_v34 = vpop.eup %6602 }
 0x32f   : > { %11738 = vst [vmem:[#allocation93_spill] sm:$0xff] %v9970_v39  ;;  %v9978_v44 = vadd.f32 %v3423_v21, %v3231_v10  ;;  %v11747_v10 = vld [vmem:[#allocation63_spill] sm:$0xff] }
 0x330   : > { %v3427_v60 = vpop.f32.mrf.mxu1  ;;  %6626 = vtanh.f32 %v11747_v10 }
 0x331   : > { %11741 = vst [vmem:[#allocation90_spill] sm:$0xff] %v9978_v44  ;;  %v9986_v19 = vadd.f32 %v3427_v60, %v3235_v48  ;;  %6628 = vtanh.f32 %v11748_v49  ;;  %v10003_v60 = vpop.eup %6604  ;;  %v11752_v49 = vld [vmem:[#allocation62_spill] sm:$0xff]  ;;  %v3251_v44 = vadd.f32 %v9774_v61, %v9614_v62 }
 0x332   : > { %v3429_v21 = vpop.f32.mrf.mxu1  ;;  %6630 = vtanh.f32 %v11750_v36  ;;  %v10007_v29 = vpop.eup %6606  ;;  %v3241_v25 = vadd.f32 %v11752_v49, %v9614_v62  ;;  %v11757_v49 = vld [vmem:[#allocation65_spill] sm:$0xff] }
 0x333   : > { %11745 = vst [vmem:[#allocation34_spill] sm:$0xff] %v9986_v19  ;;  %v10001_v48 = vadd.f32 %v3429_v21, %v3237_v28  ;;  %6632 = vtanh.f32 %v11751_v9  ;;  %v10014_v24 = vpop.eup %6608  ;;  %v10021_v36 = vpop.f32.mrf.mxu0 }
 0x334   : > { %v3431_v10 = vpop.f32.mrf.mxu1  ;;  %6634 = vtanh.f32 %v3330_v4  ;;  %v10016_v21 = vpop.eup %6610 }
 0x335   : > { %11749 = vst [vmem:[#allocation81_spill] sm:$0xff] %v10001_v48  ;;  %v10012_v37 = vadd.f32 %v3431_v10, %v3239_v12  ;;  %6636 = vtanh.f32 %v11754_v2  ;;  %v10025_v9 = vpop.eup %6612  ;;  %v3574_v12 = vld [vmem:[%s11023_s6] sm:$0x3]  ;;  %v11758_v2 = vld [vmem:[#allocation51_spill] sm:$0xff] }
 0x336   : > { %v3433_v28 = vpop.f32.mrf.mxu1  ;;  %6638 = vtanh.f32 %v3334_v26  ;;  %v10030_v10 = vpop.eup %6614  ;;  %v3247_v11 = vadd.f32 %v11758_v2, %v9614_v62  ;;  %v10046_v39 = vrot.slane %v3574_v12, %v11760_v55 }
 0x337   : > { %11753 = vst [vmem:[#allocation86_spill] sm:$0xff] %v10012_v37  ;;  %v10023_v32 = vadd.f32 %v3433_v28, %v3241_v25  ;;  %6640 = vtanh.f32 %v11757_v49  ;;  %v10037_v53 = vpop.eup %6616  ;;  %v3249_v28 = vadd.f32 %v9768_v41, %v9605_v31  ;;  %v10048_v49 = vpop.f32.mrf.mxu0  ;;  %v11762_v31 = vld [vmem:[#allocation33_spill] sm:$0xff] }
 0x338   : > { %v3437_v4 = vpop.f32.mrf.mxu1  ;;  %6642 = vtanh.f32 %v9766_v22  ;;  %v10040_v26 = vpop.eup %6618  ;;  %v10061_v41 = vrot.slane %v3574_v12, %v11762_v31 }
 0x339   : > { %11756 = vst [vmem:[#allocation84_spill] sm:$0xff] %v10023_v32  ;;  %v10035_v42 = vadd.f32 %v3437_v4, %v3245_v1  ;;  %6644 = vtanh.f32 %v9772_v8  ;;  %v10052_v1 = vpop.eup %6620  ;;  %v10073_v62 = vpop.f32.mrf.mxu0  ;;  %v11776_v32 = vld [vmem:[#allocation44_spill] sm:$0xff] }
 0x33a   : > { %v3439_v25 = vpop.f32.mrf.mxu1  ;;  %6646 = vtanh.f32 %v9778_v52  ;;  %v10055_v4 = vpop.eup %6622  ;;  %v11764_v52 = vld [vmem:[#allocation56_spill] sm:$0xff] }
 0x33b   : > { %11759 = vst [vmem:[#allocation47_spill] sm:$0xff] %v10035_v42  ;;  %v10050_v2 = vadd.f32 %v3439_v25, %v3247_v11  ;;  %6648 = vtanh.f32 %v9784_v27  ;;  %v10065_v55 = vpop.eup %6624  ;;  %v3941_v19 = vadd.f32 %v11764_v52, %v10046_v39 }
 0x33c   : > { %v3441_v22 = vpop.f32.mrf.mxu1  ;;  %6650 = vtanh.f32 %v9792_v38  ;;  %v11767_v38 = vld [vmem:[#allocation54_spill] sm:$0xff] }
 0x33d   : > { %11761 = vst [vmem:[#allocation58_spill] sm:$0xff] %v10050_v2  ;;  %v10063_v8 = vadd.f32 %v3441_v22, %v3249_v28  ;;  %v10068_v25 = vpop.eup %6626  ;;  %6652 = vtanh.f32 %v9798_v50  ;;  %v3943_v22 = vadd.f32 %v11767_v38, %v10061_v41 }
 0x33e   : > { %v3443_v11 = vpop.f32.mrf.mxu1  ;;  %v10077_v27 = vpop.eup %6628  ;;  %6654 = vtanh.f32 %v9804_v35 }
 0x33f   : > { %11763 = vst [vmem:[#allocation137_spill] sm:$0xff] %v10063_v8  ;;  %v10075_v61 = vadd.f32 %v3443_v11, %v3251_v44  ;;  %v10080_v28 = vpop.eup %6630  ;;  %6656 = vtanh.f32 %v9810_v3  ;;  %v3945_v11 = vadd.f32 %v9794_v6, %v10046_v39  ;;  %v10093_v35 = vpop.f32.mrf.mxu0 }
 0x340   : > { %v4133_v12 = vpop.f32.mrf.mxu1  ;;  %11766 = vst [vmem:[#allocation141_spill] sm:$0xff] %v10080_v28  ;;  %v10085_v52 = vpop.eup %6632  ;;  %6658 = vtanh.f32 %v9817_v51  ;;  %v11772_v51 = vld [vmem:[#allocation59_spill] sm:$0xff] }
 0x341   : > { %11765 = vst [vmem:[#allocation64_spill] sm:$0xff] %v10075_v61  ;;  %v4134_v48 = vadd.f32 %v4133_v12, %v3941_v19  ;;  %11768 = vst [vmem:[#allocation70_spill] sm:$0xff] %v10085_v52  ;;  %v10088_v44 = vpop.eup %6634  ;;  %6660 = vtanh.f32 %v9823_v47  ;;  %v3947_v12 = vadd.f32 %v11772_v51, %v10061_v41  ;;  %v3951_v51 = vadd.f32 %v11776_v32, %v10046_v39 }
 0x342   : > { %v4135_v50 = vpop.f32.mrf.mxu1  ;;  %11769 = vst [vmem:[#allocation145_spill] sm:$0xff] %v10088_v44  ;;  %v10095_v38 = vpop.eup %6636  ;;  %6662 = vtanh.f32 %v9829_v13 }
 0x343   : > { %v5871_v37 = vmul.f32 -1.442695, %v4134_v48  ;;  %v4136_v61 = vadd.f32 %v4135_v50, %v3943_v22  ;;  %11770 = vst [vmem:[#allocation76_spill] sm:$0xff] %v10095_v38  ;;  %v10098_v19 = vpop.eup %6638  ;;  %v10107_v22 = vpop.f32.mrf.mxu0 }
 0x344   : > { %v4137_v3 = vpop.f32.mrf.mxu1  ;;  %11771 = vst [vmem:[#allocation149_spill] sm:$0xff] %v10098_v19  ;;  %v10102_v6 = vpop.eup %6640 }
 0x345   : > { %6664 = vpow2.f32 %v5871_v37  ;;  %v5872_v8 = vmul.f32 -1.442695, %v4136_v61  ;;  %v4138_v2 = vadd.f32 %v4137_v3, %v3945_v11  ;;  %11773 = vst [vmem:[#allocation82_spill] sm:$0xff] %v10102_v6  ;;  %v10105_v48 = vpop.eup %6642  ;;  %v11779_v3 = vld [vmem:[#allocation50_spill] sm:$0xff] }
 0x346   : > { %6666 = vtanh.f32 %v9835_v58  ;;  %v4139_v47 = vpop.f32.mrf.mxu1  ;;  %11774 = vst [vmem:[#allocation153_spill] sm:$0xff] %v10105_v48  ;;  %v10109_v42 = vpop.eup %6644  ;;  %v3953_v28 = vadd.f32 %v11779_v3, %v10061_v41 }
 0x347   : > { %6668 = vpow2.f32 %v5872_v8  ;;  %v5873_v13 = vmul.f32 -1.442695, %v4138_v2  ;;  %v4140_v50 = vadd.f32 %v4139_v47, %v3947_v12  ;;  %11775 = vst [vmem:[#allocation79_spill] sm:$0xff] %v10109_v42  ;;  %v10114_v37 = vpop.eup %6646  ;;  %v10123_v12 = vpop.f32.mrf.mxu0  ;;  %v11782_v47 = vld [vmem:[#allocation48_spill] sm:$0xff] }
 0x348   : > { %6670 = vtanh.f32 %v9841_v30  ;;  %11777 = vst [vmem:[#allocation40_spill] sm:$0xff] %v10114_v37  ;;  %v4143_v58 = vpop.f32.mrf.mxu1  ;;  %v10116_v11 = vpop.eup %6648 }
 0x349   : > { %6672 = vpow2.f32 %v5873_v13  ;;  %v5874_v61 = vmul.f32 -1.442695, %v4140_v50  ;;  %11778 = vst [vmem:[#allocation69_spill] sm:$0xff] %v10116_v11  ;;  %v4144_v2 = vadd.f32 %v4143_v58, %v3951_v51  ;;  %v10121_v8 = vpop.eup %6650  ;;  %v3955_v13 = vadd.f32 %v11782_v47, %v10046_v39  ;;  %v11785_v58 = vld [vmem:[#allocation53_spill] sm:$0xff] }
 0x34a   : > { %6674 = vtanh.f32 %v9847_v40  ;;  %11780 = vst [vmem:[#allocation74_spill] sm:$0xff] %v10121_v8  ;;  %v4145_v32 = vpop.f32.mrf.mxu1  ;;  %v10125_v30 = vpop.eup %6652 }
 0x34b   : > { %6676 = vpow2.f32 %v5874_v61  ;;  %11781 = vst [vmem:[#allocation95_spill] sm:$0xff] %v10125_v30  ;;  %v5875_v50 = vmul.f32 -1.442695, %v4144_v2  ;;  %v4146_v52 = vadd.f32 %v4145_v32, %v3953_v28  ;;  %v10130_v44 = vpop.eup %6654  ;;  %v3957_v61 = vadd.f32 %v11785_v58, %v10061_v41 }
 0x34c   : > { %6678 = vtanh.f32 %v9853_v17  ;;  %11783 = vst [vmem:[#allocation72_spill] sm:$0xff] %v10130_v44  ;;  %v4147_v40 = vpop.f32.mrf.mxu1  ;;  %v10133_v51 = vpop.eup %6656 }
 0x34d   : > { %6680 = vtanh.f32 %v9859_v20  ;;  %11784 = vst [vmem:[#allocation77_spill] sm:$0xff] %v10133_v51  ;;  %v5876_v3 = vmul.f32 -1.442695, %v4146_v52  ;;  %v4148_v38 = vadd.f32 %v4147_v40, %v3955_v13  ;;  %v10137_v19 = vpop.eup %6658  ;;  %v10140_v17 = vpop.f32.mrf.mxu0  ;;  %v11788_v20 = vld [vmem:[#allocation30_spill] sm:$0xff] }
 0x34e   : > { %6682 = vpow2.f32 %v5875_v50  ;;  %11786 = vst [vmem:[#allocation41_spill] sm:$0xff] %v10137_v19  ;;  %v4149_v28 = vpop.f32.mrf.mxu1  ;;  %v10142_v2 = vpop.eup %6660  ;;  %v3961_v32 = vadd.f32 %v11788_v20, %v10046_v39  ;;  %v11789_v50 = vld [vmem:[#allocation43_spill] sm:$0xff] }
 0x34f   : > { %6684 = vtanh.f32 %v9865_v7  ;;  %11787 = vst [vmem:[#allocation63_spill] sm:$0xff] %v10142_v2  ;;  %v5877_v47 = vmul.f32 -1.442695, %v4148_v38  ;;  %v4150_v6 = vadd.f32 %v4149_v28, %v3957_v61  ;;  %v10146_v48 = vpop.eup %6662  ;;  %v3963_v7 = vadd.f32 %v11789_v50, %v10061_v41  ;;  %v10154_v20 = vpop.f32.mrf.mxu0  ;;  %v11791_v28 = vld [vmem:[#allocation31_spill] sm:$0xff] }
 0x350   : > { %6686 = vpow2.f32 %v5876_v3  ;;  %v4153_v52 = vpop.f32.mrf.mxu1 }
 0x351   : > { %6688 = vtanh.f32 %v9871_v18  ;;  %v5878_v40 = vmul.f32 -1.442695, %v4150_v6  ;;  %v4154_v58 = vadd.f32 %v4153_v52, %v3961_v32  ;;  %v3965_v18 = vadd.f32 %v11791_v28, %v10046_v39  ;;  %v11793_v52 = vld [vmem:[#allocation46_spill] sm:$0xff]  ;;  %v10164_v44 = vpop.f32.mrf.mxu0 }
 0x352   : > { %v6665_v13 = vpop.eup %6664  ;;  %6690 = vpow2.f32 %v5877_v47  ;;  %v4155_v61 = vpop.f32.mrf.mxu1 }
 0x353   : > { %v10151_v42 = vpop.eup %6666  ;;  %6692 = vtanh.f32 %v9877_v0  ;;  %v4484_v38 = vadd.f32 1.0, %v6665_v13  ;;  %v5879_v37 = vmul.f32 -1.442695, %v4154_v58  ;;  %v4156_v11 = vadd.f32 %v4155_v61, %v3963_v7  ;;  %v11795_v61 = vld [vmem:[#allocation36_spill] sm:$0xff] }
 0x354   : > { %11790 = vst [vmem:[#allocation68_spill] sm:$0xff] %v10151_v42  ;;  %v6669_v3 = vpop.eup %6668  ;;  %6694 = vpow2.f32 %v5878_v40  ;;  %v4157_v32 = vpop.f32.mrf.mxu1  ;;  %v3967_v0 = vadd.f32 %v11793_v52, %v10061_v41 }
 0x355   : > { %v10158_v8 = vpop.eup %6670  ;;  %6696 = vrcp.f32 %v4484_v38  ;;  %v4485_v6 = vadd.f32 1.0, %v6669_v3  ;;  %v5880_v50 = vmul.f32 -1.442695, %v4156_v11  ;;  %v4158_v13 = vadd.f32 %v4157_v32, %v3965_v18  ;;  %v11798_v32 = vld [vmem:[#allocation29_spill] sm:$0xff] }
 0x356   : > { %11792 = vst [vmem:[#allocation66_spill] sm:$0xff] %v10158_v8  ;;  %v6673_v47 = vpop.eup %6672  ;;  %6698 = vpow2.f32 %v5879_v37  ;;  %v4159_v58 = vpop.f32.mrf.mxu1  ;;  %v3971_v38 = vadd.f32 %v11795_v61, %v10046_v39  ;;  %v3973_v52 = vadd.f32 %v11798_v32, %v10061_v41  ;;  %v11799_v8 = vld [vmem:[#allocation28_spill] sm:$0xff] }
 0x357   : > { %v10162_v30 = vpop.eup %6674  ;;  %6700 = vrcp.f32 %v4485_v6  ;;  %v4486_v40 = vadd.f32 1.0, %v6673_v47  ;;  %v5881_v3 = vmul.f32 -1.442695, %v4158_v13  ;;  %v4160_v28 = vadd.f32 %v4159_v58, %v3967_v0 }
 0x358   : > { %11794 = vst [vmem:[#allocation71_spill] sm:$0xff] %v10162_v30  ;;  %v6677_v7 = vpop.eup %6676  ;;  %6702 = vpow2.f32 %v5880_v50  ;;  %v4163_v11 = vpop.f32.mrf.mxu1  ;;  %v3975_v61 = vadd.f32 %v11799_v8, %v10046_v39 }
 0x359   : > { %v10168_v51 = vpop.eup %6678  ;;  %6704 = vrcp.f32 %v4486_v40  ;;  %v4487_v37 = vadd.f32 1.0, %v6677_v7  ;;  %v5882_v6 = vmul.f32 -1.442695, %v4160_v28  ;;  %v4164_v47 = vadd.f32 %v4163_v11, %v3971_v38  ;;  %v10176_v50 = vpop.f32.mrf.mxu0 }
 0x35a   : > { %11796 = vst [vmem:[#allocation62_spill] sm:$0xff] %v10168_v51  ;;  %v10170_v18 = vpop.eup %6680  ;;  %6706 = vpow2.f32 %v5881_v3  ;;  %v4165_v0 = vpop.f32.mrf.mxu1 }
 0x35b   : > { %11797 = vst [vmem:[#allocation57_spill] sm:$0xff] %v10170_v18  ;;  %v6683_v30 = vpop.eup %6682  ;;  %6708 = vrcp.f32 %v4487_v37  ;;  %v5883_v58 = vmul.f32 -1.442695, %v4164_v47  ;;  %v4166_v7 = vadd.f32 %v4165_v0, %v3973_v52  ;;  %v10183_v51 = vpop.f32.mrf.mxu0 }
 0x35c   : > { %v10178_v13 = vpop.eup %6684  ;;  %v4488_v40 = vadd.f32 1.0, %v6683_v30  ;;  %6710 = vpow2.f32 %v5882_v6  ;;  %v4167_v3 = vpop.f32.mrf.mxu1 }
 0x35d   : > { %11800 = vst [vmem:[#allocation60_spill] sm:$0xff] %v10178_v13  ;;  %v6687_v18 = vpop.eup %6686  ;;  %6712 = vtanh.f32 %v9883_v43  ;;  %v5884_v11 = vmul.f32 -1.442695, %v4166_v7  ;;  %v4168_v8 = vadd.f32 %v4167_v3, %v3975_v61 }
 0x35e   : > { %v10181_v28 = vpop.eup %6688  ;;  %6714 = vrcp.f32 %v4488_v40  ;;  %v4489_v38 = vadd.f32 1.0, %v6687_v18  ;;  %v4169_v37 = vpop.f32.mrf.mxu1 }
 0x35f   : > { %11801 = vst [vmem:[#allocation65_spill] sm:$0xff] %v10181_v28  ;;  %v6691_v32 = vpop.eup %6690  ;;  %6716 = vpow2.f32 %v5883_v58  ;;  %v5885_v52 = vmul.f32 -1.442695, %v4168_v8  ;;  %v10189_v40 = vpop.f32.mrf.mxu0 }
 0x360   : > { %v10185_v13 = vpop.eup %6692  ;;  %6718 = vrcp.f32 %v4489_v38  ;;  %v4490_v30 = vadd.f32 1.0, %v6691_v32  ;;  %v10187_v43 = vpop.f32.mrf.mxu1 }
 0x361   : > { %11802 = vst [vmem:[#allocation51_spill] sm:$0xff] %v10185_v13  ;;  %v6695_v6 = vpop.eup %6694  ;;  %6720 = vpow2.f32 %v5884_v11  ;;  %v11815_v13 = vld [vmem:[#allocation106_spill] sm:$0xff] }
 0x362   : > { %v6697_v47 = vpop.eup %6696  ;;  %6722 = vrcp.f32 %v4490_v30  ;;  %v4491_v0 = vadd.f32 1.0, %v6695_v6  ;;  %v10191_v61 = vpop.f32.mrf.mxu1 }
 0x363   : > { %v6699_v18 = vpop.eup %6698  ;;  %6724 = vpow2.f32 %v5885_v52  ;;  %v10194_v58 = vmul.f32 %v6697_v47, %v9988_v33  ;;  %v10203_v6 = vpop.f32.mrf.mxu0 }
 0x364   : > { %v6701_v7 = vpop.eup %6700  ;;  %6726 = vrcp.f32 %v4491_v0  ;;  %v4492_v3 = vadd.f32 1.0, %v6699_v18  ;;  %v10197_v11 = vpop.f32.mrf.mxu1 }
 0x365   : > { %11803 = vst [vmem:[#allocation56_spill] sm:$0xff] %v10194_v58  ;;  %v6703_v38 = vpop.eup %6702  ;;  %6728 = vtanh.f32 %v9889_v59  ;;  %v10200_v8 = vmul.f32 %v6701_v7, %v9994_v34  ;;  %v11809_v58 = vld [vmem:[#allocation107_spill] sm:$0xff] }
 0x366   : > { %v6705_v32 = vpop.eup %6704  ;;  %6730 = vrcp.f32 %v4492_v3  ;;  %v4493_v30 = vadd.f32 1.0, %v6703_v38  ;;  %v10205_v33 = vpop.f32.mrf.mxu1 }
 0x367   : > { %11804 = vst [vmem:[#allocation54_spill] sm:$0xff] %v10200_v8  ;;  %v6707_v52 = vpop.eup %6706  ;;  %6732 = vtanh.f32 %v9895_v54  ;;  %v10208_v47 = vmul.f32 %v6705_v32, %v10003_v60  ;;  %v11808_v54 = vld [vmem:[#allocation38_spill] sm:$0xff]  ;;  %v3981_v60 = vadd.f32 %v11809_v58, %v10046_v39 }
 0x368   : > { %v6709_v0 = vpop.eup %6708  ;;  %6734 = vrcp.f32 %v4493_v30  ;;  %v4494_v59 = vadd.f32 1.0, %v6707_v52  ;;  %v10211_v34 = vpop.f32.mrf.mxu1  ;;  %v3977_v38 = vadd.f32 %v11808_v54, %v10061_v41  ;;  %v11810_v52 = vld [vmem:[#allocation113_spill] sm:$0xff]  ;;  %v11813_v58 = vld [vmem:[#allocation98_spill] sm:$0xff] }
 0x369   : > { %11805 = vst [vmem:[#allocation59_spill] sm:$0xff] %v10208_v47  ;;  %v6711_v18 = vpop.eup %6710  ;;  %6736 = vtanh.f32 %v9901_v63  ;;  %v10214_v7 = vmul.f32 %v6709_v0, %v10007_v29  ;;  %v3983_v8 = vadd.f32 %v11810_v52, %v10061_v41  ;;  %v11811_v63 = vld [vmem:[#allocation110_spill] sm:$0xff]  ;;  %v11812_v29 = vld [vmem:[#allocation116_spill] sm:$0xff] }
 0x36a   : > { %v10216_v3 = vpop.eup %6712  ;;  %6738 = vrcp.f32 %v4494_v59  ;;  %v4495_v32 = vadd.f32 1.0, %v6711_v18  ;;  %v3985_v47 = vadd.f32 %v11811_v63, %v10046_v39  ;;  %v3987_v0 = vadd.f32 %v11812_v29, %v10061_v41  ;;  %v10231_v54 = vpop.f32.mrf.mxu1 }
 0x36b   : > { %11806 = vst [vmem:[#allocation44_spill] sm:$0xff] %v10214_v7  ;;  %11807 = vst [vmem:[#allocation50_spill] sm:$0xff] %v10216_v3  ;;  %v6715_v30 = vpop.eup %6714  ;;  %6740 = vtanh.f32 %v9907_v14  ;;  %v10229_v7 = vpop.f32.mrf.mxu0  ;;  %v3991_v59 = vadd.f32 %v11813_v58, %v10046_v39  ;;  %v3995_v18 = vadd.f32 %v9915_v56, %v10046_v39  ;;  %v11816_v14 = vld [vmem:[#allocation37_spill] sm:$0xff]  ;;  %v4170_v42 = vadd.f32 %v4169_v37, %v3977_v38 }
 0x36c   : > { %v6717_v3 = vpop.eup %6716  ;;  %6742 = vrcp.f32 %v4495_v32  ;;  %v10238_v52 = vmul.f32 %v6715_v30, %v10014_v24  ;;  %v3993_v29 = vadd.f32 %v11816_v14, %v10061_v41  ;;  %v4187_v19 = vpop.f32.mrf.mxu1  ;;  %v3997_v58 = vadd.f32 %v9921_v16, %v10061_v41 }
 0x36d   : > { %v6719_v63 = vpop.eup %6718  ;;  %6744 = vtanh.f32 %v11815_v13  ;;  %v4496_v28 = vadd.f32 1.0, %v6717_v3  ;;  %v4001_v56 = vadd.f32 %v9927_v57, %v10046_v39  ;;  %v4188_v32 = vadd.f32 %v4187_v19, %v3995_v18 }
 0x36e   : > { %11814 = vst [vmem:[#allocation48_spill] sm:$0xff] %v10238_v52  ;;  %v6721_v2 = vpop.eup %6720  ;;  %v10248_v24 = vmul.f32 %v6719_v63, %v10016_v21  ;;  %v4003_v13 = vadd.f32 %v9937_v45, %v10061_v41  ;;  %v10252_v52 = vpop.f32.mrf.mxu0  ;;  %v4174_v3 = vadd.f32 %v10187_v43, %v3981_v60  ;;  %v4005_v16 = vadd.f32 %v9948_v23, %v10046_v39 }
 0x36f   : > { %v6723_v30 = vpop.eup %6722  ;;  %6746 = vrcp.f32 %v4496_v28  ;;  %v4497_v37 = vadd.f32 1.0, %v6721_v2  ;;  %v4189_v38 = vpop.f32.mrf.mxu1  ;;  %v5893_v57 = vmul.f32 -1.442695, %v4188_v32  ;;  %v5886_v45 = vmul.f32 -1.442695, %v4170_v42 }
 0x370   : > { %11817 = vst [vmem:[#allocation53_spill] sm:$0xff] %v10248_v24  ;;  %v6725_v14 = vpop.eup %6724  ;;  %v4190_v19 = vadd.f32 %v4189_v38, %v3997_v58  ;;  %v10258_v21 = vmul.f32 %v6723_v30, %v10025_v9  ;;  %v4176_v24 = vadd.f32 %v10191_v61, %v3983_v8  ;;  %v4007_v9 = vadd.f32 %v9962_v46, %v10061_v41  ;;  %v10268_v58 = vpop.f32.mrf.mxu0 }
 0x371   : > { %v6727_v18 = vpop.eup %6726  ;;  %6748 = vrcp.f32 %v4497_v37  ;;  %v4498_v63 = vadd.f32 1.0, %v6725_v14  ;;  %v4193_v28 = vpop.f32.mrf.mxu1  ;;  %v5887_v32 = vmul.f32 -1.442695, %v4174_v3  ;;  %v4178_v42 = vadd.f32 %v10197_v11, %v3985_v47 }
 0x372   : > { %11818 = vst [vmem:[#allocation30_spill] sm:$0xff] %v10258_v21  ;;  %v10261_v2 = vpop.eup %6728  ;;  %6750 = vpow2.f32 %v5893_v57  ;;  %v5894_v43 = vmul.f32 -1.442695, %v4190_v19  ;;  %v4194_v60 = vadd.f32 %v4193_v28, %v4001_v56  ;;  %v10264_v31 = vmul.f32 %v6727_v18, %v10030_v10  ;;  %v10285_v18 = vpop.f32.mrf.mxu0 }
 0x373   : > { %v6731_v23 = vpop.eup %6730  ;;  %6752 = vrcp.f32 %v4498_v63  ;;  %v4195_v61 = vpop.f32.mrf.mxu1  ;;  %v5888_v38 = vmul.f32 -1.442695, %v4176_v24  ;;  %v4180_v46 = vadd.f32 %v10205_v33, %v3987_v0  ;;  %v4184_v14 = vadd.f32 %v10211_v34, %v3991_v59 }
 0x374   : > { %v10271_v8 = vpop.eup %6732  ;;  %6754 = vpow2.f32 %v5894_v43  ;;  %v5895_v30 = vmul.f32 -1.442695, %v4194_v60  ;;  %v4196_v37 = vadd.f32 %v4195_v61, %v4003_v13  ;;  %v10274_v56 = vmul.f32 %v6731_v23, %v10037_v53 }
 0x375   : > { %v6735_v10 = vpop.eup %6734  ;;  %6756 = vpow2.f32 %v5886_v45  ;;  %v4197_v57 = vpop.f32.mrf.mxu1  ;;  %v4011_v53 = vadd.f32 %v9976_v5, %v10046_v39  ;;  %v5889_v24 = vmul.f32 -1.442695, %v4178_v42  ;;  %v4186_v33 = vadd.f32 %v10231_v54, %v3993_v29 }
 0x376   : > { %v10278_v3 = vpop.eup %6736  ;;  %6758 = vpow2.f32 %v5895_v30  ;;  %v5896_v11 = vmul.f32 -1.442695, %v4196_v37  ;;  %v4198_v47 = vadd.f32 %v4197_v57, %v4005_v16  ;;  %v10281_v19 = vmul.f32 %v6735_v10, %v10040_v26 }
 0x377   : > { %v6739_v13 = vpop.eup %6738  ;;  %6760 = vpow2.f32 %v5887_v32  ;;  %v4199_v34 = vpop.f32.mrf.mxu1  ;;  %v4013_v45 = vadd.f32 %v9999_v15, %v10061_v41  ;;  %v5890_v5 = vmul.f32 -1.442695, %v4180_v46  ;;  %v5891_v28 = vmul.f32 -1.442695, %v4184_v14 }
 0x378   : > { %v10288_v0 = vpop.eup %6740  ;;  %6762 = vpow2.f32 %v5896_v11  ;;  %v5897_v59 = vmul.f32 -1.442695, %v4198_v47  ;;  %v4200_v63 = vadd.f32 %v4199_v34, %v4007_v9  ;;  %v10291_v16 = vmul.f32 %v6739_v13, %v10052_v1  ;;  %v10302_v9 = vpop.f32.mrf.mxu0 }
 0x379   : > { %v6743_v26 = vpop.eup %6742  ;;  %6764 = vpow2.f32 %v5888_v38  ;;  %v4203_v43 = vpop.f32.mrf.mxu1  ;;  %v4015_v1 = vadd.f32 %v10021_v36, %v10046_v39  ;;  %v5892_v42 = vmul.f32 -1.442695, %v4186_v33  ;;  %v4021_v57 = vadd.f32 %v10073_v62, %v10046_v39 }
 0x37a   : > { %v10295_v60 = vpop.eup %6744  ;;  %6766 = vpow2.f32 %v5897_v59  ;;  %v5898_v54 = vmul.f32 -1.442695, %v4200_v63  ;;  %v4204_v29 = vadd.f32 %v4203_v43, %v4011_v53  ;;  %v10298_v23 = vmul.f32 %v6743_v26, %v10055_v4  ;;  %v10311_v11 = vpop.f32.mrf.mxu0 }
 0x37b   : > { %6768 = vpow2.f32 %v5889_v24  ;;  %v4205_v32 = vpop.f32.mrf.mxu1  ;;  %v4017_v4 = vadd.f32 %v10048_v49, %v10061_v41  ;;  %v4023_v34 = vadd.f32 %v10093_v35, %v10061_v41 }
 0x37c   : > { %v6747_v15 = vpop.eup %6746  ;;  %6770 = vpow2.f32 %v5898_v54  ;;  %v5899_v61 = vmul.f32 -1.442695, %v4204_v29  ;;  %v4206_v30 = vadd.f32 %v4205_v32, %v4013_v45  ;;  %v10325_v43 = vpop.f32.mrf.mxu0 }
 0x37d   : > { %6772 = vpow2.f32 %v5890_v5  ;;  %v4207_v37 = vpop.f32.mrf.mxu1  ;;  %v10305_v10 = vmul.f32 %v6747_v15, %v10065_v55  ;;  %v4027_v15 = vadd.f32 %v10123_v12, %v10061_v41 }
 0x37e   : > { %v6749_v38 = vpop.eup %6748  ;;  %6774 = vpow2.f32 %v5891_v28  ;;  %v5900_v36 = vmul.f32 -1.442695, %v4206_v30  ;;  %v4208_v46 = vadd.f32 %v4207_v37, %v4015_v1  ;;  %v4025_v28 = vadd.f32 %v10107_v22, %v10046_v39 }
 0x37f   : > { %v6751_v14 = vpop.eup %6750  ;;  %6776 = vpow2.f32 %v5899_v61  ;;  %v4209_v47 = vpop.f32.mrf.mxu1  ;;  %v10314_v13 = vmul.f32 %v6749_v38, %v10068_v25 }
 0x380   : > { %v6753_v55 = vpop.eup %6752  ;;  %6778 = vpow2.f32 %v5892_v42  ;;  %v4506_v53 = vadd.f32 1.0, %v6751_v14  ;;  %v5901_v24 = vmul.f32 -1.442695, %v4208_v46  ;;  %v4210_v33 = vadd.f32 %v4209_v47, %v4017_v4 }
 0x381   : > { %v6755_v49 = vpop.eup %6754  ;;  %6780 = vpow2.f32 %v5900_v36  ;;  %v4213_v59 = vpop.f32.mrf.mxu1  ;;  %v10319_v62 = vmul.f32 %v6753_v55, %v10077_v27  ;;  %v4031_v4 = vadd.f32 %v10140_v17, %v10046_v39 }
 0x382   : > { %v10321_v63 = vpop.eup %6756  ;;  %6782 = vrcp.f32 %v4506_v53  ;;  %v4507_v26 = vadd.f32 1.0, %v6755_v49  ;;  %v5902_v25 = vmul.f32 -1.442695, %v4210_v33  ;;  %v4214_v45 = vadd.f32 %v4213_v59, %v4021_v57  ;;  %v10335_v36 = vpop.f32.mrf.mxu0 }
 0x383   : > { %v6759_v5 = vpop.eup %6758  ;;  %6784 = vpow2.f32 %v5901_v24  ;;  %v4215_v54 = vpop.f32.mrf.mxu1  ;;  %v4033_v53 = vadd.f32 %v10154_v20, %v10061_v41 }
 0x384   : > { %v10327_v35 = vpop.eup %6760  ;;  %6786 = vrcp.f32 %v4507_v26  ;;  %v4508_v29 = vadd.f32 1.0, %v6759_v5  ;;  %v5903_v27 = vmul.f32 -1.442695, %v4214_v45  ;;  %v4216_v1 = vadd.f32 %v4215_v54, %v4023_v34  ;;  %v10345_v26 = vpop.f32.mrf.mxu0 }
 0x385   : > { %v6763_v32 = vpop.eup %6762  ;;  %6788 = vpow2.f32 %v5902_v25  ;;  %v4217_v42 = vpop.f32.mrf.mxu1  ;;  %v4035_v5 = vadd.f32 %v10164_v44, %v10046_v39 }
 0x386   : > { %v10331_v61 = vpop.eup %6764  ;;  %6790 = vrcp.f32 %v4508_v29  ;;  %v4509_v22 = vadd.f32 1.0, %v6763_v32  ;;  %v5904_v30 = vmul.f32 -1.442695, %v4216_v1  ;;  %v4218_v37 = vadd.f32 %v4217_v42, %v4025_v28 }
 0x387   : > { %v6767_v38 = vpop.eup %6766  ;;  %6792 = vpow2.f32 %v5903_v27  ;;  %v4219_v46 = vpop.f32.mrf.mxu1  ;;  %v4037_v32 = vadd.f32 %v10176_v50, %v10061_v41 }
 0x388   : > { %v10337_v14 = vpop.eup %6768  ;;  %6794 = vrcp.f32 %v4509_v22  ;;  %v4510_v12 = vadd.f32 1.0, %v6767_v38  ;;  %v5905_v57 = vmul.f32 -1.442695, %v4218_v37  ;;  %v4220_v47 = vadd.f32 %v4219_v46, %v4027_v15 }
 0x389   : > { %v6771_v55 = vpop.eup %6770  ;;  %6796 = vpow2.f32 %v5904_v30  ;;  %v4223_v24 = vpop.f32.mrf.mxu1 }
 0x38a   : > { %v10341_v33 = vpop.eup %6772  ;;  %6798 = vrcp.f32 %v4510_v12  ;;  %v4511_v17 = vadd.f32 1.0, %v6771_v55  ;;  %v5906_v49 = vmul.f32 -1.442695, %v4220_v47  ;;  %v4224_v34 = vadd.f32 %v4223_v24, %v4031_v4  ;;  %v10355_v30 = vpop.f32.mrf.mxu0 }
 0x38b   : > { %v10343_v59 = vpop.eup %6774  ;;  %6800 = vpow2.f32 %v5905_v57  ;;  %v4225_v25 = vpop.f32.mrf.mxu1  ;;  %v4041_v4 = vadd.f32 %v10183_v51, %v10046_v39 }
 0x38c   : > { %v6777_v45 = vpop.eup %6776  ;;  %6802 = vrcp.f32 %v4511_v17  ;;  %v5907_v20 = vmul.f32 -1.442695, %v4224_v34  ;;  %v4226_v28 = vadd.f32 %v4225_v25, %v4033_v53  ;;  %v4043_v53 = vadd.f32 %v10189_v40, %v10061_v41  ;;  %v10365_v34 = vpop.f32.mrf.mxu0 }
 0x38d   : > { %v10349_v54 = vpop.eup %6778  ;;  %v4512_v29 = vadd.f32 1.0, %v6777_v45  ;;  %6804 = vpow2.f32 %v5906_v49  ;;  %v4227_v27 = vpop.f32.mrf.mxu1 }
 0x38e   : > { %v6781_v1 = vpop.eup %6780  ;;  %6806 = vpow2.f32 %v5907_v20  ;;  %v5908_v15 = vmul.f32 -1.442695, %v4226_v28  ;;  %v4228_v42 = vadd.f32 %v4227_v27, %v4035_v5  ;;  %v4045_v5 = vadd.f32 %v10203_v6, %v10046_v39 }
 0x38f   : > { %v10353_v22 = vpop.eup %6782  ;;  %6808 = vrcp.f32 %v4512_v29  ;;  %v4513_v44 = vadd.f32 1.0, %v6781_v1  ;;  %v4229_v37 = vpop.f32.mrf.mxu1 }
 0x390   : > { %v6785_v38 = vpop.eup %6784  ;;  %6810 = vpow2.f32 %v5908_v15  ;;  %v5909_v46 = vmul.f32 -1.442695, %v4228_v42  ;;  %v4230_v12 = vadd.f32 %v4229_v37, %v4037_v32  ;;  %v4047_v32 = vadd.f32 %v10229_v7, %v10061_v41  ;;  %v10375_v37 = vpop.f32.mrf.mxu0 }
 0x391   : > { %v10359_v57 = vpop.eup %6786  ;;  %6812 = vrcp.f32 %v4513_v44  ;;  %v4514_v50 = vadd.f32 1.0, %v6785_v38  ;;  %v4233_v47 = vpop.f32.mrf.mxu1 }
 0x392   : > { %v6789_v55 = vpop.eup %6788  ;;  %6814 = vpow2.f32 %v5909_v46  ;;  %v5910_v24 = vmul.f32 -1.442695, %v4230_v12  ;;  %v4234_v17 = vadd.f32 %v4233_v47, %v4041_v4  ;;  %v4051_v46 = vadd.f32 %v10252_v52, %v10046_v39  ;;  %v10385_v52 = vpop.f32.mrf.mxu0 }
 0x393   : > { %v10363_v49 = vpop.eup %6790  ;;  %6816 = vrcp.f32 %v4514_v50  ;;  %v4515_v51 = vadd.f32 1.0, %v6789_v55  ;;  %v4235_v25 = vpop.f32.mrf.mxu1 }
 0x394   : > { %v6793_v45 = vpop.eup %6792  ;;  %6818 = vpow2.f32 %v5910_v24  ;;  %v5911_v20 = vmul.f32 -1.442695, %v4234_v17  ;;  %v4236_v28 = vadd.f32 %v4235_v25, %v4043_v53  ;;  %v4053_v24 = vadd.f32 %v10268_v58, %v10061_v41 }
 0x395   : > { %v10369_v29 = vpop.eup %6794  ;;  %6820 = vrcp.f32 %v4515_v51  ;;  %v4516_v40 = vadd.f32 1.0, %v6793_v45  ;;  %v4237_v27 = vpop.f32.mrf.mxu1  ;;  %v4055_v45 = vadd.f32 %v10285_v18, %v10046_v39 }
 0x396   : > { %v6797_v1 = vpop.eup %6796  ;;  %6822 = vpow2.f32 %v5911_v20  ;;  %v5912_v15 = vmul.f32 -1.442695, %v4236_v28  ;;  %v4238_v42 = vadd.f32 %v4237_v27, %v4045_v5  ;;  %v10387_v18 = vpop.f32.mrf.mxu0 }
 0x397   : > { %v10373_v44 = vpop.eup %6798  ;;  %6824 = vrcp.f32 %v4516_v40  ;;  %v4517_v6 = vadd.f32 1.0, %v6797_v1  ;;  %v4239_v38 = vpop.f32.mrf.mxu1 }
 0x398   : > { %v6801_v4 = vpop.eup %6800  ;;  %6826 = vpow2.f32 %v5912_v15  ;;  %v5913_v12 = vmul.f32 -1.442695, %v4238_v42  ;;  %v4240_v50 = vadd.f32 %v4239_v38, %v4047_v32 }
 0x399   : > { %v10379_v47 = vpop.eup %6802  ;;  %6828 = vrcp.f32 %v4517_v6  ;;  %v4518_v7 = vadd.f32 1.0, %v6801_v4  ;;  %v4243_v55 = vpop.f32.mrf.mxu1 }
 0x39a   : > { %v6805_v53 = vpop.eup %6804  ;;  %6830 = vpow2.f32 %v5913_v12  ;;  %v5914_v17 = vmul.f32 -1.442695, %v4240_v50  ;;  %v4244_v51 = vadd.f32 %v4243_v55, %v4051_v46 }
 0x39b   : > { %v6807_v25 = vpop.eup %6806  ;;  %6832 = vrcp.f32 %v4518_v7  ;;  %v4519_v5 = vadd.f32 1.0, %v6805_v53  ;;  %v4245_v20 = vpop.f32.mrf.mxu1  ;;  %v4505_v53 = vadd.f32 1.0, %v10349_v54 }
 0x39c   : > { %v6809_v28 = vpop.eup %6808  ;;  %v4520_v40 = vadd.f32 1.0, %v6807_v25  ;;  %6834 = vpow2.f32 %v5914_v17  ;;  %v5915_v27 = vmul.f32 -1.442695, %v4244_v51  ;;  %v4246_v1 = vadd.f32 %v4245_v20, %v4053_v24  ;;  %v10397_v17 = vld [vmem:[%s11024_s7] sm:$0x3] }
 0x39d   : > { %v6811_v32 = vpop.eup %6810  ;;  %6836 = vrcp.f32 %v4519_v5  ;;  %v4247_v58 = vpop.f32.mrf.mxu1  ;;  %11819 = vst [vmem:[#allocation43_spill] sm:$0xff] %v10397_v17  ;;  %v4504_v20 = vadd.f32 1.0, %v10343_v59  ;;  %v11822_v59 = vld [vmem:[#allocation41_spill] sm:$0xff] }
 0x39e   : > { %v6813_v15 = vpop.eup %6812  ;;  %6838 = vrcp.f32 %v4520_v40  ;;  %v4521_v42 = vadd.f32 1.0, %v6811_v32  ;;  %v5916_v6 = vmul.f32 -1.442695, %v4246_v1  ;;  %v4248_v38 = vadd.f32 %v4247_v58, %v4055_v45  ;;  %v10399_v5 = vpop.f32.mrf.mxu0 }
 0x39f   : > { %v6815_v4 = vpop.eup %6814  ;;  %6840 = vpow2.f32 %v5915_v27  ;;  %v10389_v46 = vpop.f32.mrf.mxu1  ;;  %v11820_v27 = vld [vmem:[#allocation33_spill] sm:$0xff] }
 0x3a0   : > { %v6817_v12 = vpop.eup %6816  ;;  %6842 = vrcp.f32 %v4521_v42  ;;  %v4522_v50 = vadd.f32 1.0, %v6815_v4  ;;  %v5917_v7 = vmul.f32 -1.442695, %v4248_v38  ;;  %v4759_v1 = vrot.slane %v10397_v17, %v11820_v27  ;;  %v11821_v42 = vld [vmem:[#allocation63_spill] sm:$0xff] }
 0x3a1   : > { %v6819_v55 = vpop.eup %6818  ;;  %6844 = vpow2.f32 %v5916_v6  ;;  %v10392_v24 = vpop.f32.mrf.mxu1  ;;  %v4706_v6 = vmul.f32 %v6817_v12, %v11821_v42  ;;  %v4503_v4 = vadd.f32 1.0, %v10341_v33  ;;  %v4502_v12 = vadd.f32 1.0, %v10337_v14 }
 0x3a2   : > { %v6821_v51 = vpop.eup %6820  ;;  %6846 = vrcp.f32 %v4522_v50  ;;  %v4523_v25 = vadd.f32 1.0, %v6819_v55  ;;  %v11823_v55 = vld [vmem:[#allocation68_spill] sm:$0xff]  ;;  %4826 = vmatprep.mubr.f32.mxu0 %v4759_v1  ;;  %v11827_v1 = vld [vmem:[#allocation77_spill] sm:$0xff]  ;;  %v4501_v42 = vadd.f32 1.0, %v10331_v61 }
 0x3a3   : > { %v6823_v45 = vpop.eup %6822  ;;  %6848 = vpow2.f32 %v5917_v7  ;;  %v10402_v40 = vpop.f32.mrf.mxu1  ;;  %v4707_v54 = vmul.f32 %v6821_v51, %v10146_v48  ;;  %v4705_v7 = vmul.f32 %v6813_v15, %v11822_v59 }
 0x3a4   : > { %v6825_v32 = vpop.eup %6824  ;;  %6850 = vrcp.f32 %v4523_v25  ;;  %v4524_v58 = vadd.f32 1.0, %v6823_v45  ;;  %v10415_v45 = vpop.f32.mrf.mxu0 }
 0x3a5   : > { %v6827_v38 = vpop.eup %6826  ;;  %6852 = vrcp.f32 %v4505_v53  ;;  %4762 = vmatprep.subr.mxu0 %v4707_v54  ;;  %v10409_v50 = vpop.f32.mrf.mxu1  ;;  %v10413_v21 = vmul.f32 %v6825_v32, %v11823_v55  ;;  %v11825_v53 = vld [vmem:[#allocation66_spill] sm:$0xff]  ;;  %v4704_v32 = vmul.f32 %v6809_v28, %v11827_v1  ;;  %v4500_v55 = vadd.f32 1.0, %v10327_v35  ;;  %v11834_v35 = vld [vmem:[#allocation57_spill] sm:$0xff] }
 0x3a6   : > { %v6829_v48 = vpop.eup %6828  ;;  %6854 = vrcp.f32 %v4524_v58  ;;  %v4525_v51 = vadd.f32 1.0, %v6827_v38  ;;  %4763 = vmatpush1.xpose.msra.mxu0 %v4706_v6  ;;  %v11828_v38 = vld [vmem:[#allocation72_spill] sm:$0xff]  ;;  %v4086_v28 = vpop.f32.mrf.mxu0 }
 0x3a7   : > { %11824 = vst [vmem:[#allocation31_spill] sm:$0xff] %v10413_v21  ;;  %v6831_v25 = vpop.eup %6830  ;;  %6856 = vrcp.f32 %v4504_v20  ;;  %4764 = vmatprep.subr.mxu0 %v4705_v7  ;;  %v10418_v33 = vpop.f32.mrf.mxu1  ;;  %v10421_v54 = vmul.f32 %v6829_v48, %v11825_v53  ;;  %v4703_v14 = vmul.f32 %v10379_v47, %v11828_v38  ;;  %v11829_v20 = vld [vmem:[#allocation71_spill] sm:$0xff]  ;;  %v4499_v47 = vadd.f32 1.0, %v10321_v63  ;;  %v11836_v38 = vld [vmem:[#allocation74_spill] sm:$0xff] }
 0x3a8   : > { %v6833_v15 = vpop.eup %6832  ;;  %6858 = vrcp.f32 %v4525_v51  ;;  %v4526_v27 = vadd.f32 1.0, %v6831_v25 }
 0x3a9   : > { %11826 = vst [vmem:[#allocation46_spill] sm:$0xff] %v10421_v54  ;;  %v6835_v58 = vpop.eup %6834  ;;  %6860 = vrcp.f32 %v4503_v4  ;;  %v10425_v6 = vpop.f32.mrf.mxu1  ;;  %v10430_v59 = vmul.f32 %v6833_v15, %v11829_v20  ;;  %v11831_v4 = vld [vmem:[#allocation62_spill] sm:$0xff]  ;;  %v11833_v15 = vld [vmem:[#allocation95_spill] sm:$0xff]  ;;  %v11849_v54 = vld [vmem:[#allocation153_spill] sm:$0xff] }
 0x3aa   : > { %v6837_v7 = vpop.eup %6836  ;;  %6862 = vrcp.f32 %v4526_v27  ;;  %v4527_v48 = vadd.f32 1.0, %v6835_v58  ;;  %4765 = vmatpush1.xpose.msra.mxu0 %v4704_v32  ;;  %v4702_v1 = vmul.f32 %v10373_v44, %v11833_v15 }
 0x3ab   : > { %11830 = vst [vmem:[#allocation36_spill] sm:$0xff] %v10430_v59  ;;  %v6839_v51 = vpop.eup %6838  ;;  %6864 = vrcp.f32 %v4502_v12  ;;  %4766 = vmatprep.subr.mxu0 %v4703_v14  ;;  %v10433_v61 = vpop.f32.mrf.mxu1  ;;  %v10436_v25 = vmul.f32 %v6837_v7, %v11831_v4  ;;  %v4701_v14 = vmul.f32 %v10369_v29, %v11836_v38  ;;  %v11837_v7 = vld [vmem:[#allocation60_spill] sm:$0xff] }
 0x3ac   : > { %v6841_v53 = vpop.eup %6840  ;;  %6866 = vrcp.f32 %v4527_v48  ;;  %v10442_v27 = vmul.f32 %v6839_v51, %v11834_v35  ;;  %v4090_v4 = vpop.f32.mrf.mxu0  ;;  %v11840_v35 = vld [vmem:[#allocation65_spill] sm:$0xff]  ;;  %v11842_v38 = vld [vmem:[#allocation40_spill] sm:$0xff] }
 0x3ad   : > { %11832 = vst [vmem:[#allocation29_spill] sm:$0xff] %v10436_v25  ;;  %v6843_v32 = vpop.eup %6842  ;;  %6868 = vrcp.f32 %v4501_v42  ;;  %v4528_v12 = vadd.f32 1.0, %v6841_v53  ;;  %v10444_v58 = vpop.f32.mrf.mxu1  ;;  %v11839_v53 = vld [vmem:[#allocation69_spill] sm:$0xff]  ;;  %v4087_v25 = vadd.f32 %v4086_v28, %v10061_v41 }
 0x3ae   : > { %11835 = vst [vmem:[#allocation28_spill] sm:$0xff] %v10442_v27  ;;  %v6845_v20 = vpop.eup %6844  ;;  %6870 = vrcp.f32 %v4500_v55  ;;  %4767 = vmatpush1.xpose.msra.mxu0 %v4702_v1  ;;  %v10449_v63 = vmul.f32 %v6843_v32, %v11837_v7  ;;  %v4700_v15 = vmul.f32 %v10363_v49, %v11839_v53  ;;  %v11844_v7 = vld [vmem:[#allocation51_spill] sm:$0xff]  ;;  %v4092_v49 = vpop.f32.mrf.mxu0 }
 0x3af   : > { %v6847_v48 = vpop.eup %6846  ;;  %6872 = vrcp.f32 %v4528_v12  ;;  %v4529_v44 = vadd.f32 1.0, %v6845_v20  ;;  %4768 = vmatprep.subr.mxu0 %v4701_v14  ;;  %v10451_v51 = vpop.f32.mrf.mxu1  ;;  %v4699_v12 = vmul.f32 %v10359_v57, %v11842_v38  ;;  %v11843_v14 = vld [vmem:[#allocation103_spill] sm:$0xff] }
 0x3b0   : > { %11838 = vst [vmem:[#allocation38_spill] sm:$0xff] %v10449_v63  ;;  %v6849_v42 = vpop.eup %6848  ;;  %6874 = vrcp.f32 %v4499_v47  ;;  %v10456_v29 = vmul.f32 %v6847_v48, %v11840_v35  ;;  %v11847_v35 = vld [vmem:[#allocation50_spill] sm:$0xff] }
 0x3b1   : > { %v6851_v55 = vpop.eup %6850  ;;  %6876 = vrcp.f32 %v4529_v44  ;;  %v4530_v1 = vadd.f32 1.0, %v6849_v42  ;;  %v10458_v32 = vpop.f32.mrf.mxu1  ;;  %v11846_v44 = vld [vmem:[#allocation79_spill] sm:$0xff] }
 0x3b2   : > { %11841 = vst [vmem:[#allocation107_spill] sm:$0xff] %v10456_v29  ;;  %v6853_v20 = vpop.eup %6852  ;;  %6878 = vtanh.f32 %v11843_v14  ;;  %4769 = vmatpush1.xpose.msra.mxu0 %v4700_v15  ;;  %v10464_v47 = vmul.f32 %v6851_v55, %v11844_v7  ;;  %v4698_v42 = vmul.f32 %v10353_v22, %v11846_v44  ;;  %v11851_v22 = vld [vmem:[#allocation82_spill] sm:$0xff] }
 0x3b3   : > { %v6855_v21 = vpop.eup %6854  ;;  %6880 = vrcp.f32 %v4530_v1  ;;  %4770 = vmatprep.subr.mxu0 %v4699_v12  ;;  %v4275_v48 = vpop.f32.mrf.mxu1  ;;  %v4697_v14 = vmul.f32 %v6853_v20, %v11849_v54  ;;  %v11852_v54 = vld [vmem:[#allocation149_spill] sm:$0xff] }
 0x3b4   : > { %11845 = vst [vmem:[#allocation113_spill] sm:$0xff] %v10464_v47  ;;  %v6857_v53 = vpop.eup %6856  ;;  %v10469_v17 = vmul.f32 %v6855_v21, %v11847_v35  ;;  %v4094_v1 = vpop.f32.mrf.mxu0 }
 0x3b5   : > { %v6859_v57 = vpop.eup %6858  ;;  %v4277_v38 = vpop.f32.mrf.mxu1  ;;  %v4696_v44 = vmul.f32 %v6857_v53, %v11851_v22 }
 0x3b6   : > { %11848 = vst [vmem:[#allocation110_spill] sm:$0xff] %v10469_v17  ;;  %v6861_v15 = vpop.eup %6860  ;;  %4771 = vmatpush1.xpose.msra.mxu0 %v4698_v42  ;;  %v10473_v55 = vmul.f32 %v6859_v57, %v10261_v2  ;;  %v4091_v2 = vadd.f32 %v4090_v4, %v10046_v39  ;;  %v4093_v57 = vadd.f32 %v4092_v49, %v10061_v41  ;;  %v4096_v29 = vpop.f32.mrf.mxu0  ;;  %v11854_v49 = vld [vmem:[#allocation145_spill] sm:$0xff] }
 0x3b7   : > { %v6863_v7 = vpop.eup %6862  ;;  %4772 = vmatprep.subr.mxu0 %v4697_v14  ;;  %v4279_v12 = vpop.f32.mrf.mxu1  ;;  %v4695_v20 = vmul.f32 %v6861_v15, %v11852_v54  ;;  %v11853_v15 = vld [vmem:[#allocation76_spill] sm:$0xff]  ;;  %v4085_v4 = vadd.f32 %v10415_v45, %v10046_v39  ;;  %v11855_v45 = vld [vmem:[#allocation70_spill] sm:$0xff] }
 0x3b8   : > { %11850 = vst [vmem:[#allocation116_spill] sm:$0xff] %v10473_v55  ;;  %v6865_v59 = vpop.eup %6864  ;;  %v10478_v21 = vmul.f32 %v6863_v7, %v10271_v8  ;;  %v4280_v63 = vadd.f32 %v4279_v12, %v4087_v25  ;;  %v4095_v7 = vadd.f32 %v4094_v1, %v10046_v39 }
 0x3b9   : > { %v6867_v35 = vpop.eup %6866  ;;  %v4283_v27 = vpop.f32.mrf.mxu1  ;;  %v4694_v54 = vmul.f32 %v6865_v59, %v11853_v15  ;;  %v4083_v59 = vadd.f32 %v10399_v5, %v10061_v41  ;;  %v4081_v5 = vadd.f32 %v10387_v18, %v10046_v39  ;;  %v11857_v18 = vld [vmem:[#allocation84_spill] sm:$0xff] }
 0x3ba   : > { %v6869_v42 = vpop.eup %6868  ;;  %4773 = vmatpush1.xpose.msra.mxu0 %v4696_v44  ;;  %v10484_v14 = vmul.f32 %v6867_v35, %v10278_v3  ;;  %v4284_v22 = vadd.f32 %v4283_v27, %v4091_v2  ;;  %v4097_v35 = vadd.f32 %v4096_v29, %v10061_v41 }
 0x3bb   : > { %v6871_v28 = vpop.eup %6870  ;;  %4774 = vmatprep.subr.mxu0 %v4695_v20  ;;  %v4285_v53 = vpop.f32.mrf.mxu1  ;;  %v4693_v12 = vmul.f32 %v6869_v42, %v11854_v49  ;;  %v5930_v20 = vmul.f32 -1.442695, %v4280_v63  ;;  %v4276_v63 = vadd.f32 %v4275_v48, %v4083_v59 }
 0x3bc   : > { %v6873_v8 = vpop.eup %6872  ;;  %v4286_v47 = vadd.f32 %v4285_v53, %v4093_v57  ;;  %v4692_v57 = vmul.f32 %v6871_v28, %v11855_v45  ;;  %v4278_v53 = vadd.f32 %v4277_v38, %v4085_v4  ;;  %v4274_v38 = vadd.f32 %v10458_v32, %v4081_v5 }
 0x3bd   : > { %v6875_v17 = vpop.eup %6874  ;;  %v4287_v25 = vpop.f32.mrf.mxu1  ;;  %v10492_v3 = vmul.f32 %v6873_v8, %v10288_v0  ;;  %v5931_v8 = vmul.f32 -1.442695, %v4284_v22  ;;  %v4075_v22 = vadd.f32 %v10375_v37, %v10046_v39  ;;  %v4073_v32 = vadd.f32 %v10365_v34, %v10061_v41  ;;  %v11860_v34 = vld [vmem:[#allocation137_spill] sm:$0xff] }
 0x3be   : > { %v6877_v44 = vpop.eup %6876  ;;  %v5932_v55 = vmul.f32 -1.442695, %v4286_v47  ;;  %v4288_v1 = vadd.f32 %v4287_v25, %v4095_v7  ;;  %4775 = vmatpush1.xpose.msra.mxu0 %v4694_v54  ;;  %v11856_v47 = vld [vmem:[#allocation141_spill] sm:$0xff]  ;;  %v5929_v28 = vmul.f32 -1.442695, %v4278_v53 }
 0x3bf   : > { %v6879_v27 = vpop.eup %6878  ;;  %4776 = vmatprep.subr.mxu0 %v4693_v12  ;;  %v4289_v2 = vpop.f32.mrf.mxu1  ;;  %v10499_v42 = vmul.f32 %v6877_v44, %v10295_v60  ;;  %v4691_v7 = vmul.f32 %v6875_v17, %v11856_v47  ;;  %v4077_v60 = vadd.f32 %v10385_v52, %v10061_v41  ;;  %v4067_v17 = vadd.f32 %v10345_v26, %v10061_v41  ;;  %v11858_v52 = vld [vmem:[#allocation47_spill] sm:$0xff] }
 0x3c0   : > { %v6881_v0 = vpop.eup %6880  ;;  %v5933_v15 = vmul.f32 -1.442695, %v4288_v1  ;;  %v4290_v29 = vadd.f32 %v4289_v2, %v4097_v35  ;;  %6882 = vpow2.f32 %v5932_v55  ;;  %v5928_v55 = vmul.f32 -1.442695, %v4276_v63 }
 0x3c1   : > { %v10502_v54 = vmul.f32 %v6881_v0, %v6879_v27  ;;  %6884 = vpow2.f32 %v5930_v20  ;;  %v4270_v48 = vadd.f32 %v10451_v51, %v4077_v60  ;;  %v4260_v4 = vadd.f32 %v10418_v33, %v4067_v17  ;;  %v11861_v20 = vld [vmem:[#allocation64_spill] sm:$0xff] }
 0x3c2   : > { %v5934_v25 = vmul.f32 -1.442695, %v4290_v29  ;;  %4777 = vmatpush1.xpose.msra.mxu0 %v4692_v57  ;;  %6886 = vpow2.f32 %v5933_v15  ;;  %v4071_v26 = vadd.f32 %v10355_v30, %v10046_v39  ;;  %v4268_v51 = vadd.f32 %v10444_v58, %v4075_v22  ;;  %v11866_v22 = vld [vmem:[#allocation86_spill] sm:$0xff] }
 0x3c3   : > { %4778 = vmatprep.subr.mxu0 %v4691_v7  ;;  %6888 = vpow2.f32 %v5931_v8  ;;  %v5927_v49 = vmul.f32 -1.442695, %v4274_v38  ;;  %v4266_v37 = vadd.f32 %v10433_v61, %v4073_v32  ;;  %v5926_v12 = vmul.f32 -1.442695, %v4270_v48  ;;  %v11865_v38 = vld [vmem:[#allocation44_spill] sm:$0xff] }
 0x3c4   : > { %6890 = vpow2.f32 %v5934_v25  ;;  %v4264_v44 = vadd.f32 %v10425_v6, %v4071_v26  ;;  %v4063_v30 = vadd.f32 %v10325_v43, %v10061_v41  ;;  %v5925_v33 = vmul.f32 -1.442695, %v4268_v51  ;;  %v11864_v25 = vld [vmem:[#allocation48_spill] sm:$0xff]  ;;  %v11869_v26 = vld [vmem:[#allocation54_spill] sm:$0xff] }
 0x3c5   : > { %6892 = vtanh.f32 %v11857_v18  ;;  %v4065_v61 = vadd.f32 %v10335_v36, %v10046_v39  ;;  %v5924_v58 = vmul.f32 -1.442695, %v4266_v37  ;;  %v4057_v36 = vadd.f32 %v10302_v9, %v10061_v41 }
 0x3c6   : > { %4779 = vmatpush1.xpose.msra.mxu0 %v10319_v62  ;;  %6894 = vtanh.f32 %v11858_v52  ;;  %v11859_v62 = vld [vmem:[#allocation58_spill] sm:$0xff]  ;;  %v5923_v6 = vmul.f32 -1.442695, %v4264_v44  ;;  %v4061_v2 = vadd.f32 %v10311_v11, %v10046_v39  ;;  %v11867_v52 = vld [vmem:[#allocation59_spill] sm:$0xff] }
 0x3c7   : > { %4780 = vmatprep.subr.mxu0 %v10314_v13  ;;  %6896 = vpow2.f32 %v5929_v28  ;;  %v5922_v13 = vmul.f32 -1.442695, %v4260_v4  ;;  %v11868_v4 = vld [vmem:[#allocation81_spill] sm:$0xff]  ;;  %v11870_v44 = vld [vmem:[#allocation34_spill] sm:$0xff] }
 0x3c8   : > { %6898 = vpow2.f32 %v5928_v55 }
 0x3c9   : > { %6900 = vtanh.f32 %v11859_v62 }
 0x3ca   : > { %4781 = vmatpush1.xpose.msra.mxu0 %v10305_v10  ;;  %6902 = vtanh.f32 %v11860_v34  ;;  %v4256_v10 = vadd.f32 %v10402_v40, %v4063_v30  ;;  %v11871_v34 = vld [vmem:[#allocation56_spill] sm:$0xff]  ;;  %v11872_v30 = vld [vmem:[#allocation90_spill] sm:$0xff] }
 0x3cb   : > { %4782 = vmatprep.subr.mxu0 %v10298_v23  ;;  %6904 = vpow2.f32 %v5927_v49  ;;  %v4258_v23 = vadd.f32 %v10409_v50, %v4065_v61 }
 0x3cc   : > { %6906 = vpow2.f32 %v5926_v12  ;;  %v5920_v57 = vmul.f32 -1.442695, %v4256_v10 }
 0x3cd   : > { %v6883_v35 = vpop.eup %6882  ;;  %6908 = vtanh.f32 %v11861_v20  ;;  %v5921_v0 = vmul.f32 -1.442695, %v4258_v23  ;;  %v4741_v20 = vld [vmem:[#allocation5] sm:$0x1]  ;;  %v7238_v23 = vmov 0  }
 0x3ce   : > { %4783 = vmatpush1.xpose.msra.mxu0 %v10291_v16  ;;  %v6885_v1 = vpop.eup %6884  ;;  %6910 = vpow2.f32 %v5922_v13  ;;  %v4545_v43 = vadd.f32 1.0, %v6883_v35  ;;  %v4250_v16 = vadd.f32 %v10389_v46, %v4057_v36  ;;  %6118 = vset.pattern.permute.xlu0 %v7238_v23 }
 0x3cf   : > { %4784 = vmatprep.subr.mxu0 %v10281_v19  ;;  %v6887_v27 = vpop.eup %6886  ;;  %6912 = vpow2.f32 %v5925_v33  ;;  %v4254_v19 = vadd.f32 %v10392_v24, %v4061_v2  ;;  %v4543_v53 = vadd.f32 1.0, %v6885_v1  ;;  %v11863_v24 = vld [vmem:[#allocation53_spill] sm:$0xff]  ;;  %4744 = vperm.xlu0 %6118, %v4741_v20   ;;  %v11882_v20 = vld [vmem:[#allocation110_spill] sm:$0xff] }
 0x3d0   : > { %v6889_v59 = vpop.eup %6888  ;;  %6914 = vpow2.f32 %v5924_v58  ;;  %v4546_v40 = vadd.f32 1.0, %v6887_v27  ;;  %v5918_v8 = vmul.f32 -1.442695, %v4250_v16  ;;  %v11873_v27 = vld [vmem:[#allocation93_spill] sm:$0xff]  ;;  %6119 = vset.pattern.permute.xlu1 %v7238_v23  ;;  %v11886_v23 = vld [vmem:[#allocation28_spill] sm:$0xff] }
 0x3d1   : > { %v6891_v45 = vpop.eup %6890  ;;  %6916 = vpow2.f32 %v5923_v6  ;;  %v4544_v39 = vadd.f32 1.0, %v6889_v59  ;;  %v5919_v29 = vmul.f32 -1.442695, %v4254_v19  ;;  %v11874_v59 = vld [vmem:[#allocation45_spill] sm:$0xff] }
 0x3d2   : > { %4785 = vmatpush1.xpose.msra.mxu0 %v10274_v56  ;;  %v10545_v50 = vpop.eup %6892  ;;  %6918 = vrcp.f32 %v4545_v43  ;;  %v4547_v41 = vadd.f32 1.0, %v6891_v45  ;;  %v11862_v56 = vld [vmem:[#allocation30_spill] sm:$0xff] }
 0x3d3   : > { %4786 = vmatprep.subr.mxu0 %v10264_v31  ;;  %v10549_v9 = vpop.eup %6894  ;;  %6920 = vrcp.f32 %v4546_v40 }
 0x3d4   : > { %v6897_v11 = vpop.eup %6896  ;;  %6922 = vrcp.f32 %v4547_v41  ;;  %v11875_v41 = vld [vmem:[#allocation87_spill] sm:$0xff] }
 0x3d5   : > { %v6899_v46 = vpop.eup %6898  ;;  %6924 = vpow2.f32 %v5920_v57  ;;  %v4542_v47 = vadd.f32 1.0, %v6897_v11  ;;  %v11876_v11 = vld [vmem:[#allocation101_spill] sm:$0xff] }
 0x3d6   : > { %4787 = vmatpush1.xpose.msra.mxu0 %v11862_v56  ;;  %v6901_v15 = vpop.eup %6900  ;;  %6926 = vpow2.f32 %v5921_v0  ;;  %v4541_v7 = vadd.f32 1.0, %v6899_v46 }
 0x3d7   : > { %4788 = vmatprep.subr.mxu0 %v11863_v24  ;;  %v6903_v63 = vpop.eup %6902  ;;  %6928 = vrcp.f32 %v4544_v39  ;;  %v11877_v24 = vld [vmem:[#allocation96_spill] sm:$0xff] }
 0x3d8   : > { %v6905_v31 = vpop.eup %6904  ;;  %6930 = vrcp.f32 %v4543_v53 }
 0x3d9   : > { %v6907_v5 = vpop.eup %6906  ;;  %6932 = vpow2.f32 %v5918_v8  ;;  %v4540_v17 = vadd.f32 1.0, %v6905_v31 }
 0x3da   : > { %4789 = vmatpush1.xpose.msra.mxu0 %v11864_v25  ;;  %v6909_v60 = vpop.eup %6908  ;;  %6934 = vpow2.f32 %v5919_v29  ;;  %v4539_v55 = vadd.f32 1.0, %v6907_v5 }
 0x3db   : > { %4790 = vmatprep.subr.mxu0 %v11865_v38  ;;  %v6911_v28 = vpop.eup %6910  ;;  %6936 = vrcp.f32 %v4542_v47 }
 0x3dc   : > { %v6913_v48 = vpop.eup %6912  ;;  %6938 = vrcp.f32 %v4541_v7  ;;  %v4535_v6 = vadd.f32 1.0, %v6911_v28  ;;  %v11880_v28 = vld [vmem:[#allocation105_spill] sm:$0xff] }
 0x3dd   : > { %v6915_v18 = vpop.eup %6914  ;;  %6940 = vtanh.f32 %v11866_v22  ;;  %v4538_v49 = vadd.f32 1.0, %v6913_v48 }
 0x3de   : > { %4791 = vmatpush1.xpose.msra.mxu0 %v11867_v52  ;;  %v6917_v32 = vpop.eup %6916  ;;  %6942 = vtanh.f32 %v11868_v4  ;;  %v4537_v12 = vadd.f32 1.0, %v6915_v18 }
 0x3df   : > { %4792 = vmatprep.subr.mxu0 %v11869_v26  ;;  %v6919_v51 = vpop.eup %6918  ;;  %6944 = vrcp.f32 %v4540_v17  ;;  %v4536_v58 = vadd.f32 1.0, %v6917_v32 }
 0x3e0   : > { %v6921_v37 = vpop.eup %6920  ;;  %6946 = vrcp.f32 %v4539_v55  ;;  %v4737_v1 = vmul.f32 %v6919_v51, %v6901_v15 }
 0x3e1   : > { %v6923_v62 = vpop.eup %6922  ;;  %6948 = vtanh.f32 %v11870_v44  ;;  %v4738_v35 = vmul.f32 %v6921_v37, %v6903_v63  ;;  %v11878_v63 = vld [vmem:[#allocation97_spill] sm:$0xff] }
 0x3e2   : > { %4793 = vmatpush1.xpose.msra.mxu0 %v11871_v34  ;;  %v6925_v13 = vpop.eup %6924  ;;  %6950 = vtanh.f32 %v11872_v30  ;;  %v4739_v33 = vmul.f32 %v6923_v62, %v6909_v60  ;;  %v11879_v60 = vld [vmem:[#allocation94_spill] sm:$0xff] }
 0x3e3   : > { %v6927_v61 = vpop.eup %6926  ;;  %6952 = vrcp.f32 %v4538_v49  ;;  %v4533_v57 = vadd.f32 1.0, %v6925_v13 }
 0x3e4   : > { %v6929_v10 = vpop.eup %6928  ;;  %6954 = vrcp.f32 %v4537_v12  ;;  %4794 = vmatprep.subr.mxu0 %v4739_v33  ;;  %v4534_v40 = vadd.f32 1.0, %v6927_v61 }
 0x3e5   : > { %v6931_v43 = vpop.eup %6930  ;;  %6956 = vtanh.f32 %v11873_v27  ;;  %v4736_v45 = vmul.f32 %v6929_v10, %v10549_v9  ;;  %v11883_v10 = vld [vmem:[#allocation113_spill] sm:$0xff]  ;;  %v11892_v27 = vld [vmem:[#allocation31_spill] sm:$0xff] }
 0x3e6   : > { %4795 = vmatpush2.xpose.msra.mxu0 %v4738_v35  ;;  %v6933_v36 = vpop.eup %6932  ;;  %6958 = vtanh.f32 %v11874_v59  ;;  %v4735_v19 = vmul.f32 %v6931_v43, %v10545_v50  ;;  %v11881_v35 = vld [vmem:[#allocation116_spill] sm:$0xff] }
 0x3e7   : > { %4796 = vmatprep.subr.mxu0 %v4737_v1  ;;  %v6935_v2 = vpop.eup %6934  ;;  %6960 = vrcp.f32 %v4536_v58  ;;  %v4531_v15 = vadd.f32 1.0, %v6933_v36  ;;  %v11885_v1 = vld [vmem:[#allocation38_spill] sm:$0xff] }
 0x3e8   : > { %v6937_v16 = vpop.eup %6936  ;;  %6962 = vrcp.f32 %v4535_v6  ;;  %v4532_v46 = vadd.f32 1.0, %v6935_v2  ;;  %v11884_v6 = vld [vmem:[#allocation107_spill] sm:$0xff]  ;;  %v11893_v36 = vld [vmem:[#allocation42_spill] sm:$0xff] }
 0x3e9   : > { %v6939_v0 = vpop.eup %6938  ;;  %6964 = vtanh.f32 %v11875_v41  ;;  %v11894_v59 = vmax.f32 %v11893_v36, 0.0  ;;  %v11895_v2 = vld [vmem:[#allocation131_spill] sm:$0xff] }
 0x3ea   : > { %4797 = vmatpush2.xpose.msra.mxu0 %v4736_v45  ;;  %v6941_v39 = vpop.eup %6940  ;;  %6966 = vtanh.f32 %v11876_v11  ;;  %v11897_v45 = vld [vmem:[#allocation130_spill] sm:$0xff] }
 0x3eb   : > { %4798 = vmatprep.subr.mxu0 %v4735_v19  ;;  %v6943_v53 = vpop.eup %6942  ;;  %6968 = vrcp.f32 %v4534_v40  ;;  %v4734_v8 = vmul.f32 %v6941_v39, %v6937_v16  ;;  %v11896_v40 = vmax.f32 %v11895_v2, 0.0  ;;  %v11898_v16 = vmax.f32 %v11897_v45, 0.0  ;;  %v11903_v39 = vld [vmem:[#allocation127_spill] sm:$0xff] }
 0x3ec   : > { %v6945_v56 = vpop.eup %6944  ;;  %6970 = vrcp.f32 %v4533_v57  ;;  %v4733_v9 = vmul.f32 %v6943_v53, %v6939_v0  ;;  %v11899_v57 = vld [vmem:[#allocation132_spill] sm:$0xff]  ;;  %v11901_v0 = vld [vmem:[#allocation129_spill] sm:$0xff]  ;;  %v11904_v11 = vmax.f32 %v11903_v39, 0.0  ;;  %v11905_v53 = vld [vmem:[#allocation126_spill] sm:$0xff] }
 0x3ed   : > { %v6947_v29 = vpop.eup %6946  ;;  %6972 = vtanh.f32 %v11877_v24  ;;  %v11900_v19 = vmax.f32 %v11899_v57, 0.0  ;;  %v11902_v41 = vmax.f32 %v11901_v0, 0.0 }
 0x3ee   : > { %4799 = vmatpush2.xpose.msra.mxu0 %v4734_v8  ;;  %v6949_v50 = vpop.eup %6948  ;;  %6974 = vtanh.f32 %v11878_v63  ;;  %v11907_v8 = vld [vmem:[#allocation128_spill] sm:$0xff] }
 0x3ef   : > { %4800 = vmatprep.subr.mxu0 %v4733_v9  ;;  %v6951_v47 = vpop.eup %6950  ;;  %6976 = vrcp.f32 %v4532_v46  ;;  %v4732_v31 = vmul.f32 %v6949_v50, %v6945_v56  ;;  %v11906_v46 = vmax.f32 %v11905_v53, 0.0  ;;  %v11908_v56 = vmax.f32 %v11907_v8, 0.0  ;;  %v11913_v50 = vld [vmem:[#allocation91_spill] sm:$0xff] }
 0x3f0   : > { %v6953_v7 = vpop.eup %6952  ;;  %6978 = vrcp.f32 %v4531_v15  ;;  %v4731_v5 = vmul.f32 %v6951_v47, %v6947_v29  ;;  %v11909_v15 = vld [vmem:[#allocation125_spill] sm:$0xff]  ;;  %v11911_v29 = vld [vmem:[#allocation124_spill] sm:$0xff]  ;;  %v11914_v63 = vmax.f32 %v11913_v50, 0.0 }
 0x3f1   : > { %v6955_v25 = vpop.eup %6954  ;;  %6980 = vtanh.f32 %v11879_v60  ;;  %v11910_v9 = vmax.f32 %v11909_v15, 0.0  ;;  %v11912_v24 = vmax.f32 %v11911_v29, 0.0  ;;  %v11915_v47 = vld [vmem:[#allocation89_spill] sm:$0xff] }
 0x3f2   : > { %4801 = vmatpush2.xpose.msra.mxu0 %v4732_v31  ;;  %v6957_v38 = vpop.eup %6956  ;;  %6982 = vtanh.f32 %v11880_v28  ;;  %v11916_v31 = vmax.f32 %v11915_v47, 0.0 }
 0x3f3   : > { %4802 = vmatprep.subr.mxu0 %v4731_v5  ;;  %v6959_v17 = vpop.eup %6958  ;;  %v4730_v48 = vmul.f32 %v6957_v38, %v6953_v7  ;;  %v11917_v7 = vld [vmem:[#allocation123_spill] sm:$0xff]  ;;  %v11921_v38 = vld [vmem:[#allocation121_spill] sm:$0xff] }
 0x3f4   : > { %v6961_v55 = vpop.eup %6960  ;;  %v4729_v18 = vmul.f32 %v6959_v17, %v6955_v25  ;;  %v11918_v5 = vmax.f32 %v11917_v7, 0.0  ;;  %v11919_v25 = vld [vmem:[#allocation122_spill] sm:$0xff]  ;;  %v11922_v28 = vmax.f32 %v11921_v38, 0.0  ;;  %v11923_v17 = vld [vmem:[#allocation83_spill] sm:$0xff] }
 0x3f5   : > { %v6963_v22 = vpop.eup %6962  ;;  %v11920_v60 = vmax.f32 %v11919_v25, 0.0 }
 0x3f6   : > { %4803 = vmatpush2.xpose.msra.mxu0 %v4730_v48  ;;  %v6965_v52 = vpop.eup %6964  ;;  %v11924_v48 = vmax.f32 %v11923_v17, 0.0 }
 0x3f7   : > { %4804 = vmatprep.subr.mxu0 %v4729_v18  ;;  %v6967_v32 = vpop.eup %6966  ;;  %v4728_v4 = vmul.f32 %v6965_v52, %v6961_v55  ;;  %v11925_v55 = vld [vmem:[#allocation120_spill] sm:$0xff] }
 0x3f8   : > { %v6969_v26 = vpop.eup %6968  ;;  %v4727_v51 = vmul.f32 %v6967_v32, %v6963_v22  ;;  %v11926_v18 = vmax.f32 %v11925_v55, 0.0  ;;  %v11927_v22 = vld [vmem:[#allocation39_spill] sm:$0xff]  ;;  %v11929_v32 = vld [vmem:[#allocation78_spill] sm:$0xff] }
 0x3f9   : > { %v6971_v49 = vpop.eup %6970  ;;  %v11928_v52 = vmax.f32 %v11927_v22, 0.0 }
 0x3fa   : > { %4805 = vmatpush2.xpose.msra.mxu0 %v4728_v4  ;;  %v6973_v37 = vpop.eup %6972  ;;  %v11930_v4 = vmax.f32 %v11929_v32, 0.0 }
 0x3fb   : > { %4806 = vmatprep.subr.mxu0 %v4727_v51  ;;  %v6975_v12 = vpop.eup %6974  ;;  %v4726_v62 = vmul.f32 %v6973_v37, %v6969_v26  ;;  %v11931_v26 = vld [vmem:[#allocation119_spill] sm:$0xff] }
 0x3fc   : > { %v6977_v44 = vpop.eup %6976  ;;  %v4725_v34 = vmul.f32 %v6975_v12, %v6971_v49  ;;  %v11932_v51 = vmax.f32 %v11931_v26, 0.0  ;;  %v11933_v49 = vld [vmem:[#allocation118_spill] sm:$0xff]  ;;  %v11935_v12 = vld [vmem:[#allocation115_spill] sm:$0xff] }
 0x3fd   : > { %v6979_v13 = vpop.eup %6978  ;;  %v11934_v37 = vmax.f32 %v11933_v49, 0.0 }
 0x3fe   : > { %4807 = vmatpush2.xpose.msra.mxu0 %v4726_v62  ;;  %v6981_v30 = vpop.eup %6980  ;;  %v11936_v62 = vmax.f32 %v11935_v12, 0.0 }
 0x3ff   : > { %4808 = vmatprep.subr.mxu0 %v4725_v34  ;;  %v6983_v33 = vpop.eup %6982  ;;  %v4724_v61 = vmul.f32 %v6981_v30, %v6977_v44  ;;  %v11937_v44 = vld [vmem:[#allocation114_spill] sm:$0xff] }
 0x400   : > { %v4723_v58 = vmul.f32 %v6983_v33, %v6979_v13  ;;  %v11938_v34 = vmax.f32 %v11937_v44, 0.0  ;;  %v11939_v13 = vld [vmem:[#allocation117_spill] sm:$0xff]  ;;  %v11941_v33 = vld [vmem:[#allocation112_spill] sm:$0xff] }
 0x401   : > { %v11940_v30 = vmax.f32 %v11939_v13, 0.0 }
 0x402   : > { %4809 = vmatpush2.xpose.msra.mxu0 %v4724_v61  ;;  %v11942_v61 = vmax.f32 %v11941_v33, 0.0 }
 0x403   : > { %4810 = vmatprep.subr.mxu0 %v4723_v58  ;;  %v11943_v58 = vld [vmem:[#allocation109_spill] sm:$0xff] }
 0x406   : > { %4811 = vmatpush2.xpose.msra.mxu0 %v10502_v54  ;;  %v11887_v54 = vld [vmem:[#allocation29_spill] sm:$0xff] }
 0x407   : > { %4812 = vmatprep.subr.mxu0 %v10499_v42  ;;  %v11888_v42 = vld [vmem:[#allocation36_spill] sm:$0xff] }
 0x40a   : > { %4813 = vmatpush2.xpose.msra.mxu0 %v10492_v3  ;;  %v11889_v3 = vld [vmem:[#allocation46_spill] sm:$0xff] }
 0x40b   : > { %4814 = vmatprep.subr.mxu0 %v10484_v14  ;;  %v11890_v14 = vld [vmem:[#allocation35_spill] sm:$0xff] }
 0x40e   : > { %4815 = vmatpush2.xpose.msra.mxu0 %v10478_v21  ;;  %v11891_v21 = vld [vmem:[#allocation43_spill] sm:$0xff] }
 0x40f   : > { %4816 = vmatprep.subr.mxu0 %v11881_v35  ;;  %v4755_v43 = vrot.slane %v11891_v21, %v11890_v14  ;;  %v11944_v35 = vmax.f32 %v11943_v58, 0.0  ;;  %v11953_v21 = vld [vmem:[#allocation99_spill] sm:$0xff] }
 0x412   : > { %4817 = vmatpush2.xpose.msra.mxu0 %v11882_v20  ;;  %v11945_v20 = vld [vmem:[#allocation108_spill] sm:$0xff] }
 0x413   : > { %4818 = vmatprep.subr.mxu0 %v11883_v10  ;;  %v11946_v10 = vmax.f32 %v11945_v20, 0.0 }
 0x416   : > { %4819 = vmatpush2.xpose.msra.mxu0 %v11884_v6  ;;  %v11947_v6 = vld [vmem:[#allocation111_spill] sm:$0xff] }
 0x417   : > { %4820 = vmatprep.subr.mxu0 %v11885_v1  ;;  %v11948_v1 = vmax.f32 %v11947_v6, 0.0 }
 0x41a   : > { %4821 = vmatpush2.xpose.msra.mxu0 %v11886_v23  ;;  %v11949_v23 = vld [vmem:[#allocation104_spill] sm:$0xff] }
 0x41b   : > { %4822 = vmatprep.subr.mxu0 %v11887_v54  ;;  %v11950_v54 = vmax.f32 %v11949_v23, 0.0 }
 0x41e   : > { %4823 = vmatpush2.xpose.msra.mxu0 %v11888_v42  ;;  %v11951_v42 = vld [vmem:[#allocation100_spill] sm:$0xff] }
 0x41f   : > { %4824 = vmatprep.subr.mxu0 %v11889_v3  ;;  %v11952_v3 = vmax.f32 %v11951_v42, 0.0 }
 0x422   : > { %4825 = vmatpush2.xpose.msra.mxu0 %v11892_v27  ;;  %v11955_v27 = vld [vmem:[#allocation102_spill] sm:$0xff] }
 0x423   : > { %4985 = vmatprep.subr.mxu0 %v11894_v59  ;;  %v11956_v36 = vmax.f32 %v11955_v27, 0.0  ;;  %v11957_v59 = vld [vmem:[#allocation92_spill] sm:$0xff] }
 0x424   : > { %v11958_v2 = vmax.f32 %v11957_v59, 0.0 }
 0x425   : > { %4827 = vmatmul.mubr.f32.vlgmr.msra.gmra.mxu0 %v4755_v43  ;;  %v11954_v43 = vmax.f32 %v11953_v21, 0.0 }
 0x426   : > { %4986 = vmatpush1.msra.mxu0 %v11896_v40  ;;  %v11959_v40 = vld [vmem:[#allocation157_spill] sm:$0xff] }
 0x427   : > { %4987 = vmatprep.subr.mxu0 %v11898_v16  ;;  %v11960_v45 = vmax.f32 %v11959_v40, 0.0  ;;  %v11961_v16 = vld [vmem:[#allocation88_spill] sm:$0xff] }
 0x428   : > { %4988 = vmatpush1.msra.mxu0 %v11900_v19  ;;  %v11962_v57 = vmax.f32 %v11961_v16, 0.0  ;;  %v11963_v19 = vld [vmem:[#allocation158_spill] sm:$0xff] }
 0x429   : > { %4989 = vmatprep.subr.mxu0 %v11902_v41  ;;  %v11964_v0 = vmax.f32 %v11963_v19, 0.0  ;;  %v11965_v41 = vld [vmem:[#allocation85_spill] sm:$0xff]  ;;  %v7239_v19 = vmov 1966171168  }
 0x42a   : > { %4990 = vmatpush1.msra.mxu0 %v11904_v11  ;;  %v11966_v39 = vmax.f32 %v11965_v41, 0.0  ;;  %v11967_v11 = vld [vmem:[#allocation155_spill] sm:$0xff] }
 0x42b   : > { %4991 = vmatprep.subr.mxu0 %v11906_v46  ;;  %v11968_v53 = vmax.f32 %v11967_v11, 0.0  ;;  %v11969_v46 = vld [vmem:[#allocation154_spill] sm:$0xff] }
 0x42c   : > { %4992 = vmatpush1.msra.mxu0 %v11908_v56  ;;  %v11970_v8 = vmax.f32 %v11969_v46, 0.0  ;;  %v11971_v56 = vld [vmem:[#allocation156_spill] sm:$0xff] }
 0x42d   : > { %4993 = vmatprep.subr.mxu0 %v11910_v9  ;;  %v11972_v15 = vmax.f32 %v11971_v56, 0.0  ;;  %v11973_v9 = vld [vmem:[#allocation80_spill] sm:$0xff] }
 0x42e   : > { %4994 = vmatpush1.msra.mxu0 %v11912_v24  ;;  %v11974_v29 = vmax.f32 %v11973_v9, 0.0  ;;  %v11975_v24 = vld [vmem:[#allocation151_spill] sm:$0xff] }
 0x42f   : > { %4995 = vmatprep.subr.mxu0 %v11914_v63  ;;  %v11976_v50 = vmax.f32 %v11975_v24, 0.0  ;;  %v11977_v63 = vld [vmem:[#allocation150_spill] sm:$0xff] }
 0x430   : > { %4996 = vmatpush1.msra.mxu0 %v11916_v31  ;;  %v11978_v47 = vmax.f32 %v11977_v63, 0.0  ;;  %v11979_v31 = vld [vmem:[#allocation152_spill] sm:$0xff] }
 0x431   : > { %4997 = vmatprep.subr.mxu0 %v11918_v5  ;;  %v11980_v7 = vmax.f32 %v11979_v31, 0.0  ;;  %v11981_v5 = vld [vmem:[#allocation73_spill] sm:$0xff] }
 0x432   : > { %4998 = vmatpush1.msra.mxu0 %v11920_v60  ;;  %v11982_v25 = vmax.f32 %v11981_v5, 0.0  ;;  %v11983_v60 = vld [vmem:[#allocation147_spill] sm:$0xff] }
 0x433   : > { %4999 = vmatprep.subr.mxu0 %v11922_v28  ;;  %v11984_v38 = vmax.f32 %v11983_v60, 0.0  ;;  %v11985_v28 = vld [vmem:[#allocation146_spill] sm:$0xff]  ;;  %v4867_v60 = vld [vmem:[#allocation2] sm:$0x1] }
 0x434   : > { %5000 = vmatpush1.msra.mxu0 %v11924_v48  ;;  %v11986_v17 = vmax.f32 %v11985_v28, 0.0  ;;  %v11987_v48 = vld [vmem:[#allocation148_spill] sm:$0xff] }
 0x435   : > { %5001 = vmatprep.subr.mxu0 %v11926_v18  ;;  %v11988_v55 = vmax.f32 %v11987_v48, 0.0  ;;  %v11989_v18 = vld [vmem:[#allocation67_spill] sm:$0xff] }
 0x436   : > { %5002 = vmatpush1.msra.mxu0 %v11928_v52  ;;  %v11990_v22 = vmax.f32 %v11989_v18, 0.0  ;;  %v11991_v52 = vld [vmem:[#allocation143_spill] sm:$0xff] }
 0x437   : > { %5003 = vmatprep.subr.mxu0 %v11930_v4  ;;  %v11992_v32 = vmax.f32 %v11991_v52, 0.0  ;;  %v11993_v4 = vld [vmem:[#allocation142_spill] sm:$0xff] }
 0x438   : > { %5004 = vmatpush1.msra.mxu0 %v11932_v51  ;;  %v11994_v26 = vmax.f32 %v11993_v4, 0.0  ;;  %v11995_v51 = vld [vmem:[#allocation144_spill] sm:$0xff] }
 0x439   : > { %5005 = vmatprep.subr.mxu0 %v11934_v37  ;;  %v11996_v49 = vmax.f32 %v11995_v51, 0.0  ;;  %v11997_v37 = vld [vmem:[#allocation61_spill] sm:$0xff] }
 0x43a   : > { %5006 = vmatpush1.msra.mxu0 %v11936_v62  ;;  %v11998_v12 = vmax.f32 %v11997_v37, 0.0  ;;  %v11999_v62 = vld [vmem:[#allocation139_spill] sm:$0xff] }
 0x43b   : > { %5007 = vmatprep.subr.mxu0 %v11938_v34  ;;  %v12000_v44 = vmax.f32 %v11999_v62, 0.0  ;;  %v12001_v34 = vld [vmem:[#allocation138_spill] sm:$0xff] }
 0x43c   : > { %5008 = vmatpush1.msra.mxu0 %v11940_v30  ;;  %v12002_v13 = vmax.f32 %v12001_v34, 0.0  ;;  %v12003_v30 = vld [vmem:[#allocation140_spill] sm:$0xff] }
 0x43d   : > { %5009 = vmatprep.subr.mxu0 %v11942_v61  ;;  %v12004_v33 = vmax.f32 %v12003_v30, 0.0  ;;  %v12005_v61 = vld [vmem:[#allocation55_spill] sm:$0xff] }
 0x43e   : > { %5010 = vmatpush1.msra.mxu0 %v11944_v35  ;;  %v12006_v58 = vmax.f32 %v12005_v61, 0.0  ;;  %v12007_v35 = vld [vmem:[#allocation75_spill] sm:$0xff] }
 0x43f   : > { %5011 = vmatprep.subr.mxu0 %v11946_v10  ;;  %v12008_v20 = vmax.f32 %v12007_v35, 0.0  ;;  %v12009_v10 = vld [vmem:[#allocation52_spill] sm:$0xff] }
 0x440   : > { %5012 = vmatpush1.msra.mxu0 %v11948_v1  ;;  %v12010_v6 = vmax.f32 %v12009_v10, 0.0  ;;  %v12011_v1 = vld [vmem:[#allocation136_spill] sm:$0xff] }
 0x441   : > { %5013 = vmatprep.subr.mxu0 %v11950_v54  ;;  %v12012_v23 = vmax.f32 %v12011_v1, 0.0  ;;  %v12013_v54 = vld [vmem:[#allocation49_spill] sm:$0xff] }
 0x442   : > { %5014 = vmatpush1.msra.mxu0 %v11952_v3  ;;  %v12014_v42 = vmax.f32 %v12013_v54, 0.0  ;;  %v12015_v3 = vld [vmem:[#allocation134_spill] sm:$0xff] }
 0x443   : > { %5015 = vmatprep.subr.mxu0 %v11954_v43  ;;  %v12016_v21 = vmax.f32 %v12015_v3, 0.0  ;;  %v12017_v43 = vld [vmem:[#allocation133_spill] sm:$0xff] }
 0x444   : > { %5016 = vmatpush1.msra.mxu0 %v11956_v36  ;;  %v12018_v27 = vmax.f32 %v12017_v43, 0.0  ;;  %v12019_v36 = vld [vmem:[#allocation135_spill] sm:$0xff] }
 0x445   : > { %5017 = vmatprep.subr.mxu0 %v11958_v2  ;;  %v12020_v59 = vmax.f32 %v12019_v36, 0.0  ;;  %v12021_v2 = vlaneseq }
 0x446   : > { %5018 = vmatpush2.msra.mxu0 %v11960_v45  ;;  %v4860_v45 = vstv %s5935_s27 }
 0x447   : > { %5019 = vmatprep.subr.mxu0 %v11962_v57  ;;  %v10718_v40 = vand.u32 127, %v12021_v2  ;;  %vm4853_vm5 = vcmp.lt.s32.totalorder %v12021_v2, 256  ;;  %vm5086_vm7 = vcmp.lt.s32.totalorder %v12021_v2, 512 }
 0x448   : > { %5020 = vmatpush2.msra.mxu0 %v11964_v0  ;;  %v4837_v0 = vunpack.c.l.s4 %v7239_v19 }
 0x449   : > { %5021 = vmatprep.subr.mxu0 %v11966_v39  ;;  %v4858_v57 = vadd.s32 128, %v10718_v40  ;;  %v4861_v41 = vadd.s32 %v4860_v45, %v10718_v40 }
 0x44a   : > { %5022 = vmatpush2.msra.mxu0 %v11968_v53  ;;  %v4745_v16 = vpop.permute.xlu0 %4744  ;;  %v4838_v53 = vunpack.c.0.s8 %v4837_v0 }
 0x44b   : > { %5023 = vmatprep.subr.mxu0 %v11970_v8  ;;  %v4750_v39 = vrot.slane %v4745_v16, %v11890_v14  ;;  %v4862_v11 = vadd.s32 %v4860_v45, %v4858_v57  ;;  %vm4863_vm2 = vcmp.lt.s32.totalorder %v4861_v41, 300 }
 0x44c   : > { %5024 = vmatpush2.msra.mxu0 %v11972_v15 }
 0x44d   : > { %5025 = vmatprep.subr.mxu0 %v11974_v29  ;;  %vm4864_vm3 = vcmp.lt.s32.totalorder %v4862_v11, 300  ;;  %v12022_v29 = vld [vmem:[#allocation32_spill] sm:$0xff] }
 0x44e   : > { %5026 = vmatpush2.msra.mxu0 %v11976_v50  ;;  %v4841_v24 = vsub.s32 %v4838_v53, %v12022_v29 }
 0x44f   : > { %5027 = vmatprep.subr.mxu0 %v11978_v47 }
 0x450   : > { %5028 = vmatpush2.msra.mxu0 %v11980_v7 }
 0x451   : > { %5029 = vmatprep.subr.mxu0 %v11982_v25 }
 0x452   : > { %5030 = vmatpush2.msra.mxu0 %v11984_v38 }
 0x453   : > { %5031 = vmatprep.subr.mxu0 %v11986_v17 }
 0x454   : > { %5032 = vmatpush2.msra.mxu0 %v11988_v55 }
 0x455   : > { %5033 = vmatprep.subr.mxu0 %v11990_v22 }
 0x456   : > { %5034 = vmatpush2.msra.mxu0 %v11992_v32 }
 0x457   : > { %5035 = vmatprep.subr.mxu0 %v11994_v26 }
 0x458   : > { %5036 = vmatpush2.msra.mxu0 %v11996_v49 }
 0x459   : > { %5037 = vmatprep.subr.mxu0 %v11998_v12 }
 0x45a   : > { %5038 = vmatpush2.msra.mxu0 %v12000_v44  ;;  %v4893_v44 = vld [vmem:[#allocation3] sm:$0x1] }
 0x45b   : > { %5039 = vmatprep.subr.mxu0 %v12002_v13 }
 0x45c   : > { %5040 = vmatpush2.msra.mxu0 %v12004_v33 }
 0x45d   : > { %5041 = vmatprep.subr.mxu0 %v12006_v58 }
 0x45e   : > { %5042 = vmatpush2.msra.mxu0 %v12008_v20 }
 0x45f   : > { %5043 = vmatprep.subr.mxu0 %v12010_v6 }
 0x460   : > { %5044 = vmatpush2.msra.mxu0 %v12012_v23 }
 0x461   : > { %5045 = vmatprep.subr.mxu0 %v12014_v42  ;;  %v4903_v42 = vld [vmem:[#allocation4] sm:$0xf] }
 0x462   : > { %5046 = vmatpush2.msra.mxu0 %v12016_v21 }
 0x463   : > { %5047 = vmatprep.subr.mxu0 %v12018_v27 }
 0x464   : > { %5048 = vmatpush2.msra.mxu0 %v12020_v59 }
 0x4e5   : > { %v4828_v46 = vpop.f32.mrf.mxu0 }
 0x4e6   : > { %v4829_v8 = vadd.f32 %v4828_v46, %v4750_v39 }
 0x4e7   : > { %v4830_v56 = vpop.f32.mrf.mxu0 }
 0x4e8   : > { %v4865_v15 = vsel %vm4863_vm2, %v4829_v8, -inf  ;;  %v4831_v9 = vadd.f32 %v4830_v56, %v4750_v39 }
 0x4e9   : > { %v4869_v47 = vsel %vm4868_vm4, %v4865_v15, -inf }
 0x4ea   : > { %v4835_v50 = vcombine.low %v4829_v8, %v4831_v9  ;;  %v4866_v63 = vsel %vm4864_vm3, %v4831_v9, -inf }
 0x4eb   : > { %v4870_v31 = vsel %vm4868_vm4, %v4866_v63, -inf }
 0x4ec   : > { %v4842_v7 = vrot.slane %v4835_v50, %v4841_v24  ;;  %v4871_v5 = vmax.f32 %v4869_v47, %v4870_v31 }
 0x4ee   : > { %v4849_v25 = vrot.slane %v4842_v7, %v4841_v24  ;;  %4872 = vmax.xlane.f32.xlu0 %v4871_v5 }
 0x4f0   : > { %4855 = vst.msk [vmem:[%s7472_s5] sm:$0x3] %vm4853_vm5, %v4849_v25 }
 0x577   : > { %v4873_v38 = vpop.xlane.xlu0 %4872 }
 0x578   : > { %v4874_v28 = vmax.f32 %v4867_v60, %v4873_v38 }
 0x57a   : > { %v4875_v17 = vsub.f32 %v4867_v60, %v4874_v28  ;;  %5089 = vst.msk [vmem:[#allocation2] sm:$0x1] %vm4901_vm6, %v4874_v28  ;;  %4880 = vperm.xlu1 %6119, %v4874_v28  }
 0x57c   : > { %v4876_v48 = vmul.f32 1.442695, %v4875_v17 }
 0x57e   : > { %6984 = vpow2.f32 %v4876_v48 }
 0x58b   : > { %v6985_v55 = vpop.eup %6984 }
 0x58c   : > { %4906 = vperm.xlu0 %6118, %v6985_v55   ;;  %v4894_v34 = vmul.f32 %v6985_v55, %v4893_v44 }
 0x5f5   : > { %v4881_v18 = vpop.permute.xlu1 %4880 }
 0x5f6   : > { %v4886_v22 = vrot.slane %v4881_v18, %v11890_v14 }
 0x5f8   : > { %v4887_v52 = vsub.f32 %v4865_v15, %v4886_v22  ;;  %v4888_v32 = vsub.f32 %v4866_v63, %v4886_v22 }
 0x5fa   : > { %v4889_v4 = vmul.f32 1.442695, %v4887_v52  ;;  %v4891_v26 = vmul.f32 1.442695, %v4888_v32 }
 0x5fc   : > { %6986 = vpow2.f32 %v4889_v4 }
 0x5fd   : > { %6988 = vpow2.f32 %v4891_v26 }
 0x607   : > { %v4907_v58 = vpop.permute.xlu0 %4906 }
 0x608   : > { %v4912_v1 = vrot.slane %v4907_v58, %v11890_v14 }
 0x609   : > { %v6987_v51 = vpop.eup %6986 }
 0x60a   : > { %v6989_v49 = vpop.eup %6988  ;;  %v4895_v37 = vsel %vm4868_vm4, %v6987_v51, 0.0  ;;  %v4913_v21 = vmul.f32 %v4912_v1, %v4903_v42 }
 0x60b   : > { %4978 = vmatprep.mubr.f32.mxu1 %v6989_v49  ;;  %5049 = vmatprep.mubr.f32.mxu0 %v6989_v49  ;;  %v4896_v12 = vsel %vm4868_vm4, %v6989_v49, 0.0 }
 0x60c   : > { %4979 = vmatmul.mubr.f32.vlgmr.msra.gmra.mxu1 %v6987_v51  ;;  %5050 = vmatmul.mubr.f32.vlgmr.msra.gmra.mxu0 %v6987_v51  ;;  %v4897_v62 = vadd.f32 %v4896_v12, %v4895_v37 }
 0x60e   : > { %4898 = vadd.xlane.f32.xlu1 %v4897_v62 }
 0x697   : > { %v4899_v13 = vpop.xlane.xlu1 %4898 }
 0x698   : > { %v4900_v30 = vadd.f32 %v4899_v13, %v4894_v34 }
 0x69a   : > { %4902 = vst.msk [vmem:[#allocation3] sm:$0x1] %vm4901_vm6, %v4900_v30 }
 0x6cc   : > { %v4980_v33 = vpop.f32.mrf.mxu1  ;;  %v5051_v61 = vpop.f32.mrf.mxu0 }
 0x6ce   : > { %v4982_v35 = vpop.f32.mrf.mxu1  ;;  %v5053_v20 = vpop.f32.mrf.mxu0 }
 0x6cf   : > { %v5060_v10 = vcombine.low %v4980_v33, %v4982_v35  ;;  %v5061_v6 = vcombine.low %v5051_v61, %v5053_v20 }
 0x6d1   : > { %v5068_v23 = vrot.slane %v5060_v10, %v4841_v24  ;;  %v5075_v54 = vrot.slane %v5061_v6, %v4841_v24 }
 0x6d3   : > { %v5076_v3 = vcombine.low %v5068_v23, %v5075_v54 }
 0x6d5   : > { %v5083_v43 = vrot.slane %v5076_v3, %v4841_v24  ;;  %5093 = sbr.rel (%p5936_p8) target bundleno = 2531 (0x9e3), region = 84 }
 0x6d7   : > { %v5085_v27 = vadd.f32 %v5083_v43, %v4913_v21 }
 0x6d9   : > { %5088 = vst.msk [vmem:[#allocation4] sm:$0xf] %vm5086_vm7, %v5085_v27 }
 0x6da   : > { %v5095_v36 = vld [vmem:[#allocation3] sm:$0x1]  ;;  %v5138_v59 = vld [vmem:[%s11026_s9 + $0xf8] sm:$0xff]  ;;  %v7240_v45 = vmov 0   ;;  %v5137_v57 = vld [vmem:[%s11026_s9 + $0xf0] sm:$0xff]  ;;  %vm5333_vm8 = vcmask 8192  }
 0x6db   : > { %v5170_v14 = vld [vmem:[%s11026_s9 + $0x1f8] sm:$0xff]  ;;  %6992 = vset.pattern.permute.xlu0 %v7240_v45  ;;  %5951 = vmatprep.subr.mxu0 %v5138_v59  ;;  %v5169_v19 = vld [vmem:[%s11026_s9 + $0x1f0] sm:$0xff]  ;;  %v5136_v39 = vld [vmem:[%s11026_s9 + $0xe8] sm:$0xff] }
 0x6dc   : > { %v5122_v2 = vld [vmem:[%s11026_s9 + $0x78] sm:$0xff]  ;;  %5098 = vperm.xlu0 %6992, %v5095_v36   ;;  %5986 = vmatprep.subr.mxu1 %v5170_v14  ;;  %v5121_v0 = vld [vmem:[%s11026_s9 + $0x70] sm:$0xff]  ;;  %v5168_v11 = vld [vmem:[%s11026_s9 + $0x1e8] sm:$0xff] }
 0x6dd   : > { %v5154_v16 = vld [vmem:[%s11026_s9 + $0x178] sm:$0xff]  ;;  %v5153_v41 = vld [vmem:[%s11026_s9 + $0x170] sm:$0xff]  ;;  %5952 = vmatpush3.msra.mxu0 %v5122_v2  ;;  %v5120_v53 = vld [vmem:[%s11026_s9 + $0x68] sm:$0xff] }
 0x6de   : > { %5987 = vmatpush3.msra.mxu1 %v5154_v16  ;;  %5953 = vmatprep.subr.mxu0 %v5137_v57  ;;  %v5152_v46 = vld [vmem:[%s11026_s9 + $0x168] sm:$0xff]  ;;  %v5135_v8 = vld [vmem:[%s11026_s9 + $0xe0] sm:$0xff]  ;;  %v5134_v29 = vld [vmem:[%s11026_s9 + $0xd8] sm:$0xff] }
 0x6df   : > { %5988 = vmatprep.subr.mxu1 %v5169_v19  ;;  %5954 = vmatpush3.msra.mxu0 %v5121_v0  ;;  %v5167_v56 = vld [vmem:[%s11026_s9 + $0x1e0] sm:$0xff]  ;;  %v5166_v24 = vld [vmem:[%s11026_s9 + $0x1d8] sm:$0xff]  ;;  %v5133_v47 = vld [vmem:[%s11026_s9 + $0xd0] sm:$0xff] }
 0x6e0   : > { %5989 = vmatpush3.msra.mxu1 %v5153_v41  ;;  %5955 = vmatprep.subr.mxu0 %v5136_v39  ;;  %v5119_v15 = vld [vmem:[%s11026_s9 + $0x60] sm:$0xff]  ;;  %v5118_v50 = vld [vmem:[%s11026_s9 + $0x58] sm:$0xff]  ;;  %v5165_v31 = vld [vmem:[%s11026_s9 + $0x1d0] sm:$0xff] }
 0x6e1   : > { %5990 = vmatprep.subr.mxu1 %v5168_v11  ;;  %v5151_v9 = vld [vmem:[%s11026_s9 + $0x160] sm:$0xff]  ;;  %5956 = vmatpush3.msra.mxu0 %v5120_v53  ;;  %v5150_v63 = vld [vmem:[%s11026_s9 + $0x158] sm:$0xff]  ;;  %v5117_v7 = vld [vmem:[%s11026_s9 + $0x50] sm:$0xff] }
 0x6e2   : > { %5991 = vmatpush3.msra.mxu1 %v5152_v46  ;;  %5957 = vmatprep.subr.mxu0 %v5135_v8  ;;  %v5149_v5 = vld [vmem:[%s11026_s9 + $0x150] sm:$0xff]  ;;  %v5132_v25 = vld [vmem:[%s11026_s9 + $0xc8] sm:$0xff]  ;;  %v5131_v17 = vld [vmem:[%s11026_s9 + $0xc0] sm:$0xff] }
 0x6e3   : > { %5992 = vmatprep.subr.mxu1 %v5167_v56  ;;  %5958 = vmatpush3.msra.mxu0 %v5119_v15  ;;  %v5164_v60 = vld [vmem:[%s11026_s9 + $0x1c8] sm:$0xff]  ;;  %v5163_v48 = vld [vmem:[%s11026_s9 + $0x1c0] sm:$0xff]  ;;  %v5130_v22 = vld [vmem:[%s11026_s9 + $0xb8] sm:$0xff] }
 0x6e4   : > { %5993 = vmatpush3.msra.mxu1 %v5151_v9  ;;  %5959 = vmatprep.subr.mxu0 %v5134_v29  ;;  %v5116_v38 = vld [vmem:[%s11026_s9 + $0x48] sm:$0xff]  ;;  %v5115_v55 = vld [vmem:[%s11026_s9 + $0x40] sm:$0xff]  ;;  %v5162_v52 = vld [vmem:[%s11026_s9 + $0x1b8] sm:$0xff] }
 0x6e5   : > { %5994 = vmatprep.subr.mxu1 %v5166_v24  ;;  %5960 = vmatpush3.msra.mxu0 %v5118_v50  ;;  %v5148_v28 = vld [vmem:[%s11026_s9 + $0x148] sm:$0xff]  ;;  %v5147_v18 = vld [vmem:[%s11026_s9 + $0x140] sm:$0xff]  ;;  %v5114_v32 = vld [vmem:[%s11026_s9 + $0x38] sm:$0xff] }
 0x6e6   : > { %5995 = vmatpush3.msra.mxu1 %v5150_v63  ;;  %5961 = vmatprep.subr.mxu0 %v5133_v47  ;;  %v5146_v4 = vld [vmem:[%s11026_s9 + $0x138] sm:$0xff]  ;;  %v5129_v26 = vld [vmem:[%s11026_s9 + $0xb0] sm:$0xff]  ;;  %v5128_v12 = vld [vmem:[%s11026_s9 + $0xa8] sm:$0xff] }
 0x6e7   : > { %5996 = vmatprep.subr.mxu1 %v5165_v31  ;;  %5962 = vmatpush3.msra.mxu0 %v5117_v7  ;;  %v5161_v51 = vld [vmem:[%s11026_s9 + $0x1b0] sm:$0xff]  ;;  %v5160_v62 = vld [vmem:[%s11026_s9 + $0x1a8] sm:$0xff]  ;;  %v5127_v13 = vld [vmem:[%s11026_s9 + $0xa0] sm:$0xff] }
 0x6e8   : > { %5997 = vmatpush3.msra.mxu1 %v5149_v5  ;;  %5963 = vmatprep.subr.mxu0 %v5132_v25  ;;  %v5113_v49 = vld [vmem:[%s11026_s9 + $0x30] sm:$0xff]  ;;  %v5112_v44 = vld [vmem:[%s11026_s9 + $0x28] sm:$0xff]  ;;  %v5159_v30 = vld [vmem:[%s11026_s9 + $0x1a0] sm:$0xff] }
 0x6e9   : > { %5998 = vmatprep.subr.mxu1 %v5164_v60  ;;  %5964 = vmatpush3.msra.mxu0 %v5116_v38  ;;  %v5145_v37 = vld [vmem:[%s11026_s9 + $0x130] sm:$0xff]  ;;  %v5144_v34 = vld [vmem:[%s11026_s9 + $0x128] sm:$0xff]  ;;  %v5111_v33 = vld [vmem:[%s11026_s9 + $0x20] sm:$0xff] }
 0x6ea   : > { %5999 = vmatpush3.msra.mxu1 %v5148_v28  ;;  %5965 = vmatprep.subr.mxu0 %v5131_v17  ;;  %v5143_v61 = vld [vmem:[%s11026_s9 + $0x120] sm:$0xff]  ;;  %v5126_v58 = vld [vmem:[%s11026_s9 + $0x98] sm:$0xff]  ;;  %v5125_v6 = vld [vmem:[%s11026_s9 + $0x90] sm:$0xff] }
 0x6eb   : > { %6000 = vmatprep.subr.mxu1 %v5163_v48  ;;  %5966 = vmatpush3.msra.mxu0 %v5115_v55  ;;  %v5158_v35 = vld [vmem:[%s11026_s9 + $0x198] sm:$0xff]  ;;  %v5157_v1 = vld [vmem:[%s11026_s9 + $0x190] sm:$0xff]  ;;  %v5124_v42 = vld [vmem:[%s11026_s9 + $0x88] sm:$0xff] }
 0x6ec   : > { %6001 = vmatpush3.msra.mxu1 %v5147_v18  ;;  %5967 = vmatprep.subr.mxu0 %v5130_v22  ;;  %v5110_v20 = vld [vmem:[%s11026_s9 + $0x18] sm:$0xff]  ;;  %v5109_v23 = vld [vmem:[%s11026_s9 + $0x10] sm:$0xff]  ;;  %v5156_v3 = vld [vmem:[%s11026_s9 + $0x188] sm:$0xff] }
 0x6ed   : > { %6002 = vmatprep.subr.mxu1 %v5162_v52  ;;  %5968 = vmatpush3.msra.mxu0 %v5114_v32  ;;  %v5142_v10 = vld [vmem:[%s11026_s9 + $0x118] sm:$0xff]  ;;  %v5141_v54 = vld [vmem:[%s11026_s9 + $0x110] sm:$0xff]  ;;  %v5108_v21 = vld [vmem:[%s11026_s9 + $0x8] sm:$0xff] }
 0x6ee   : > { %6003 = vmatpush3.msra.mxu1 %v5146_v4  ;;  %5969 = vmatprep.subr.mxu0 %v5129_v26  ;;  %v5140_v43 = vld [vmem:[%s11026_s9 + $0x108] sm:$0xff]  ;;  %v5123_v27 = vld [vmem:[%s11026_s9 + $0x80] sm:$0xff]  ;;  %v12025_v11 = vld [vmem:[#allocation32_spill] sm:$0xff] }
 0x6ef   : > { %6004 = vmatprep.subr.mxu1 %v5161_v51  ;;  %5970 = vmatpush3.msra.mxu0 %v5113_v49  ;;  %v5155_v36 = vld [vmem:[%s11026_s9 + $0x180] sm:$0xff]  ;;  %v12023_v2 = vld [vmem:[#allocation35_spill] sm:$0xff]  ;;  %v12026_v53 = vsub.s32 3, %v12025_v11  ;;  %v12027_v56 = vsub.s32 2, %v12025_v11 }
 0x6f0   : > { %6005 = vmatpush3.msra.mxu1 %v5145_v37  ;;  %5971 = vmatprep.subr.mxu0 %v5128_v12  ;;  %v5107_v59 = vld [vmem:[%s11026_s9] sm:$0xff] }
 0x6f1   : > { %6006 = vmatprep.subr.mxu1 %v5160_v62  ;;  %5972 = vmatpush3.msra.mxu0 %v5112_v44  ;;  %v5139_v14 = vld [vmem:[%s11026_s9 + $0x100] sm:$0xff] }
 0x6f2   : > { %6007 = vmatpush3.msra.mxu1 %v5144_v34  ;;  %5973 = vmatprep.subr.mxu0 %v5127_v13  ;;  %v5094_v57 = vld [vmem:[#allocation4] sm:$0xf]  ;;  %v12024_v41 = vld [vmem:[#allocation33_spill] sm:$0xff] }
 0x6f3   : > { %6008 = vmatprep.subr.mxu1 %v5159_v30  ;;  %5974 = vmatpush3.msra.mxu0 %v5111_v33  ;;  %v5171_v24 = vld [vmem:[%s11027_s10] sm:$0x1] }
 0x6f4   : > { %6009 = vmatpush3.msra.mxu1 %v5143_v61  ;;  %5975 = vmatprep.subr.mxu0 %v5126_v58 }
 0x6f5   : > { %6010 = vmatprep.subr.mxu1 %v5158_v35  ;;  %5976 = vmatpush3.msra.mxu0 %v5110_v20 }
 0x6f6   : > { %6011 = vmatpush3.msra.mxu1 %v5142_v10  ;;  %5977 = vmatprep.subr.mxu0 %v5125_v6 }
 0x6f7   : > { %6012 = vmatprep.subr.mxu1 %v5157_v1  ;;  %5978 = vmatpush3.msra.mxu0 %v5109_v23 }
 0x6f8   : > { %6013 = vmatpush3.msra.mxu1 %v5141_v54  ;;  %5979 = vmatprep.subr.mxu0 %v5124_v42 }
 0x6f9   : > { %6014 = vmatprep.subr.mxu1 %v5156_v3  ;;  %5980 = vmatpush3.msra.mxu0 %v5108_v21 }
 0x6fa   : > { %6015 = vmatpush3.msra.mxu1 %v5140_v43  ;;  %5981 = vmatprep.subr.mxu0 %v5123_v27 }
 0x6fb   : > { %6016 = vmatprep.subr.mxu1 %v5155_v36  ;;  %5982 = vmatpush3.msra.mxu0 %v5107_v59 }
 0x6fc   : > { %6017 = vmatpush3.msra.mxu1 %v5139_v14 }
 0x757   : > { %v5099_v45 = vpop.permute.xlu0 %5098 }
 0x758   : > { %v5104_v16 = vrot.slane %v5099_v45, %v12023_v2 }
 0x75a   : > { %6993 = vrcp.f32 %v5104_v16 }
 0x767   : > { %v6994_v19 = vpop.eup %6993 }
 0x768   : > { %v5106_v0 = vmul.f32 %v6994_v19, %v5094_v57 }
 0x76a   : > { %v5180_v39 = vrot.slane %v5106_v0, %v12024_v41  ;;  %v5188_v46 = vrot.slane %v5106_v0, %v12026_v53  ;;  %v5176_v8 = vrot.slane %v5106_v0, %v12023_v2  ;;  %v5184_v15 = vrot.slane %v5106_v0, %v12027_v56 }
 0x76c   : > { %5257 = vmatprep.mubr.f32.mxu0 %v5180_v39  ;;  %5327 = vmatprep.mubr.f32.mxu1 %v5188_v46 }
 0x76d   : > { %5258 = vmatmul.mubr.f32.vlgmr.msra.gmra.mxu0 %v5176_v8  ;;  %5328 = vmatmul.mubr.f32.vlgmr.msra.gmra.mxu1 %v5184_v15 }
 0x82d   : > { %v5983_v9 = vpop.f32.mrf.mxu0  ;;  %v6018_v29 = vpop.f32.mrf.mxu1 }
 0x82f   : > { %v5984_v50 = vpop.f32.mrf.mxu0  ;;  %v6019_v63 = vpop.f32.mrf.mxu1 }
 0x830   : > { %v5985_v47 = vadd.f32 %v5984_v50, %v5983_v9  ;;  %v6020_v7 = vadd.f32 %v6019_v63, %v6018_v29 }
 0x832   : > { %v5260_v31 = vadd.f32 %v5985_v47, %v5171_v24 }
 0x834   : > { %v5330_v5 = vadd.f32 %v6020_v7, %v5260_v31 }
 0x836   : > { %v5335_v25 = vsel %vm5333_vm8, %v5330_v5, -inf  ;;  %5334 = vst.msk [vmem:[#allocation12] sm:$0x1] %vm5333_vm8, %v5330_v5 }
 0x837   : > { %5336 = vmax.xlane.f32.xlu0 %v5335_v25 }
 0x8c0   : > { %v5337_v60 = vpop.xlane.xlu0 %5336 }
 0x8c1   : > { %v5338_v38 = vsub.f32 %v5330_v5, %v5337_v60  ;;  %vm5347_vm9 = vcmp.eq.f32.partialorder %v5330_v5, %v5337_v60 }
 0x8c2   : > { %v5348_v28 = vsel %vm5347_vm9, %v10718_v40, 2 }
 0x8c3   : > { %v5339_v17 = vmul.f32 1.442695, %v5338_v38  ;;  %v5349_v48 = vsel %vm5333_vm8, %v5348_v28, 2147483647 }
 0x8c4   : > { %v5351_v55 = vshra.s32 %v5349_v48, 16  ;;  %v5350_v32 = vand.u32 65535, %v5349_v48 }
 0x8c5   : > { %6995 = vpow2.f32 %v5339_v17 }
 0x8c6   : > { %v5353_v18 = vcvt.s32.f32 %v5351_v55  ;;  %v5352_v26 = vcvt.s32.f32 %v5350_v32 }
 0x8c8   : > { %5354 = vmin.xlane.f32.xlu1 %v5353_v18 }
 0x8d2   : > { %v6996_v22 = vpop.eup %6995 }
 0x8d3   : > { %v5341_v52 = vsel %vm5333_vm8, %v6996_v22, 0.0 }
 0x8d4   : > { %5342 = vadd.xlane.f32.xlu1 %v5341_v52 }
 0x951   : > { %v5355_v4 = vpop.xlane.xlu1 %5354 }
 0x952   : > { %vm5356_vm10 = vcmp.eq.f32.partialorder %v5353_v18, %v5355_v4  ;;  %v5361_v12 = vcvt.f32.s32 %v5355_v4 }
 0x953   : > { %v5357_v51 = vsel %vm5356_vm10, %v5352_v26, inf }
 0x954   : > { %5358 = vmin.xlane.f32.xlu1 %v5357_v51  ;;  %v5362_v44 = vshll.u32 %v5361_v12, 16 }
 0x95d   : > { %v5343_v49 = vpop.xlane.xlu1 %5342 }
 0x95e   : > { %6997 = vrcp.f32 %v5343_v49 }
 0x96b   : > { %v6998_v40 = vpop.eup %6997 }
 0x96c   : > { %v5345_v37 = vmul.f32 %v6998_v40, %v6996_v22 }
 0x96e   : > { %5346 = vst.msk [vmem:[#allocation13] sm:$0x1] %vm5333_vm8, %v5345_v37 }
 0x9dd   : > { %v5359_v62 = vpop.xlane.xlu1 %5358 }
 0x9de   : > { %v5360_v34 = vcvt.f32.s32 %v5359_v62 }
 0x9e0   : > { %v5363_v13 = vadd.s32 %v5362_v44, %v5360_v34 }
 0x9e2   : > { %5364 = vst.msk [vmem:[#allocation15] sm:$0x1] %vm4901_vm6, %v5363_v13 }
 0x9e3 PF: > { %s7241_s17 = smov [#allocation13]   ;;  %s7242_s18 = smov [#allocation12]  }
 0x9e4   : > { %s5388_s28 = sshll.u32 %s7241_s17, 4  ;;  %s5377_s19 = sshll.u32 %s7242_s18, 4  ;;  %s5389_s28 = int_to_ptr.vmem [resolvable:$true] %s5388_s28  ;;  %s5378_s19 = int_to_ptr.vmem [resolvable:$true] %s5377_s19 }
 0x9e5   : > { %s7079_s1 = scalar_lea.vmem %s5389_s28, 16  ;;  %p12028_p10 = scmp.eq.s32.totalorder %s7344_s8, 1 }
 0x9e6   : > { %p7080_p12 = scmp.ne.s32.totalorder %s5389_s28, %s7079_s1  ;;  %s7085_s24 = scalar_lea.vmem %s5389_s28, 32 }
 0x9e7   : > { %p7086_p11 = scmp.lt.s32.totalorder %s5389_s28, %s5389_s28  ;;  %p7087_p5 = scmp.lt.s32.totalorder %s7085_s24, %s7079_s1 }
 0x9e8   : > { %p7081_p0 = pnand %p7080_p12, %p12028_p10 }
 0x9e9   : > { %p7088_p7 = por %p7087_p5, %p7086_p11 }
 0x9ea   : > { %p7082_p3 = pneg %p7081_p0 }
 0x9ec   : > { %p7089_p13 = pnand %p7088_p7, %p7082_p3 }
 0x9ee   : > { %7092 = shalt.err (!%p7089_p13)
}
 0x9ef   : > { %p12029_p1 = pmov %p12028_p10  ;;  %s7103_s23 = scalar_lea.vmem %s5378_s19, 16 }
 0x9f0   : > { %p7104_p2 = scmp.ne.s32.totalorder %s5378_s19, %s7103_s23  ;;  %s7109_s30 = scalar_lea.vmem %s5378_s19, 32 }
 0x9f1   : > { %6034 = dma.vmem_to_hbm [thread:$0]  (%p12029_p1), %s5389_s28, 16, %s11029_s12, [#allocation14]  }
 0x9f2   : > { %p12030_p4 = pmov %p12029_p1  ;;  %p7110_p8 = scmp.lt.s32.totalorder %s5378_s19, %s5378_s19 }
 0x9f3   : > { %p7111_p12 = scmp.lt.s32.totalorder %s7109_s30, %s7103_s23 }
 0x9f4   : > { %p7105_p6 = pnand %p7104_p2, %p12030_p4 }
 0x9f5   : > { %p7112_p10 = por %p7111_p12, %p7110_p8 }
 0x9f6   : > { %p7106_p9 = pneg %p7105_p6 }
 0x9f8   : > { %p7113_p0 = pnand %p7112_p10, %p7106_p9 }
 0x9fa   : > { %7116 = shalt.err (!%p7113_p0)
}
 0x9fb   : > { %p12031_p3 = pmov %p12029_p1  ;;  %s7243_s27 = smov [#allocation15]  }
 0x9fc   : > { %s5399_s17 = sshll.u32 %s7243_s27, 4  ;;  %s5950_s28 = sshll.u32 %s7344_s8, 5  ;;  %s5400_s17 = int_to_ptr.vmem [resolvable:$true] %s5399_s17 }
 0x9fd   : > { %6032 = dma.vmem_to_hbm [thread:$0]  (%p12031_p3), %s5378_s19, 16, %s11028_s11, [#allocation8]  }
 0x9fe   : > { %s10964_s24 = scalar_lea.hbm %s11031_s14, %s5950_s28  ;;  %s7127_s20 = scalar_lea.vmem %s5400_s17, 16 }
 0x9ff   : > { %p7128_p11 = scmp.ne.s32.totalorder %s5400_s17, %s7127_s20  ;;  %p12032_p5 = pmov %p12029_p1 }
 0xa00   : > { %s7133_s22 = scalar_lea.vmem %s5400_s17, 32  ;;  %p7134_p1 = scmp.lt.s32.totalorder %s5400_s17, %s5400_s17 }
 0xa01   : > { %p7129_p7 = pnand %p7128_p11, %p12032_p5  ;;  %p7135_p2 = scmp.lt.s32.totalorder %s7133_s22, %s7127_s20 }
 0xa03   : > { %p7130_p13 = pneg %p7129_p7  ;;  %p7136_p4 = por %p7135_p2, %p7134_p1 }
 0xa05   : > { %p7137_p6 = pnand %p7136_p4, %p7130_p13 }
 0xa07   : > { %7140 = shalt.err (!%p7137_p6)
}
 0xa08   : > { %p12033_p9 = pmov %p12031_p3  ;;  %s5413_s30 = sshll.u32 %s7472_s5, 4  ;;  %s5414_s30 = int_to_ptr.vmem [resolvable:$true] %s5413_s30 }
 0xa09   : > { %s5366_s29 = scalar_lea.sflag [#allocation17], %s7457_s26  ;;  %s7151_s25 = scalar_lea.vmem %s5414_s30, 32 }
 0xa0a   : > { %6036 = dma.vmem_to_hbm [thread:$0]  (%p12033_p9), %s5400_s17, 16, %s11030_s13, [#allocation14]  }
 0xa0b   : > { %p7152_p8 = scmp.ne.s32.totalorder %s5414_s30, %s7151_s25  ;;  %p12034_p12 = scmp.ne.s32.totalorder %s11285_s21, 0 }
 0xa0c   : > { %s7244_s27 = smov [#allocation16]  }
 0xa0d   : > { %p7153_p10 = pnand %p7152_p8, %p12034_p12  ;;  %s7155_s28 = sshll.u32 %s7244_s27, 4  ;;  %s7156_s28 = int_to_ptr.vmem [resolvable:$false] %s7155_s28 }
 0xa0e   : > { %s7157_s18 = scalar_lea.vmem %s7156_s28, 64  ;;  %p7158_p3 = scmp.lt.s32.totalorder %s5414_s30, %s7156_s28 }
 0xa0f   : > { %p7154_p0 = pneg %p7153_p10  ;;  %p7159_p11 = scmp.lt.s32.totalorder %s7157_s18, %s7151_s25 }
 0xa11   : > { %p7160_p5 = por %p7159_p11, %p7158_p3 }
 0xa13   : > { %p7161_p7 = pnand %p7160_p5, %p7154_p0 }
 0xa15   : > { %7164 = shalt.err (!%p7161_p7)
}
 0xa16   : > { %s7165_s5 = scalar_lea.hbm %s10964_s24, 32  ;;  %s7169_s1 = scalar_lea.hbm %s11031_s14, 64 }
 0xa17   : > { %p7166_p13 = scmp.ne.s32.totalorder %s10964_s24, %s7165_s5  ;;  %p7170_p4 = scmp.lt.s32.totalorder %s10964_s24, %s11031_s14 }
 0xa18   : > { %p7171_p6 = scmp.lt.s32.totalorder %s7169_s1, %s7165_s5 }
 0xa19   : > { %p7167_p1 = pnand %p7166_p13, %p12034_p12 }
 0xa1a   : > { %p7172_p9 = por %p7171_p6, %p7170_p4 }
 0xa1b   : > { %p7168_p2 = pneg %p7167_p1 }
 0xa1d   : > { %p7173_p8 = pnand %p7172_p9, %p7168_p2 }
 0xa1f   : > { %7176 = shalt.err (!%p7173_p8)
}
 0xa20   : > { %6037 = dma.vmem_to_hbm [thread:$0]  (%p12034_p12), %s5414_s30, 32, %s10964_s24, %s5366_s29  }
 0xa21   : > { %p12035_p10 = scmp.eq.s32.totalorder %s7344_s8, 1 }
 0xa23   : > { %7202 = dma.done.wait (%p12035_p10), [#allocation8], 16   ;;  %p12036_p0 = pmov %p12035_p10 }
 0xa25   : > { %7204 = vsyncadd (%p12036_p0), [#allocation8], 4294967280  ;;  %p12037_p3 = pmov %p12036_p0 }
 0xa26   : > { %p12038_p11 = pmov %p12036_p0 }
 0xa27   : > { %7206 = dma.done.wait (%p12037_p3), [#allocation14], 32  }
 0xa28   : > { %7208 = vsyncadd (%p12038_p11), [#allocation14], 4294967264 }
 0xa29 PF: > { %s12039_s19 = sld [smem:[#allocation25_spill]]  ;;  %s5437_s25 = sand.u32 1, %s7215_s15  }
 0xa2a   : > { %s12040_s23 = sld [smem:[#allocation24_spill]]  ;;  %s5438_s21 = scalar_lea.sflag [#allocation17], %s5437_s25 }
 0xa2f   : > { %p12041_p5 = scmp.ne.s32.totalorder %s12039_s19, 0 }
 0xa30   : > { %p12042_p7 = scmp.ge.s32.totalorder %s12040_s23, 2 }
 0xa32   : > { %p6057_p13 = pnand %p12042_p7, %p12041_p5 }
 0xa34   : > { %p6058_p12 = pneg %p6057_p13 }
 0xa36   : > { %7210 = dma.done.wait (%p6058_p12), %s5438_s21, 32  }
 0xa37   : > { %7212 = vsyncadd (%p6058_p12), %s5438_s21, 4294967264  ;;  %s12043_s18 = sld [smem:[#allocation26_spill]]  ;;  %s12046_s15 = smov %s7219_s16 }
 0xa38   : > { %s12044_s24 = sld [smem:[#allocation23_spill]] }
 0xa39   : > { %s12045_s17 = sld [smem:[#allocation27_spill]] }
 0xa3d   : > { %p33_p1 = scmp.ge.s32.totalorder %s12043_s18, 4  }
 0xa3e   : > { %s12047_s16 = smov %s12044_s24 }
 0xa3f   :  { %35 = sbr.rel (!%p33_p1) target bundleno = 11 (0xb), region = 150 }
 0xa44   :  { %5443 = vsyncpa [#allocation7], 1 }
 0xa45   :  { %5445 = vsyncpa [#allocation7 + $0x1], 1 }
 0xa46   :  { %5446 = vsyncpa [#allocation10], 1 }
 0xa47   :  { %5447 = vsyncpa [#allocation8], 1 }
 0xa48   :  { %5449 = vsyncpa [#allocation8 + $0x1], 1 }
 0xa49   :  { %5450 = vsyncpa [#allocation14], 1 }
 0xa4a   :  { %5451 = vsyncpa [#allocation17], 1 }
 0xa4b   :  { %5453 = vsyncpa [#allocation17 + $0x1], 1 }

</bundles_post_ra>
